<compile_context>
chip_gen: v5e
topology: v5e:2x2
jax: 0.10.0
libtpu: 0.0.40
codegen_flags: <defaults>
</compile_context>

<pallas_src>
import jax
import jax.numpy as jnp
from jax.experimental import pallas as pl
from jax.experimental.pallas import tpu as pltpu


def _with_input_switch_kernel(pre_ref, x_ref, w_ref, b_ref, o_ref, acc_ref):
    """Computes one (tm, tn) output tile, accumulating over the K grid axis."""
    k = pl.program_id(2)

    @pl.when(k == 0)
    def _init():
        acc_ref[...] = jnp.zeros_like(acc_ref)

    # Hard Gumbel-softmax forward: mask = 1 iff (l1+g1) > (l0+g0)
    #   <=> (delta_logits + logistic_noise) > 0, pre-folded in the wrapper.
    # Ties -> 0, matching argmax index 0.  bf16 compare/select is VPU filler
    # under the MXU (executes in f32 on v5e, which has no bf16 VALU - fine).
    gate = pre_ref[...] > 0                                    # (tm, tk) bool
    on_off = jnp.where(gate, x_ref[...], jnp.zeros_like(x_ref[...]))

    # MXU matmul: bf16 inputs, f32 accumulation in the resident scratch.
    acc_ref[...] += jnp.dot(on_off, w_ref[...],
                            preferred_element_type=jnp.float32)

    @pl.when(k == pl.num_programs(2) - 1)
    def _finalize():
        o_ref[...] = (acc_ref[...] + b_ref[...]).astype(o_ref.dtype)


def _round_up(v, m):
    return pl.cdiv(v, m) * m


def _pad2(a, rows, cols):
    """Pad a 2-D array up to (rows, cols); no-op (no copy) if already aligned."""
    if a.shape == (rows, cols):
        return a
    return jnp.pad(a, ((0, rows - a.shape[0]), (0, cols - a.shape[1])))


def with_input_switch(x, logits, logistic_noise, w, b, *, tm=256, tn=256, tk=512):
    """Forward pass of WithInputSwitch (switch -> gate -> Linear) in one kernel."""
    B, F = x.shape
    H = w.shape[1]

    # Clamp tiles to the (8/128-aligned) problem size so small problems don't
    # over-pad; keeps second-to-last dims multiples of 8 and last dims of 128.
    tm = min(tm, _round_up(B, 8))
    tn = min(tn, _round_up(H, 128))
    tk = min(tk, _round_up(F, 128))

    Bp = _round_up(B, tm)
    Fp = _round_up(F, tk)
    Hp = _round_up(H, tn)

    # Fold delta_logits into the noise -> single bf16 gate stream.  bf16
    # rounding is sign-preserving, so the hard sample is unchanged.
    pre = (logistic_noise + (logits[1] - logits[0])[None, :]).astype(jnp.bfloat16)
    x_b = x.astype(jnp.bfloat16)
    w_b = w.astype(jnp.bfloat16)
    b_f = jnp.asarray(b, jnp.float32).reshape(1, H)

    # Padded pre is 0 -> gate False -> contributes nothing; padded x/w are 0.
    pre_p = _pad2(pre, Bp, Fp)
    x_p = _pad2(x_b, Bp, Fp)
    w_p = _pad2(w_b, Fp, Hp)
    b_p = _pad2(b_f, 1, Hp)

    grid = (Bp // tm, Hp // tn, Fp // tk)
    gm, gn, _ = grid

    # Truthful HBM traffic: x/pre re-streamed per output-column strip, w
    # re-streamed per batch strip, bias per batch strip, output written once.
    cost = pl.CostEstimate(
        flops=2 * B * F * H,
        transcendentals=0,
        bytes_accessed=(x_p.size * 2 + pre_p.size * 2) * gn
        + w_p.size * 2 * gm
        + b_p.size * 4 * gm
        + Bp * Hp * 4,
    )

    out = pl.pallas_call(
        _with_input_switch_kernel,
        out_shape=jax.ShapeDtypeStruct((Bp, Hp), jnp.float32),
        grid_spec=pltpu.PrefetchScalarGridSpec(
            num_scalar_prefetch=0,
            grid=grid,
            in_specs=[
                pl.BlockSpec((tm, tk), lambda i, j, k: (i, k)),   # pre (bf16)
                pl.BlockSpec((tm, tk), lambda i, j, k: (i, k)),   # x (bf16)
                pl.BlockSpec((tk, tn), lambda i, j, k: (k, j)),   # w (bf16)
                pl.BlockSpec((1, tn), lambda i, j, k: (0, j)),    # bias (f32)
            ],
            out_specs=pl.BlockSpec((tm, tn), lambda i, j, k: (i, j)),
            scratch_shapes=[pltpu.VMEM((tm, tn), jnp.float32)],
        ),
        compiler_params=pltpu.CompilerParams(
            # Per-step double-buffered working set is only a few MiB at these
            # tiles, so the scoped-VMEM default is fine on v5e/v6e/v7x.
            dimension_semantics=("parallel", "parallel", "arbitrary"),
        ),
        cost_estimate=cost,
    )(pre_p, x_p, w_p, b_p)

    return out[:B, :H]


if __name__ == "__main__":
    # Modest shapes that still exercise the tiled grid: (2, 1, 2) with
    # 256/256/512 tiles, and >=2 blocks on the batch (parallel) axis.
    B, F, H = 512, 1024, 256

    key = jax.random.PRNGKey(0)
    kx, kg, kw, kb = jax.random.split(key, 4)

    # Input x: (batch, features), input_shape = (F,)
    x = jax.random.normal(kx, (B, F), dtype=jnp.float32)

    # LearnableSwitch.__init__: logits = stack([ones*switch_neg, ones*switch_pos]) = [-1, +1]
    logits = jnp.stack(
        [jnp.full((F,), -1.0, dtype=jnp.float32),
         jnp.full((F,), 1.0, dtype=jnp.float32)], axis=0)

    # One logistic draw per (batch row, feature): distributed as g1 - g0 of the
    # two independent Gumbel(0,1) draws used by gumbel_softmax.
    noise = jax.random.logistic(kg, (B, F), dtype=jnp.float32)

    # Deterministic stand-in for model_cls: Linear(F -> H).
    w = jax.random.normal(kw, (F, H), dtype=jnp.float32) * 0.1
    b = jax.random.normal(kb, (1, H), dtype=jnp.float32) * 0.1

    y = with_input_switch(x, logits, noise, w, b)
    jax.block_until_ready(y)

    # Pure-JAX reference of the same forward (bf16 gate stream + bf16 matmul
    # inputs, f32 accumulate) - matches the kernel's numerics exactly.
    pre_ref = (noise + (logits[1] - logits[0])[None, :]).astype(jnp.bfloat16)
    mask = pre_ref > 0
    on_off = jnp.where(mask, x.astype(jnp.bfloat16), jnp.bfloat16(0))
    y_ref = jnp.dot(on_off, w.astype(jnp.bfloat16),
                    preferred_element_type=jnp.float32) + b

    assert y.shape == (B, H) and y.dtype == jnp.float32
    assert jnp.allclose(y, y_ref, rtol=2e-2, atol=2e-2), float(jnp.max(jnp.abs(y - y_ref)))
    print("KERNEL_OK")
</pallas_src>

<mosaic_0001>
module attributes {stable_mosaic.version = 11 : i64} {
  func.func @_with_input_switch_kernel(%arg0: i32, %arg1: i32, %arg2: i32, %arg3: memref<256x512xbf16, #tpu.memory_space<vmem>>, %arg4: memref<256x512xbf16, #tpu.memory_space<vmem>>, %arg5: memref<512x256xbf16, #tpu.memory_space<vmem>>, %arg6: memref<1x256xf32, #tpu.memory_space<vmem>>, %arg7: memref<256x256xf32, #tpu.memory_space<vmem>>, %arg8: memref<256x256xf32, #tpu.memory_space<vmem>>) attributes {dimension_semantics = [#tpu.dimension_semantics<parallel>, #tpu.dimension_semantics<parallel>, #tpu.dimension_semantics<arbitrary>], iteration_bounds = array<i64: 2, 1, 2>, scalar_prefetch = 0 : i64, scratch_operands = 1 : i64, tpu.core_type = #tpu.core_type<tc>, window_params = [{transform_indices = @transform_0, window_bounds = array<i64: 256, 512>}, {transform_indices = @transform_1, window_bounds = array<i64: 256, 512>}, {transform_indices = @transform_2, window_bounds = array<i64: 512, 256>}, {transform_indices = @transform_3, window_bounds = array<i64: 1, 256>}, {transform_indices = @transform_4, window_bounds = array<i64: 256, 256>}]} {
    %c0_i32 = arith.constant 0 : i32
    %0 = arith.cmpi eq, %arg2, %c0_i32 : i32
    %1 = arith.extui %0 : i1 to i32
    %c0_i32_0 = arith.constant 0 : i32
    %2 = arith.cmpi ne, %1, %c0_i32_0 : i32
    scf.if %2 {
      %cst_13 = arith.constant 0.000000e+00 : f32
      %17 = vector.broadcast %cst_13 : f32 to vector<256x256xf32>
      %c0_14 = arith.constant 0 : index
      %c0_15 = arith.constant 0 : index
      %18 = vector.load %arg8[%c0_14, %c0_15] : memref<256x256xf32, #tpu.memory_space<vmem>>, vector<256x256xf32>
      tpu.vector_store %arg8[%c0_14, %c0_15], %17 {strides = array<i32>} : memref<256x256xf32, #tpu.memory_space<vmem>>, vector<256x256xf32>,
    } else {
    }
    %c0 = arith.constant 0 : index
    %c0_1 = arith.constant 0 : index
    %3 = vector.load %arg3[%c0, %c0_1] : memref<256x512xbf16, #tpu.memory_space<vmem>>, vector<256x512xbf16>
    %cst = arith.constant 0.000000e+00 : bf16
    %4 = vector.broadcast %cst : bf16 to vector<256x512xbf16>
    %5 = arith.cmpf ogt, %3, %4 : vector<256x512xbf16>
    %c0_2 = arith.constant 0 : index
    %c0_3 = arith.constant 0 : index
    %6 = vector.load %arg4[%c0_2, %c0_3] : memref<256x512xbf16, #tpu.memory_space<vmem>>, vector<256x512xbf16>
    %cst_4 = arith.constant 0.000000e+00 : bf16
    %7 = vector.broadcast %cst_4 : bf16 to vector<256x512xbf16>
    %8 = arith.select %5, %6, %7 : vector<256x512xi1>, vector<256x512xbf16>
    %c0_5 = arith.constant 0 : index
    %c0_6 = arith.constant 0 : index
    %9 = vector.load %arg8[%c0_5, %c0_6] : memref<256x256xf32, #tpu.memory_space<vmem>>, vector<256x256xf32>
    %c0_7 = arith.constant 0 : index
    %c0_8 = arith.constant 0 : index
    %10 = vector.load %arg5[%c0_7, %c0_8] : memref<512x256xbf16, #tpu.memory_space<vmem>>, vector<512x256xbf16>
    %cst_9 = arith.constant dense<0.000000e+00> : vector<256x256xf32>
    %11 = tpu.matmul %8, %10, %cst_9 {dimension_numbers = #tpu.dot_dimension_numbers<[1], [0], [0], [1], [0, 0, 1, 1], [], []>} : vector<256x512xbf16>, vector<512x256xbf16>, vector<256x256xf32> -> vector<256x256xf32>
    %12 = arith.addf %9, %11 : vector<256x256xf32>
    %c0_10 = arith.constant 0 : index
    %c0_11 = arith.constant 0 : index
    %13 = vector.load %arg8[%c0_10, %c0_11] : memref<256x256xf32, #tpu.memory_space<vmem>>, vector<256x256xf32>
    tpu.vector_store %arg8[%c0_10, %c0_11], %12 {strides = array<i32>} : memref<256x256xf32, #tpu.memory_space<vmem>>, vector<256x256xf32>,
    %c1_i32 = arith.constant 1 : i32
    %14 = arith.cmpi eq, %arg2, %c1_i32 : i32
    %15 = arith.extui %14 : i1 to i32
    %c0_i32_12 = arith.constant 0 : i32
    %16 = arith.cmpi ne, %15, %c0_i32_12 : i32
    scf.if %16 {
      %c0_13 = arith.constant 0 : index
      %c0_14 = arith.constant 0 : index
      %17 = vector.load %arg8[%c0_13, %c0_14] : memref<256x256xf32, #tpu.memory_space<vmem>>, vector<256x256xf32>
      %c0_15 = arith.constant 0 : index
      %c0_16 = arith.constant 0 : index
      %18 = vector.load %arg6[%c0_15, %c0_16] : memref<1x256xf32, #tpu.memory_space<vmem>>, vector<1x256xf32>
      %19 = vector.broadcast %18 : vector<1x256xf32> to vector<256x256xf32>
      %20 = arith.addf %17, %19 : vector<256x256xf32>
      %c0_17 = arith.constant 0 : index
      %c0_18 = arith.constant 0 : index
      %21 = vector.load %arg7[%c0_17, %c0_18] : memref<256x256xf32, #tpu.memory_space<vmem>>, vector<256x256xf32>
      tpu.vector_store %arg7[%c0_17, %c0_18], %20 {strides = array<i32>} : memref<256x256xf32, #tpu.memory_space<vmem>>, vector<256x256xf32>,
    } else {
    }
    return
  }
  func.func @transform_0(%arg0: i32, %arg1: i32, %arg2: i32) -> (i32, i32) {
    %c0_i32 = arith.constant 0 : i32
    return %arg0, %arg2 : i32, i32
  }
  func.func @transform_1(%arg0: i32, %arg1: i32, %arg2: i32) -> (i32, i32) {
    %c0_i32 = arith.constant 0 : i32
    return %arg0, %arg2 : i32, i32
  }
  func.func @transform_2(%arg0: i32, %arg1: i32, %arg2: i32) -> (i32, i32) {
    %c0_i32 = arith.constant 0 : i32
    return %arg2, %arg1 : i32, i32
  }
  func.func @transform_3(%arg0: i32, %arg1: i32, %arg2: i32) -> (i32, i32) {
    %c0_i32 = arith.constant 0 : i32
    %c0_i32_0 = arith.constant 0 : i32
    return %c0_i32, %arg1 : i32, i32
  }
  func.func @transform_4(%arg0: i32, %arg1: i32, %arg2: i32) -> (i32, i32) {
    %c0_i32 = arith.constant 0 : i32
    return %arg0, %arg1 : i32, i32
  }
}

</mosaic_0001>

<bundles_post_ra>
// kernel: tpu_custom_call.1
= control target key start
LH: loop header
LB: loop body
LE: loop exit
PB: predicated region body
PF: predicated region fallthrough
CT: control target
= control target key end

     0   :  { %s5588_s0 = inlined_call_operand.hbm [shape: bf16[512,1024], index: 0, kind: input, shape index: {}]   ;;  %s5589_s1 = inlined_call_operand.hbm [shape: bf16[512,1024], index: 1, kind: input, shape index: {}]   ;;  %s5590_s2 = inlined_call_operand.hbm [shape: bf16[1024,256], index: 2, kind: input, shape index: {}]   ;;  %s5591_s3 = inlined_call_operand.vmem [shape: f32[1,256], index: 3, kind: input, shape index: {}]   ;;  %s5592_s4 = inlined_call_operand.hbm [shape: f32[512,256], index: 4, kind: output, shape index: {}]  }
   0x1   :  { %5627 = sst [smem:[#allocation50_spill]] %s5589_s1 }
   0x2   :  { %5628 = sst [smem:[#allocation51_spill]] %s5591_s3 }
   0x3   :  { %5629 = sst [smem:[#allocation52_spill]] %s5592_s4 }
   0x4   :  { %9 = vsyncpa [#allocation4], 0 }
   0x5   :  { %11 = vsyncpa [#allocation4 + $0x1], 0 }
   0x6   :  { %12 = vsyncpa [#allocation7], 0 }
   0x7   :  { %14 = vsyncpa [#allocation7 + $0x1], 0 }
   0x8   :  { %15 = vsyncpa [#allocation5], 0 }
   0x9   :  { %17 = vsyncpa [#allocation5 + $0x1], 0  ;;  %s3707_s15 = smov 0   ;;  %s3709_s16 = smov 0  }
   0xa   :  { %s3711_s17 = smov 0   ;;  %s3713_s18 = smov 0  }
   0xb   :  { %s3715_s19 = smov 0   ;;  %s3717_s20 = smov 0  }
   0xc   :  { %s3719_s21 = smov 0   ;;  %s3721_s22 = smov 0  }
   0xd   :  { %s3723_s23 = smov 0   ;;  %s3725_s24 = smov 0  }
   0xe   :  { %s3727_s25 = smov 0   ;;  %s3729_s26 = smov 0  }
   0xf   :  { %s3731_s27 = smov 0   ;;  %s3733_s28 = smov 0  }
  0x10 LB: > { %5630 = sst [smem:[#allocation14_spill]] %s3620_s15  ;;  %s3776_s29 = sadd.s32 4294967295, %s3672_s28   ;;  %s3672_s28 = sphi %s3733_s28, %s23_s28   ;;  %s3668_s27 = sphi %s3731_s27, %s5959_s27   ;;  %s3664_s26 = sphi %s3729_s26, %s5969_s26   ;;  %s3660_s25 = sphi %s3727_s25, %s5957_s25   ;;  %s3656_s24 = sphi %s3725_s24, %s5968_s24   ;;  %s3652_s23 = sphi %s3723_s23, %s5956_s23   ;;  %s3648_s22 = sphi %s3721_s22, %s5967_s22   ;;  %s3644_s21 = sphi %s3719_s21, %s5966_s21   ;;  %s3640_s20 = sphi %s3717_s20, %s5965_s20   ;;  %s3636_s19 = sphi %s3715_s19, %s5964_s19   ;;  %s3632_s18 = sphi %s3713_s18, %s5963_s18   ;;  %s3628_s17 = sphi %s3711_s17, %s5954_s17   ;;  %s3624_s16 = sphi %s3709_s16, %s5962_s16   ;;  %s3620_s15 = sphi %s3707_s15, %s5961_s15  }
  0x11   : > { %5631 = sst [smem:[#allocation15_spill]] %s3628_s17  ;;  %s2927_s30 = sadd.s32 4294967294, %s3672_s28  }
  0x12   : > { %5632 = sst [smem:[#allocation16_spill]] %s3652_s23  ;;  %s35_s5 = sadd.s32 1, %s3664_s26 }
  0x13   : > { %5633 = sst [smem:[#allocation17_spill]] %s3656_s24  ;;  %s42_s6 = sadd.s32 1, %s3668_s27 }
  0x14   : > { %5634 = sst [smem:[#allocation18_spill]] %s3660_s25  ;;  %p36_p0 = scmp.ge.s32.totalorder %s35_s5, 2 }
  0x15   : > { %5635 = sst [smem:[#allocation19_spill]] %s3668_s27  ;;  %s51_s7 = sadd.s32 1, %s3652_s23 }
  0x16   : > { %p58_p1 = scmp.ne.s32.totalorder %s3652_s23, %s3648_s22  ;;  %p59_p2 = scmp.eq.s32.totalorder %s3672_s28, 0 }
  0x17   : > { %s5971_s5 = smov (%p36_p0, %s35_s5), 0  ;;  %s5973_s6 = smov (!%p36_p0, %s42_s6), %s3668_s27 }
  0x18   : > { %5636 = sst [smem:[#allocation20_spill]] %s5971_s5  ;;  %s3790_s8 = ssub.s32 %s3664_s26, %s5971_s5 }
  0x19   : > { %p3794_p3 = por %p59_p2, %p58_p1  ;;  %p44_p4 = scmp.ge.s32.totalorder %s5973_s6, 2 }
  0x1a   : > { %p64_p5 = scmp.ne.s32.totalorder %s3648_s22, %s3644_s21  ;;  %p65_p6 = scmp.eq.s32.totalorder %s3776_s29, 0 }
  0x1b   : > { %p105_p7 = scmp.eq.s32.totalorder %s3790_s8, 0  ;;  %s5975_s6 = smov (%p44_p4, %s5973_s6), 0 }
  0x1c   : > { %5638 = sst [smem:[#allocation21_spill]] %s5975_s6  ;;  %p3805_p8 = por %p65_p6, %p64_p5 }
  0x1d   : > { %s161_s11 = sadd.s32 1, %s3628_s17  ;;  %s46_s12 = ssub.s32 %s3668_s27, %s5975_s6 }
  0x1e   : > { %p171_p9 = scmp.ne.s32.totalorder %s3628_s17, %s3624_s16  ;;  %s48_s13 = sor.u32 %s3790_s8, %s46_s12 }
  0x1f   : > { %p159_p10 = scmp.eq.s32.totalorder %s46_s12, 0  ;;  %p49_p11 = scmp.eq.s32.totalorder %s48_s13, 0 }
  0x20   : > { %p172_p12 = scmp.eq.s32.totalorder %s3776_s29, 3  ;;  %p177_p0 = scmp.ne.s32.totalorder %s3624_s16, %s3620_s15 }
  0x21   : > { %s3817_s14 = scalar_select %p159_p10, %s3628_s17, %s161_s11  }
  0x22   : > { %s3820_s21 = scalar_select %p49_p11, %s3652_s23, %s51_s7  }
  0x23   : > { %5640 = sst [smem:[#allocation22_spill]] %s3817_s14  ;;  %p3822_p13 = por %p172_p12, %p171_p9 }
  0x24   : > { %5641 = sst [smem:[#allocation23_spill]] %s3820_s21  ;;  %p178_p1 = scmp.eq.s32.totalorder %s2927_s30, 3 }
  0x25   : > { %s5642_s5 = scalar_select %p3822_p13, 1, 0 }
  0x26   : > { %p3306_p4 = scmp.lt.s32.totalorder %s3672_s28, 4  ;;  %s206_s6 = sand.u32 1, %s3652_s23  }
  0x27   : > { %5643 = sst [smem:[#allocation24_spill]] %s5642_s5  ;;  %p3830_p5 = por %p178_p1, %p177_p0 }
  0x28   : > { %s2931_s12 = sshll.u32 %s206_s6, 9  ;;  %s2933_s13 = sshll.u32 %s3664_s26, 2 }
  0x29   : > { %s5644_s4 = scalar_select %p3830_p5, 1, 0 }
  0x2a   : > { %s3214_s25 = sshll.u32 %s3668_s27, 8  ;;  %p3840_p9 = pnand %p3306_p4, %p3794_p3 }
  0x2b   : > { %5645 = sst [smem:[#allocation25_spill]] %s5644_s4  ;;  %s216_s11 = sadd.s32 %s3214_s25, %s2933_s13 }
  0x2c   : > { %s2935_s30 = sshll.u32 %s216_s11, 2  ;;  %s231_s21 = sand.u32 1, %s3672_s28  }
  0x2d   : > { %s5647_s1 = sld [smem:[#allocation50_spill]]  ;;  %s235_s15 = scalar_lea.vmem [#allocation6], %s2931_s12 }
  0x2e   : > { %s246_s4 = sshll.u32 %s235_s15, 4  ;;  %p2945_p10 = scmp.ge.s32.totalorder %s3672_s28, 1  ;;  %s247_s4 = int_to_ptr.vmem [resolvable:$true] %s246_s4 }
  0x2f   : > { %s3849_s25 = scalar_lea.sflag [#allocation7], %s231_s21  ;;  %s3674_s9 = smov 512  }
  0x30   : > { %s3675_s13 = smov 256   ;;  %s3676_s23 = smov 16  }
  0x31   : > { %p279_p3 = scmp.lt.s32.totalorder %s3672_s28, 5  ;;  %s218_s21 = scalar_lea.hbm %s5588_s0, %s2935_s30 }
  0x32   : > { %s210_s11 = scalar_lea.vmem [#allocation3], %s2931_s12  ;;  %s219_s27 = sshll.u32 %s218_s21, 4  ;;  %s220_s27 = int_to_ptr.hbm [resolvable:$true] %s219_s27 }
  0x33   : > { %s243_s17 = scalar_lea.hbm %s5647_s1, %s2935_s30  ;;  %p3855_p11 = pnand %p2945_p10, %p279_p3 }
  0x34   : > { %s244_s5 = sshll.u32 %s243_s17, 4  ;;  %s221_s1 = sshll.u32 %s210_s11, 4  ;;  %s245_s5 = int_to_ptr.hbm [resolvable:$true] %s244_s5  ;;  %s222_s1 = int_to_ptr.vmem [resolvable:$true] %s221_s1 }
  0x35   : > { %3298 = dma.hbm_to_vmem [thread:$0]  (!%p3840_p9), %s245_s5, 8192, %s247_s4, %s3849_s25, %s3674_s9, %s3675_s13, %s3676_s23  }
  0x36   : > { %s207_s3 = scalar_lea.sflag [#allocation4], %s206_s6  ;;  %s107_s4 = sadd.s32 1, %s3640_s20 }
  0x37   : > { %3295 = dma.hbm_to_vmem [thread:$0]  (!%p3840_p9), %s220_s27, 8192, %s222_s1, %s207_s3, %s3674_s9, %s3675_s13, %s3676_s23  }
  0x38   : > { %s3868_s5 = scalar_select %p105_p7, %s3640_s20, %s107_s4  }
  0x39   : > { %p114_p12 = scmp.ne.s32.totalorder %s3640_s20, %s3636_s19  ;;  %p120_p0 = scmp.ne.s32.totalorder %s3636_s19, %s3632_s18 }
  0x3a   : > { %s258_s24 = sand.u32 1, %s3640_s20   ;;  %s3217_s17 = sshll.u32 %s3664_s26, 9 }
  0x3b   : > { %p116_p1 = por %p114_p12, %p59_p2  ;;  %p3880_p10 = por %p120_p0, %p65_p6 }
  0x3c   : > { %s2941_s6 = sshll.u32 %s258_s24, 9  ;;  %s268_s3 = scalar_lea.hbm %s5590_s2, %s3217_s17 }
  0x3d   : > { %s269_s27 = sshll.u32 %s268_s3, 4  ;;  %s260_s8 = scalar_lea.vmem [#allocation8], %s2941_s6  ;;  %s270_s27 = int_to_ptr.hbm [resolvable:$true] %s269_s27 }
  0x3e   : > { %s271_s30 = sshll.u32 %s260_s8, 4  ;;  %p3299_p7 = pnand %p3306_p4, %p116_p1  ;;  %s272_s30 = int_to_ptr.vmem [resolvable:$true] %s271_s30 }
  0x3f   : > { %s3677_s18 = smov 128   ;;  %s3678_s9 = smov 8  }
  0x40   : > { %3301 = dma.hbm_to_vmem [thread:$0]  (!%p3299_p7), %s270_s27, 8192, %s272_s30, %s3849_s25, %s3677_s18, %s3677_s18, %s3678_s9  }
  0x41   : > { %283 = sbr.rel (%p3855_p11) target bundleno = 929 (0x3a1), region = 36 }
  0x46   : > { %s285_s24 = sand.u32 1, %s3648_s22  }
  0x47   : > { %s2946_s13 = sshll.u32 %s285_s24, 9  ;;  %s286_s23 = scalar_lea.sflag [#allocation4], %s285_s24 }
  0x48   : > { %s3893_s14 = scalar_lea.vmem [#allocation3], %s2946_s13 }
  0x49   : > { %3603 = dma.done.wait (%p3805_p8), %s286_s23, 8192  }
  0x4a   : > { %3605 = vsyncadd (%p3805_p8), %s286_s23, 4294959104  ;;  %s295_s21 = sand.u32 1, %s3776_s29   ;;  %s3900_s25 = scalar_lea.vmem [#allocation6], %s2946_s13 }
  0x4b   : > { %s296_s11 = scalar_lea.sflag [#allocation7], %s295_s21 }
  0x4c   : > { %3607 = dma.done.wait (%p3805_p8), %s296_s11, 8192  }
  0x4d   : > { %3609 = vsyncadd (%p3805_p8), %s296_s11, 4294959104  ;;  %s307_s15 = sand.u32 1, %s3636_s19  }
  0x4e   : > { %s2948_s4 = sshll.u32 %s307_s15, 9 }
  0x4f   : > { %s3907_s17 = scalar_lea.vmem [#allocation8], %s2948_s4 }
  0x50   : > { %3611 = dma.done.wait (%p3880_p10), %s296_s11, 8192  }
  0x51   : > { %3613 = vsyncadd (%p3880_p10), %s296_s11, 4294959104  ;;  %s346_s29 = sand.u32 1, %s3624_s16   ;;  %s5650_s10 = sld [smem:[#allocation17_spill]] }
  0x52   : > { %s2949_s6 = sshll.u32 %s346_s29, 9 }
  0x53   : > { %s3916_s7 = scalar_lea.vmem [#allocation9], %s2949_s6 }
  0x57   : > { %p2950_p2 = scmp.ne.s32.totalorder %s5650_s10, 0 }
  0x59   : > { %366 = sbr.rel (%p2950_p2) target bundleno = 159 (0x9f), region = 52 }
  0x5e   : > { %v3679_v0 = vmov 0.0  }
  0x5f   : > { %367 = vst [vmem:[#allocation2 + $0xb0] sm:$0xff] %v3679_v0 }
  0x60   : > { %368 = vst [vmem:[#allocation2 + $0x1b0] sm:$0xff] %v3679_v0 }
  0x61   : > { %369 = vst [vmem:[#allocation2 + $0xd8] sm:$0xff] %v3679_v0 }
  0x62   : > { %370 = vst [vmem:[#allocation2 + $0x18] sm:$0xff] %v3679_v0 }
  0x63   : > { %371 = vst [vmem:[#allocation2 + $0x50] sm:$0xff] %v3679_v0 }
  0x64   : > { %372 = vst [vmem:[#allocation2 + $0x168] sm:$0xff] %v3679_v0 }
  0x65   : > { %373 = vst [vmem:[#allocation2 + $0x130] sm:$0xff] %v3679_v0 }
  0x66   : > { %374 = vst [vmem:[#allocation2 + $0x48] sm:$0xff] %v3679_v0 }
  0x67   : > { %375 = vst [vmem:[#allocation2 + $0x180] sm:$0xff] %v3679_v0 }
  0x68   : > { %376 = vst [vmem:[#allocation2 + $0x110] sm:$0xff] %v3679_v0 }
  0x69   : > { %377 = vst [vmem:[#allocation2 + $0x118] sm:$0xff] %v3679_v0 }
  0x6a   : > { %378 = vst [vmem:[#allocation2 + $0x98] sm:$0xff] %v3679_v0 }
  0x6b   : > { %379 = vst [vmem:[#allocation2 + $0x120] sm:$0xff] %v3679_v0 }
  0x6c   : > { %380 = vst [vmem:[#allocation2 + $0x150] sm:$0xff] %v3679_v0 }
  0x6d   : > { %381 = vst [vmem:[#allocation2 + $0x108] sm:$0xff] %v3679_v0 }
  0x6e   : > { %382 = vst [vmem:[#allocation2 + $0x60] sm:$0xff] %v3679_v0 }
  0x6f   : > { %383 = vst [vmem:[#allocation2 + $0xe0] sm:$0xff] %v3679_v0 }
  0x70   : > { %384 = vst [vmem:[#allocation2 + $0x188] sm:$0xff] %v3679_v0 }
  0x71   : > { %385 = vst [vmem:[#allocation2 + $0x138] sm:$0xff] %v3679_v0 }
  0x72   : > { %386 = vst [vmem:[#allocation2 + $0x140] sm:$0xff] %v3679_v0 }
  0x73   : > { %387 = vst [vmem:[#allocation2 + $0x80] sm:$0xff] %v3679_v0 }
  0x74   : > { %388 = vst [vmem:[#allocation2 + $0x1a8] sm:$0xff] %v3679_v0 }
  0x75   : > { %389 = vst [vmem:[#allocation2 + $0x1b8] sm:$0xff] %v3679_v0 }
  0x76   : > { %390 = vst [vmem:[#allocation2 + $0x28] sm:$0xff] %v3679_v0 }
  0x77   : > { %391 = vst [vmem:[#allocation2 + $0x1e8] sm:$0xff] %v3679_v0 }
  0x78   : > { %392 = vst [vmem:[#allocation2 + $0xf8] sm:$0xff] %v3679_v0 }
  0x79   : > { %393 = vst [vmem:[#allocation2 + $0x160] sm:$0xff] %v3679_v0 }
  0x7a   : > { %394 = vst [vmem:[#allocation2 + $0x30] sm:$0xff] %v3679_v0 }
  0x7b   : > { %395 = vst [vmem:[#allocation2 + $0x1e0] sm:$0xff] %v3679_v0 }
  0x7c   : > { %396 = vst [vmem:[#allocation2] sm:$0xff] %v3679_v0 }
  0x7d   : > { %397 = vst [vmem:[#allocation2 + $0xf0] sm:$0xff] %v3679_v0 }
  0x7e   : > { %398 = vst [vmem:[#allocation2 + $0x8] sm:$0xff] %v3679_v0 }
  0x7f   : > { %399 = vst [vmem:[#allocation2 + $0x148] sm:$0xff] %v3679_v0 }
  0x80   : > { %400 = vst [vmem:[#allocation2 + $0x1d0] sm:$0xff] %v3679_v0 }
  0x81   : > { %401 = vst [vmem:[#allocation2 + $0x100] sm:$0xff] %v3679_v0 }
  0x82   : > { %402 = vst [vmem:[#allocation2 + $0xc8] sm:$0xff] %v3679_v0 }
  0x83   : > { %403 = vst [vmem:[#allocation2 + $0x40] sm:$0xff] %v3679_v0 }
  0x84   : > { %404 = vst [vmem:[#allocation2 + $0x1f8] sm:$0xff] %v3679_v0 }
  0x85   : > { %405 = vst [vmem:[#allocation2 + $0x20] sm:$0xff] %v3679_v0 }
  0x86   : > { %406 = vst [vmem:[#allocation2 + $0x128] sm:$0xff] %v3679_v0 }
  0x87   : > { %407 = vst [vmem:[#allocation2 + $0x1a0] sm:$0xff] %v3679_v0 }
  0x88   : > { %408 = vst [vmem:[#allocation2 + $0x1f0] sm:$0xff] %v3679_v0 }
  0x89   : > { %409 = vst [vmem:[#allocation2 + $0xe8] sm:$0xff] %v3679_v0 }
  0x8a   : > { %410 = vst [vmem:[#allocation2 + $0x78] sm:$0xff] %v3679_v0 }
  0x8b   : > { %411 = vst [vmem:[#allocation2 + $0x70] sm:$0xff] %v3679_v0 }
  0x8c   : > { %412 = vst [vmem:[#allocation2 + $0x90] sm:$0xff] %v3679_v0 }
  0x8d   : > { %413 = vst [vmem:[#allocation2 + $0x1d8] sm:$0xff] %v3679_v0 }
  0x8e   : > { %414 = vst [vmem:[#allocation2 + $0xd0] sm:$0xff] %v3679_v0 }
  0x8f   : > { %415 = vst [vmem:[#allocation2 + $0xb8] sm:$0xff] %v3679_v0 }
  0x90   : > { %416 = vst [vmem:[#allocation2 + $0x88] sm:$0xff] %v3679_v0 }
  0x91   : > { %417 = vst [vmem:[#allocation2 + $0xa8] sm:$0xff] %v3679_v0 }
  0x92   : > { %418 = vst [vmem:[#allocation2 + $0x1c8] sm:$0xff] %v3679_v0 }
  0x93   : > { %419 = vst [vmem:[#allocation2 + $0x170] sm:$0xff] %v3679_v0 }
  0x94   : > { %420 = vst [vmem:[#allocation2 + $0x178] sm:$0xff] %v3679_v0 }
  0x95   : > { %421 = vst [vmem:[#allocation2 + $0x68] sm:$0xff] %v3679_v0 }
  0x96   : > { %422 = vst [vmem:[#allocation2 + $0x190] sm:$0xff] %v3679_v0 }
  0x97   : > { %423 = vst [vmem:[#allocation2 + $0x198] sm:$0xff] %v3679_v0 }
  0x98   : > { %424 = vst [vmem:[#allocation2 + $0x38] sm:$0xff] %v3679_v0 }
  0x99   : > { %425 = vst [vmem:[#allocation2 + $0xc0] sm:$0xff] %v3679_v0 }
  0x9a   : > { %426 = vst [vmem:[#allocation2 + $0x1c0] sm:$0xff] %v3679_v0 }
  0x9b   : > { %427 = vst [vmem:[#allocation2 + $0x158] sm:$0xff] %v3679_v0 }
  0x9c   : > { %428 = vst [vmem:[#allocation2 + $0x10] sm:$0xff] %v3679_v0 }
  0x9d   : > { %429 = vst [vmem:[#allocation2 + $0x58] sm:$0xff] %v3679_v0 }
  0x9e   : > { %430 = vst [vmem:[#allocation2 + $0xa0] sm:$0xff] %v3679_v0 }
  0x9f PF: > { %v3009_v1 = vld [vmem:[%s3907_s17 + $0x70] sm:$0xf]  ;;  %v3233_v2 = vld [vmem:[%s3907_s17 + $0x74] sm:$0xf0]  ;;  %v3001_v12 = vld [vmem:[%s3907_s17 + $0x60] sm:$0xf] }
  0xa0   : > { %v3073_v3 = vld [vmem:[%s3907_s17 + $0xf0] sm:$0xf]  ;;  %v3010_v4 = vor.u32 %v3233_v2, %v3009_v1  ;;  %v3249_v5 = vld [vmem:[%s3907_s17 + $0xf4] sm:$0xf0]  ;;  %v3231_v14 = vld [vmem:[%s3907_s17 + $0x64] sm:$0xf0] }
  0xa1   : > { %v3137_v6 = vld [vmem:[%s3907_s17 + $0x170] sm:$0xf]  ;;  %v3265_v7 = vld [vmem:[%s3907_s17 + $0x174] sm:$0xf0]  ;;  %v3074_v8 = vor.u32 %v3249_v5, %v3073_v3  ;;  %v3065_v15 = vld [vmem:[%s3907_s17 + $0xe0] sm:$0xf]  ;;  %v3002_v17 = vor.u32 %v3231_v14, %v3001_v12 }
  0xa2   : > { %v3138_v9 = vor.u32 %v3265_v7, %v3137_v6  ;;  %v3201_v10 = vld [vmem:[%s3907_s17 + $0x1f0] sm:$0xf]  ;;  %v3281_v11 = vld [vmem:[%s3907_s17 + $0x1f4] sm:$0xf0]  ;;  %1711 = vmatpush.bf16.msra.mxu0 %v3010_v4  ;;  %v3247_v16 = vld [vmem:[%s3907_s17 + $0xe4] sm:$0xf0] }
  0xa3   : > { %v3202_v13 = vor.u32 %v3281_v11, %v3201_v10  ;;  %1800 = vmatpush.bf16.msra.mxu1 %v3074_v8  ;;  %v3066_v18 = vor.u32 %v3247_v16, %v3065_v15  ;;  %v3129_v19 = vld [vmem:[%s3907_s17 + $0x160] sm:$0xf]  ;;  %v3263_v20 = vld [vmem:[%s3907_s17 + $0x164] sm:$0xf0]  ;;  %v2993_v24 = vld [vmem:[%s3907_s17 + $0x50] sm:$0xf] }
  0xa4   : > { %1889 = vmatpush.bf16.msra.mxu2 %v3138_v9  ;;  %v3193_v21 = vld [vmem:[%s3907_s17 + $0x1e0] sm:$0xf]  ;;  %v3130_v22 = vor.u32 %v3263_v20, %v3129_v19  ;;  %v3279_v23 = vld [vmem:[%s3907_s17 + $0x1e4] sm:$0xf0]  ;;  %v3229_v25 = vld [vmem:[%s3907_s17 + $0x54] sm:$0xf0] }
  0xa5   : > { %1978 = vmatpush.bf16.msra.mxu3 %v3202_v13  ;;  %v3194_v26 = vor.u32 %v3279_v23, %v3193_v21  ;;  %v3057_v27 = vld [vmem:[%s3907_s17 + $0xd0] sm:$0xf]  ;;  %v3245_v28 = vld [vmem:[%s3907_s17 + $0xd4] sm:$0xf0]  ;;  %v2994_v30 = vor.u32 %v3229_v25, %v2993_v24  ;;  %v2985_v36 = vld [vmem:[%s3907_s17 + $0x40] sm:$0xf] }
  0xa6   : > { %v3121_v29 = vld [vmem:[%s3907_s17 + $0x150] sm:$0xf]  ;;  %1712 = vmatpush.bf16.msra.mxu0 %v3002_v17  ;;  %v3261_v31 = vld [vmem:[%s3907_s17 + $0x154] sm:$0xf0]  ;;  %v3058_v34 = vor.u32 %v3245_v28, %v3057_v27  ;;  %v3227_v37 = vld [vmem:[%s3907_s17 + $0x44] sm:$0xf0] }
  0xa7   : > { %v3185_v32 = vld [vmem:[%s3907_s17 + $0x1d0] sm:$0xf]  ;;  %v3277_v33 = vld [vmem:[%s3907_s17 + $0x1d4] sm:$0xf0]  ;;  %1801 = vmatpush.bf16.msra.mxu1 %v3066_v18  ;;  %v3122_v35 = vor.u32 %v3261_v31, %v3121_v29  ;;  %v3049_v38 = vld [vmem:[%s3907_s17 + $0xc0] sm:$0xf]  ;;  %v2986_v45 = vor.u32 %v3227_v37, %v2985_v36 }
  0xa8   : > { %1890 = vmatpush.bf16.msra.mxu2 %v3130_v22  ;;  %v3186_v39 = vor.u32 %v3277_v33, %v3185_v32  ;;  %v3243_v40 = vld [vmem:[%s3907_s17 + $0xc4] sm:$0xf0]  ;;  %v3113_v41 = vld [vmem:[%s3907_s17 + $0x140] sm:$0xf]  ;;  %v2977_v46 = vld [vmem:[%s3907_s17 + $0x30] sm:$0xf] }
  0xa9   : > { %1979 = vmatpush.bf16.msra.mxu3 %v3194_v26  ;;  %v3259_v42 = vld [vmem:[%s3907_s17 + $0x144] sm:$0xf0]  ;;  %v3177_v43 = vld [vmem:[%s3907_s17 + $0x1c0] sm:$0xf]  ;;  %v3225_v47 = vld [vmem:[%s3907_s17 + $0x34] sm:$0xf0]  ;;  %v3050_v48 = vor.u32 %v3243_v40, %v3049_v38 }
  0xaa   : > { %v3275_v44 = vld [vmem:[%s3907_s17 + $0x1c4] sm:$0xf0]  ;;  %1713 = vmatpush.bf16.msra.mxu0 %v2994_v30  ;;  %v3114_v49 = vor.u32 %v3259_v42, %v3113_v41  ;;  %v3041_v50 = vld [vmem:[%s3907_s17 + $0xb0] sm:$0xf]  ;;  %v3241_v51 = vld [vmem:[%s3907_s17 + $0xb4] sm:$0xf0]  ;;  %v2978_v62 = vor.u32 %v3225_v47, %v2977_v46 }
  0xab   : > { %1802 = vmatpush.bf16.msra.mxu1 %v3058_v34  ;;  %v3105_v52 = vld [vmem:[%s3907_s17 + $0x130] sm:$0xf]  ;;  %v3178_v53 = vor.u32 %v3275_v44, %v3177_v43  ;;  %v3257_v54 = vld [vmem:[%s3907_s17 + $0x134] sm:$0xf0]  ;;  %v2969_v57 = vld [vmem:[%s3907_s17 + $0x20] sm:$0xf]  ;;  %v3042_v2 = vor.u32 %v3241_v51, %v3041_v50 }
  0xac   : > { %1891 = vmatpush.bf16.msra.mxu2 %v3122_v35  ;;  %v3169_v55 = vld [vmem:[%s3907_s17 + $0x1b0] sm:$0xf]  ;;  %v3273_v56 = vld [vmem:[%s3907_s17 + $0x1b4] sm:$0xf0]  ;;  %v3223_v58 = vld [vmem:[%s3907_s17 + $0x24] sm:$0xf0]  ;;  %v3106_v3 = vor.u32 %v3257_v54, %v3105_v52 }
  0xad   : > { %1980 = vmatpush.bf16.msra.mxu3 %v3186_v39  ;;  %v3033_v59 = vld [vmem:[%s3907_s17 + $0xa0] sm:$0xf]  ;;  %v3239_v60 = vld [vmem:[%s3907_s17 + $0xa4] sm:$0xf0]  ;;  %v4032_v4 = vld [vmem:[%s3907_s17 + $0x10] sm:$0xf]  ;;  %v3170_v7 = vor.u32 %v3273_v56, %v3169_v55  ;;  %v2970_v14 = vor.u32 %v3223_v58, %v2969_v57 }
  0xae   : > { %v3097_v61 = vld [vmem:[%s3907_s17 + $0x120] sm:$0xf]  ;;  %1714 = vmatpush.bf16.msra.mxu0 %v2986_v45  ;;  %v3255_v63 = vld [vmem:[%s3907_s17 + $0x124] sm:$0xf0]  ;;  %v4035_v5 = vld [vmem:[%s3907_s17 + $0x14] sm:$0xf0]  ;;  %v3034_v15 = vor.u32 %v3239_v60, %v3033_v59 }
  0xaf   : > { %v3161_v0 = vld [vmem:[%s3907_s17 + $0x1a0] sm:$0xf]  ;;  %v3271_v1 = vld [vmem:[%s3907_s17 + $0x1a4] sm:$0xf0]  ;;  %1803 = vmatpush.bf16.msra.mxu1 %v3050_v48  ;;  %v4038_v6 = vld [vmem:[%s3907_s17 + $0x90] sm:$0xf]  ;;  %v3098_v16 = vor.u32 %v3255_v63, %v3097_v61  ;;  %v2962_v21 = vor.u32 %v4035_v5, %v4032_v4 }
  0xb0   : > { %1892 = vmatpush.bf16.msra.mxu2 %v3114_v49  ;;  %v4041_v8 = vld [vmem:[%s3907_s17 + $0x94] sm:$0xf0]  ;;  %v4044_v9 = vld [vmem:[%s3907_s17 + $0x110] sm:$0xf]  ;;  %v4056_v13 = vld [vmem:[%s3907_s17] sm:$0xf]  ;;  %v3162_v20 = vor.u32 %v3271_v1, %v3161_v0 }
  0xb1   : > { %1981 = vmatpush.bf16.msra.mxu3 %v3178_v53  ;;  %v4047_v10 = vld [vmem:[%s3907_s17 + $0x114] sm:$0xf0]  ;;  %v4050_v11 = vld [vmem:[%s3907_s17 + $0x190] sm:$0xf]  ;;  %v4059_v17 = vld [vmem:[%s3907_s17 + $0x4] sm:$0xf0]  ;;  %v3026_v22 = vor.u32 %v4041_v8, %v4038_v6 }
  0xb2   : > { %v4053_v12 = vld [vmem:[%s3907_s17 + $0x194] sm:$0xf0]  ;;  %1715 = vmatpush.bf16.msra.mxu0 %v2978_v62  ;;  %v4062_v18 = vld [vmem:[%s3907_s17 + $0x80] sm:$0xf]  ;;  %v4065_v19 = vld [vmem:[%s3907_s17 + $0x84] sm:$0xf0]  ;;  %v3090_v26 = vor.u32 %v4047_v10, %v4044_v9  ;;  %v2954_v28 = vor.u32 %v4059_v17, %v4056_v13 }
  0xb3   : > { %1804 = vmatpush.bf16.msra.mxu1 %v3042_v2  ;;  %v4072_v23 = vld [vmem:[%s3907_s17 + $0x100] sm:$0xf]  ;;  %v4075_v24 = vld [vmem:[%s3907_s17 + $0x104] sm:$0xf0]  ;;  %v3154_v27 = vor.u32 %v4053_v12, %v4050_v11  ;;  %v3018_v29 = vor.u32 %v4065_v19, %v4062_v18  ;;  %v433_v32 = vld [vmem:[%s3893_s14 + $0x10] sm:$0xff]  ;;  %s5945_s12 = sld [smem:[#allocation17_spill]] }
  0xb4   : > { %1893 = vmatpush.bf16.msra.mxu2 %v3106_v3  ;;  %v4078_v25 = vld [vmem:[%s3907_s17 + $0x180] sm:$0xf]  ;;  %v4089_v30 = vld [vmem:[%s3907_s17 + $0x184] sm:$0xf0]  ;;  %v3082_v33 = vor.u32 %v4075_v24, %v4072_v23  ;;  %v499_v36 = vunpack.c.l.bf16 %v433_v32  ;;  %v500_v40 = vunpack.c.h.bf16 %v433_v32  ;;  %v753_v41 = vld [vmem:[%s3900_s25 + $0x10] sm:$0xff] }
  0xb5   : > { %1982 = vmatpush.bf16.msra.mxu3 %v3170_v7  ;;  %v431_v31 = vld [vmem:[%s3893_s14] sm:$0xff]  ;;  %v432_v38 = vld [vmem:[%s3893_s14 + $0x8] sm:$0xff]  ;;  %v3146_v39 = vor.u32 %v4089_v30, %v4078_v25  ;;  %v434_v42 = vld [vmem:[%s3893_s14 + $0x18] sm:$0xff] }
  0xb6   : > { %v495_v34 = vunpack.c.l.bf16 %v431_v31  ;;  %v496_v35 = vunpack.c.h.bf16 %v431_v31  ;;  %v751_v37 = vld [vmem:[%s3900_s25] sm:$0xff]  ;;  %1716 = vmatpush.bf16.msra.mxu0 %v2970_v14  ;;  %v497_v43 = vunpack.c.l.bf16 %v432_v38  ;;  %v498_v44 = vunpack.c.h.bf16 %v432_v38  ;;  %v752_v45 = vld [vmem:[%s3900_s25 + $0x8] sm:$0xff]  ;;  %v3264_v49 = vld [vmem:[%s3907_s17 + $0x174] sm:$0xf] }
  0xb7   : > { %1805 = vmatpush.bf16.msra.mxu1 %v3034_v15  ;;  %vm4106_vm2 = vcmp.gt.f32.partialorder %v499_v36, 0.0  ;;  %v501_v48 = vunpack.c.l.bf16 %v434_v42  ;;  %v435_v50 = vld [vmem:[%s3893_s14 + $0x20] sm:$0xff]  ;;  %vm4112_vm3 = vcmp.gt.f32.partialorder %v500_v40, 0.0  ;;  %v502_v52 = vunpack.c.h.bf16 %v434_v42  ;;  %v754_v55 = vld [vmem:[%s3900_s25 + $0x18] sm:$0xff]  ;;  %v3280_v60 = vld [vmem:[%s3907_s17 + $0x1f4] sm:$0xf] }
  0xb8   : > { %1894 = vmatpush.bf16.msra.mxu2 %v3098_v16  ;;  %vm4102_vm0 = vcmp.gt.f32.partialorder %v495_v34, 0.0  ;;  %vm624_vm1 = vcmp.gt.f32.partialorder %v496_v35, 0.0  ;;  %vm4118_vm5 = vcmp.gt.f32.partialorder %v497_v43, 0.0  ;;  %vm4122_vm6 = vcmp.gt.f32.partialorder %v498_v44, 0.0  ;;  %v3139_v56 = vld [vmem:[%s3907_s17 + $0x178] sm:$0xf0]  ;;  %vm817_vm7 = vmpackc.low %vm4112_vm3, %vm4106_vm2 }
  0xb9   : > { %1983 = vmatpush.bf16.msra.mxu3 %v3162_v20  ;;  %vm815_vm4 = vmpackc.low %vm624_vm1, %vm4102_vm0  ;;  %vm4132_vm8 = vcmp.gt.f32.partialorder %v501_v48, 0.0  ;;  %v3142_v59 = vor.u32 %v3264_v49, %v3139_v56  ;;  %v3203_v61 = vld [vmem:[%s3907_s17 + $0x1f8] sm:$0xf0]  ;;  %v437_v62 = vld [vmem:[%s3893_s14 + $0x30] sm:$0xff]  ;;  %v503_v63 = vunpack.c.l.bf16 %v435_v50  ;;  %v881_v0 = vsel %vm817_vm7, %v753_v41, 0  ;;  %p3207_p6 = scmp.ne.s32.totalorder %s5945_s12, 1 }
  0xba   : > { %v879_v57 = vsel %vm815_vm4, %v751_v37, 0  ;;  %1717 = vmatpush.bf16.msra.mxu0 %v2962_v21  ;;  %vm630_vm9 = vcmp.gt.f32.partialorder %v502_v52, 0.0  ;;  %vm816_vm10 = vmpackc.low %vm4122_vm6, %vm4118_vm5  ;;  %v3232_v3 = vld [vmem:[%s3907_s17 + $0x74] sm:$0xf]  ;;  %v3011_v4 = vld [vmem:[%s3907_s17 + $0x78] sm:$0xf0]  ;;  %v1139_v5 = vunpack.c.l.b16 %v881_v0  ;;  %v1140_v6 = vunpack.c.h.b16 %v881_v0 }
  0xbb   : > { %v1135_v1 = vunpack.c.l.b16 %v879_v57  ;;  %v1136_v2 = vunpack.c.h.b16 %v879_v57  ;;  %1806 = vmatpush.bf16.msra.mxu1 %v3026_v22  ;;  %vm818_vm11 = vmpackc.low %vm630_vm9, %vm4132_vm8  ;;  %v880_v7 = vsel %vm816_vm10, %v752_v45, 0  ;;  %v3206_v8 = vor.u32 %v3280_v60, %v3203_v61  ;;  %v3248_v9 = vld [vmem:[%s3907_s17 + $0xf4] sm:$0xf]  ;;  %v3075_v10 = vld [vmem:[%s3907_s17 + $0xf8] sm:$0xf0]  ;;  %s5946_s27 = sld [smem:[#allocation51_spill]] (!%p3207_p6) }
  0xbc   : > { %1895 = vmatpush.bf16.msra.mxu2 %v3090_v26  ;;  %v882_v11 = vsel %vm818_vm11, %v754_v55, 0  ;;  %v1137_v12 = vunpack.c.l.b16 %v880_v7  ;;  %v1138_v14 = vunpack.c.h.b16 %v880_v7  ;;  %v3014_v15 = vor.u32 %v3232_v3, %v3011_v4  ;;  %v436_v16 = vld [vmem:[%s3893_s14 + $0x28] sm:$0xff]  ;;  %v755_v30 = vld [vmem:[%s3900_s25 + $0x20] sm:$0xff]  ;;  %v441_v43 = vld [vmem:[%s3893_s14 + $0x50] sm:$0xff] }
  0xbd   : > { %1984 = vmatpush.bf16.msra.mxu3 %v3154_v27  ;;  %v4150_v20 = vpack.c.b16 %v1139_v5, %v1135_v1  ;;  %v4152_v21 = vpack.c.b16 %v1140_v6, %v1136_v2  ;;  %v1141_v22 = vunpack.c.l.b16 %v882_v11  ;;  %v1142_v26 = vunpack.c.h.b16 %v882_v11  ;;  %v438_v27 = vld [vmem:[%s3893_s14 + $0x38] sm:$0xff]  ;;  %v756_v38 = vld [vmem:[%s3900_s25 + $0x28] sm:$0xff]  ;;  %v439_v42 = vld [vmem:[%s3893_s14 + $0x40] sm:$0xff] }
  0xbe   : > { %1718 = vmatpush.bf16.msra.mxu0 %v2954_v28  ;;  %v3078_v31 = vor.u32 %v3248_v9, %v3075_v10  ;;  %v504_v32 = vunpack.c.h.bf16 %v435_v50  ;;  %v507_v34 = vunpack.c.l.bf16 %v437_v62  ;;  %v508_v35 = vunpack.c.h.bf16 %v437_v62  ;;  %v440_v46 = vld [vmem:[%s3893_s14 + $0x48] sm:$0xff]  ;;  %v442_v49 = vld [vmem:[%s3893_s14 + $0x58] sm:$0xff]  ;;  %v3262_v50 = vld [vmem:[%s3907_s17 + $0x164] sm:$0xf] }
  0xbf   : > { %1807 = vmatpush.bf16.msra.mxu1 %v3018_v29  ;;  %v4164_v36 = vpack.c.b16 %v1141_v22, %v1137_v12  ;;  %v4166_v37 = vpack.c.b16 %v1142_v26, %v1138_v14  ;;  %vm4168_vm12 = vcmp.gt.f32.partialorder %v503_v63, 0.0  ;;  %v505_v17 = vunpack.c.l.bf16 %v436_v16  ;;  %v3131_v51 = vld [vmem:[%s3907_s17 + $0x168] sm:$0xf0]  ;;  %v3278_v55 = vld [vmem:[%s3907_s17 + $0x1e4] sm:$0xf]  ;;  %v761_v18 = vld [vmem:[%s3900_s25 + $0x50] sm:$0xff] }
  0xc0   : > { %1896 = vmatpush.bf16.msra.mxu2 %v3082_v33  ;;  %vm4175_vm13 = vcmp.gt.f32.partialorder %v504_v32, 0.0  ;;  %vm4179_vm14 = vcmp.gt.f32.partialorder %v507_v34, 0.0  ;;  %vm4183_vm15 = vcmp.gt.f32.partialorder %v508_v35, 0.0  ;;  %v506_v24 = vunpack.c.h.bf16 %v436_v16  ;;  %v757_v33 = vld [vmem:[%s3900_s25 + $0x30] sm:$0xff]  ;;  %v3195_v56 = vld [vmem:[%s3907_s17 + $0x1e8] sm:$0xf0] }
  0xc1   : > { %1985 = vmatpush.bf16.msra.mxu3 %v3146_v39  ;;  %1719 = vmatmul.bf16.vlgmr.msra.gmra.mxu0 %v4150_v20  ;;  %vm819_vm0 = vmpackc.low %vm4175_vm13, %vm4168_vm12  ;;  %v509_v25 = vunpack.c.l.bf16 %v438_v27  ;;  %v510_v28 = vunpack.c.h.bf16 %v438_v27  ;;  %vm4192_vm1 = vcmp.gt.f32.partialorder %v505_v17, 0.0  ;;  %v758_v39 = vld [vmem:[%s3900_s25 + $0x38] sm:$0xff]  ;;  %v511_v52 = vunpack.c.l.bf16 %v439_v42  ;;  %v3230_v57 = vld [vmem:[%s3907_s17 + $0x64] sm:$0xf] }
  0xc2   : > { %1808 = vmatmul.bf16.vlgmr.msra.gmra.mxu1 %v4152_v21  ;;  %vm821_vm2 = vmpackc.low %vm4183_vm15, %vm4179_vm14  ;;  %vm634_vm3 = vcmp.gt.f32.partialorder %v506_v24, 0.0  ;;  %2067 = vmatpush.bf16.msrb.mxu0 %v3014_v15  ;;  %v883_v40 = vsel %vm819_vm0, %v755_v30, 0  ;;  %v512_v53 = vunpack.c.h.bf16 %v439_v42  ;;  %v515_v54 = vunpack.c.l.bf16 %v441_v43  ;;  %v3003_v62 = vld [vmem:[%s3907_s17 + $0x68] sm:$0xf0]  ;;  %v3246_v63 = vld [vmem:[%s3907_s17 + $0xe4] sm:$0xf] }
  0xc3   : > { %1897 = vmatmul.bf16.vlgmr.msra.gmra.mxu2 %v4164_v36  ;;  %vm637_vm4 = vcmp.gt.f32.partialorder %v509_v25, 0.0  ;;  %2156 = vmatpush.bf16.msrb.mxu1 %v3078_v31  ;;  %vm638_vm5 = vcmp.gt.f32.partialorder %v510_v28, 0.0  ;;  %vm820_vm6 = vmpackc.low %vm634_vm3, %vm4192_vm1  ;;  %v885_v41 = vsel %vm821_vm2, %v757_v33, 0  ;;  %v1143_v47 = vunpack.c.l.b16 %v883_v40  ;;  %v3067_v0 = vld [vmem:[%s3907_s17 + $0xe8] sm:$0xf0]  ;;  %v759_v17 = vld [vmem:[%s3900_s25 + $0x40] sm:$0xff] }
  0xc4   : > { %2245 = vmatpush.bf16.msrb.mxu2 %v3142_v59  ;;  %1986 = vmatmul.bf16.vlgmr.msra.gmra.mxu3 %v4166_v37  ;;  %vm822_vm7 = vmpackc.low %vm638_vm5, %vm637_vm4  ;;  %v884_v44 = vsel %vm820_vm6, %v756_v38, 0  ;;  %v1147_v48 = vunpack.c.l.b16 %v885_v41  ;;  %v1144_v58 = vunpack.c.h.b16 %v883_v40  ;;  %v1148_v59 = vunpack.c.h.b16 %v885_v41  ;;  %v760_v19 = vld [vmem:[%s3900_s25 + $0x48] sm:$0xff]  ;;  %v762_v23 = vld [vmem:[%s3900_s25 + $0x58] sm:$0xff] }
  0xc5   : > { %2334 = vmatpush.bf16.msrb.mxu3 %v3206_v8  ;;  %v886_v45 = vsel %vm822_vm7, %v758_v39, 0  ;;  %v1145_v60 = vunpack.c.l.b16 %v884_v44  ;;  %v1146_v1 = vunpack.c.h.b16 %v884_v44  ;;  %v516_v3 = vunpack.c.h.bf16 %v441_v43  ;;  %v443_v28 = vld [vmem:[%s3893_s14 + $0x60] sm:$0xff]  ;;  %v445_v29 = vld [vmem:[%s3893_s14 + $0x70] sm:$0xff]  ;;  %v444_v38 = vld [vmem:[%s3893_s14 + $0x68] sm:$0xff] }
  0xc6   : > { %v1149_v61 = vunpack.c.l.b16 %v886_v45  ;;  %v1150_v2 = vunpack.c.h.b16 %v886_v45  ;;  %v3134_v4 = vor.u32 %v3262_v50, %v3131_v51  ;;  %v4226_v5 = vpack.c.b16 %v1147_v48, %v1143_v47  ;;  %v446_v43 = vld [vmem:[%s3893_s14 + $0x78] sm:$0xff]  ;;  %v3228_v22 = vld [vmem:[%s3907_s17 + $0x54] sm:$0xf] }
  0xc7   : > { %v513_v6 = vunpack.c.l.bf16 %v440_v46  ;;  %v514_v7 = vunpack.c.h.bf16 %v440_v46  ;;  %v3198_v8 = vor.u32 %v3278_v55, %v3195_v56  ;;  %v517_v9 = vunpack.c.l.bf16 %v442_v49  ;;  %v3187_v16 = vld [vmem:[%s3907_s17 + $0x1d8] sm:$0xf0]  ;;  %v3244_v35 = vld [vmem:[%s3907_s17 + $0xd4] sm:$0xf] }
  0xc8   : > { %v518_v10 = vunpack.c.h.bf16 %v442_v49  ;;  %2246 = vmatpush.bf16.msrb.mxu2 %v3134_v4  ;;  %v3006_v11 = vor.u32 %v3230_v57, %v3003_v62  ;;  %v3070_v12 = vor.u32 %v3246_v63, %v3067_v0  ;;  %v4228_v14 = vpack.c.b16 %v1148_v59, %v1144_v58  ;;  %v763_v4 = vld [vmem:[%s3900_s25 + $0x60] sm:$0xff]  ;;  %v2995_v31 = vld [vmem:[%s3907_s17 + $0x58] sm:$0xf0]  ;;  %v773_v56 = vld [vmem:[%s3900_s25 + $0xb0] sm:$0xff] }
  0xc9   : > { %v4230_v15 = vpack.c.b16 %v1149_v61, %v1145_v60  ;;  %vm4232_vm8 = vcmp.gt.f32.partialorder %v511_v52, 0.0  ;;  %vm4236_vm9 = vcmp.gt.f32.partialorder %v512_v53, 0.0  ;;  %2335 = vmatpush.bf16.msrb.mxu3 %v3198_v8  ;;  %v4240_v26 = vpack.c.b16 %v1150_v2, %v1146_v1  ;;  %v766_v8 = vld [vmem:[%s3900_s25 + $0x78] sm:$0xff]  ;;  %v772_v59 = vld [vmem:[%s3900_s25 + $0xa8] sm:$0xff]  ;;  %v3258_v63 = vld [vmem:[%s3907_s17 + $0x144] sm:$0xf] }
  0xca   : > { %vm4242_vm10 = vcmp.gt.f32.partialorder %v515_v54, 0.0  ;;  %vm4246_vm11 = vcmp.gt.f32.partialorder %v516_v3, 0.0  ;;  %2068 = vmatpush.bf16.msrb.mxu0 %v3006_v11  ;;  %2157 = vmatpush.bf16.msrb.mxu1 %v3070_v12  ;;  %vm4250_vm12 = vcmp.gt.f32.partialorder %v513_v6, 0.0  ;;  %vm4254_vm13 = vcmp.gt.f32.partialorder %v514_v7, 0.0  ;;  %vm823_vm14 = vmpackc.low %vm4236_vm9, %vm4232_vm8  ;;  %v765_v6 = vld [vmem:[%s3900_s25 + $0x70] sm:$0xff]  ;;  %v764_v7 = vld [vmem:[%s3900_s25 + $0x68] sm:$0xff] }
  0xcb   : > { %vm4263_vm15 = vcmp.gt.f32.partialorder %v517_v9, 0.0  ;;  %vm4267_vm0 = vcmp.gt.f32.partialorder %v518_v10, 0.0  ;;  %vm825_vm1 = vmpackc.low %vm4246_vm11, %vm4242_vm10  ;;  %v887_v24 = vsel %vm823_vm14, %v759_v17, 0  ;;  %v519_v41 = vunpack.c.l.bf16 %v443_v28  ;;  %v3260_v9 = vld [vmem:[%s3907_s17 + $0x154] sm:$0xf]  ;;  %v774_v60 = vld [vmem:[%s3900_s25 + $0xb8] sm:$0xff] }
  0xcc   : > { %vm824_vm2 = vmpackc.low %vm4254_vm13, %vm4250_vm12  ;;  %v889_v25 = vsel %vm825_vm1, %v761_v18, 0  ;;  %v1151_v39 = vunpack.c.l.b16 %v887_v24  ;;  %v520_v42 = vunpack.c.h.bf16 %v443_v28  ;;  %v1152_v44 = vunpack.c.h.b16 %v887_v24  ;;  %v3123_v10 = vld [vmem:[%s3907_s17 + $0x158] sm:$0xf0]  ;;  %v3276_v11 = vld [vmem:[%s3907_s17 + $0x1d4] sm:$0xf] }
  0xcd   : > { %vm826_vm3 = vmpackc.low %vm4267_vm0, %vm4263_vm15  ;;  %v888_v30 = vsel %vm824_vm2, %v760_v19, 0  ;;  %v1155_v40 = vunpack.c.l.b16 %v889_v25  ;;  %v1156_v45 = vunpack.c.h.b16 %v889_v25  ;;  %v523_v46 = vunpack.c.l.bf16 %v445_v29  ;;  %v3059_v27 = vld [vmem:[%s3907_s17 + $0xd8] sm:$0xf0]  ;;  %v447_v24 = vld [vmem:[%s3893_s14 + $0x80] sm:$0xff] }
  0xce   : > { %v890_v33 = vsel %vm826_vm3, %v762_v23, 0  ;;  %v524_v47 = vunpack.c.h.bf16 %v445_v29  ;;  %v1153_v48 = vunpack.c.l.b16 %v888_v30  ;;  %v521_v50 = vunpack.c.l.bf16 %v444_v38  ;;  %v449_v25 = vld [vmem:[%s3893_s14 + $0x90] sm:$0xff]  ;;  %v3115_v0 = vld [vmem:[%s3907_s17 + $0x148] sm:$0xf0]  ;;  %v3274_v2 = vld [vmem:[%s3907_s17 + $0x1c4] sm:$0xf] }
  0xcf   : > { %v1157_v49 = vunpack.c.l.b16 %v890_v33  ;;  %v522_v51 = vunpack.c.h.bf16 %v444_v38  ;;  %v1154_v52 = vunpack.c.h.b16 %v888_v30  ;;  %v1158_v53 = vunpack.c.h.b16 %v890_v33  ;;  %v448_v38 = vld [vmem:[%s3893_s14 + $0x88] sm:$0xff] }
  0xd0   : > { %v525_v54 = vunpack.c.l.bf16 %v446_v43  ;;  %v526_v55 = vunpack.c.h.bf16 %v446_v43  ;;  %vm4294_vm4 = vcmp.gt.f32.partialorder %v519_v41, 0.0  ;;  %vm4298_vm5 = vcmp.gt.f32.partialorder %v520_v42, 0.0  ;;  %v450_v43 = vld [vmem:[%s3893_s14 + $0x98] sm:$0xff] }
  0xd1   : > { %1724 = vmatmul.bf16.gmra.mxu0 %v4226_v5  ;;  %v4302_v58 = vpack.c.b16 %v1155_v40, %v1151_v39  ;;  %vm4304_vm6 = vcmp.gt.f32.partialorder %v523_v46, 0.0  ;;  %vm4308_vm7 = vcmp.gt.f32.partialorder %v524_v47, 0.0  ;;  %v4312_v61 = vpack.c.b16 %v1156_v45, %v1152_v44  ;;  %vm827_vm10 = vmpackc.low %vm4298_vm5, %vm4294_vm4 }
  0xd2   : > { %1813 = vmatmul.bf16.gmra.mxu1 %v4228_v14  ;;  %v4314_v62 = vpack.c.b16 %v1157_v49, %v1153_v48  ;;  %vm4316_vm8 = vcmp.gt.f32.partialorder %v521_v50, 0.0  ;;  %vm4320_vm9 = vcmp.gt.f32.partialorder %v522_v51, 0.0  ;;  %v4324_v1 = vpack.c.b16 %v1158_v53, %v1154_v52  ;;  %vm829_vm13 = vmpackc.low %vm4308_vm7, %vm4304_vm6 }
  0xd3   : > { %1902 = vmatmul.bf16.gmra.mxu2 %v4230_v15  ;;  %vm4330_vm11 = vcmp.gt.f32.partialorder %v525_v54, 0.0  ;;  %vm4334_vm12 = vcmp.gt.f32.partialorder %v526_v55, 0.0  ;;  %vm828_vm14 = vmpackc.low %vm4320_vm9, %vm4316_vm8  ;;  %v3126_v12 = vor.u32 %v3260_v9, %v3123_v10  ;;  %v3190_v32 = vor.u32 %v3276_v11, %v3187_v16  ;;  %v451_v11 = vld [vmem:[%s3893_s14 + $0xa0] sm:$0xff] }
  0xd4   : > { %1991 = vmatmul.bf16.gmra.mxu3 %v4240_v26  ;;  %vm830_vm15 = vmpackc.low %vm4334_vm12, %vm4330_vm11  ;;  %v2998_v34 = vor.u32 %v3228_v22, %v2995_v31  ;;  %v891_v13 = vsel %vm827_vm10, %v763_v4, 0  ;;  %v893_v17 = vsel %vm829_vm13, %v765_v6, 0  ;;  %v3062_v18 = vor.u32 %v3244_v35, %v3059_v27  ;;  %v767_v4 = vld [vmem:[%s3900_s25 + $0x80] sm:$0xff]  ;;  %v769_v6 = vld [vmem:[%s3900_s25 + $0x90] sm:$0xff] }
  0xd5   : > { %2247 = vmatpush.bf16.msrb.mxu2 %v3126_v12  ;;  %v892_v19 = vsel %vm828_vm14, %v764_v7, 0  ;;  %v894_v23 = vsel %vm830_vm15, %v766_v8, 0  ;;  %2336 = vmatpush.bf16.msrb.mxu3 %v3190_v32  ;;  %v1159_v28 = vunpack.c.l.b16 %v891_v13  ;;  %v1163_v29 = vunpack.c.l.b16 %v893_v17  ;;  %v768_v7 = vld [vmem:[%s3900_s25 + $0x88] sm:$0xff]  ;;  %v770_v8 = vld [vmem:[%s3900_s25 + $0x98] sm:$0xff]  ;;  %v453_v12 = vld [vmem:[%s3893_s14 + $0xb0] sm:$0xff] }
  0xd6   : > { %2069 = vmatpush.bf16.msrb.mxu0 %v2998_v34  ;;  %2158 = vmatpush.bf16.msrb.mxu1 %v3062_v18  ;;  %v1160_v30 = vunpack.c.h.b16 %v891_v13  ;;  %v1164_v33 = vunpack.c.h.b16 %v893_v17  ;;  %v1161_v39 = vunpack.c.l.b16 %v892_v19  ;;  %v1165_v40 = vunpack.c.l.b16 %v894_v23  ;;  %v452_v31 = vld [vmem:[%s3893_s14 + $0xa8] sm:$0xff]  ;;  %v454_v13 = vld [vmem:[%s3893_s14 + $0xb8] sm:$0xff]  ;;  %v771_v55 = vld [vmem:[%s3900_s25 + $0xa0] sm:$0xff] }
  0xd7   : > { %v527_v41 = vunpack.c.l.bf16 %v447_v24  ;;  %v528_v42 = vunpack.c.h.bf16 %v447_v24  ;;  %v1162_v44 = vunpack.c.h.b16 %v892_v19  ;;  %v1166_v45 = vunpack.c.h.b16 %v894_v23 }
  0xd8   : > { %v531_v46 = vunpack.c.l.bf16 %v449_v25  ;;  %v532_v47 = vunpack.c.h.bf16 %v449_v25  ;;  %v529_v48 = vunpack.c.l.bf16 %v448_v38  ;;  %v530_v49 = vunpack.c.h.bf16 %v448_v38 }
  0xd9   : > { %v4390_v50 = vpack.c.b16 %v1163_v29, %v1159_v28  ;;  %v533_v51 = vunpack.c.l.bf16 %v450_v43  ;;  %v534_v52 = vunpack.c.h.bf16 %v450_v43  ;;  %v4392_v53 = vpack.c.b16 %v1164_v33, %v1160_v30 }
  0xda   : > { %v4394_v54 = vpack.c.b16 %v1165_v40, %v1161_v39  ;;  %vm4396_vm0 = vcmp.gt.f32.partialorder %v527_v41, 0.0  ;;  %vm4400_vm1 = vcmp.gt.f32.partialorder %v528_v42, 0.0  ;;  %v4404_v57 = vpack.c.b16 %v1166_v45, %v1162_v44 }
  0xdb   : > { %vm4406_vm2 = vcmp.gt.f32.partialorder %v531_v46, 0.0  ;;  %vm4410_vm3 = vcmp.gt.f32.partialorder %v532_v47, 0.0  ;;  %vm4414_vm4 = vcmp.gt.f32.partialorder %v529_v48, 0.0  ;;  %vm4418_vm5 = vcmp.gt.f32.partialorder %v530_v49, 0.0  ;;  %vm831_vm6 = vmpackc.low %vm4400_vm1, %vm4396_vm0 }
  0xdc   : > { %vm4427_vm7 = vcmp.gt.f32.partialorder %v533_v51, 0.0  ;;  %vm4431_vm8 = vcmp.gt.f32.partialorder %v534_v52, 0.0  ;;  %vm833_vm9 = vmpackc.low %vm4410_vm3, %vm4406_vm2  ;;  %v895_v9 = vsel %vm831_vm6, %v767_v4, 0  ;;  %v535_v35 = vunpack.c.l.bf16 %v451_v11  ;;  %v3179_v4 = vld [vmem:[%s3907_s17 + $0x1c8] sm:$0xf0] }
  0xdd   : > { %vm832_vm10 = vmpackc.low %vm4418_vm5, %vm4414_vm4  ;;  %v897_v10 = vsel %vm833_vm9, %v769_v6, 0  ;;  %v1167_v32 = vunpack.c.l.b16 %v895_v9  ;;  %v536_v27 = vunpack.c.h.bf16 %v451_v11  ;;  %v1168_v17 = vunpack.c.h.b16 %v895_v9  ;;  %v3226_v6 = vld [vmem:[%s3907_s17 + $0x44] sm:$0xf]  ;;  %v3051_v11 = vld [vmem:[%s3907_s17 + $0xc8] sm:$0xf0] }
  0xde   : > { %vm834_vm11 = vmpackc.low %vm4431_vm8, %vm4427_vm7  ;;  %v896_v16 = vsel %vm832_vm10, %v768_v7, 0  ;;  %v1171_v34 = vunpack.c.l.b16 %v897_v10  ;;  %v1172_v18 = vunpack.c.h.b16 %v897_v10  ;;  %v539_v19 = vunpack.c.l.bf16 %v453_v12  ;;  %v2987_v7 = vld [vmem:[%s3907_s17 + $0x48] sm:$0xf0]  ;;  %v3242_v10 = vld [vmem:[%s3907_s17 + $0xc4] sm:$0xf] }
  0xdf   : > { %v898_v22 = vsel %vm834_vm11, %v770_v8, 0  ;;  %v540_v23 = vunpack.c.h.bf16 %v453_v12  ;;  %v1169_v24 = vunpack.c.l.b16 %v896_v16  ;;  %v537_v28 = vunpack.c.l.bf16 %v452_v31 }
  0xe0   : > { %v1173_v25 = vunpack.c.l.b16 %v898_v22  ;;  %v538_v29 = vunpack.c.h.bf16 %v452_v31  ;;  %v1170_v30 = vunpack.c.h.b16 %v896_v16  ;;  %v1174_v33 = vunpack.c.h.b16 %v898_v22 }
  0xe1   : > { %1729 = vmatmul.bf16.gmra.mxu0 %v4302_v58  ;;  %v541_v38 = vunpack.c.l.bf16 %v454_v13  ;;  %v542_v39 = vunpack.c.h.bf16 %v454_v13  ;;  %vm4458_vm12 = vcmp.gt.f32.partialorder %v535_v35, 0.0  ;;  %vm4462_vm13 = vcmp.gt.f32.partialorder %v536_v27, 0.0  ;;  %v457_v35 = vld [vmem:[%s3893_s14 + $0xd0] sm:$0xff] }
  0xe2   : > { %1818 = vmatmul.bf16.gmra.mxu1 %v4312_v61  ;;  %v4466_v42 = vpack.c.b16 %v1171_v34, %v1167_v32  ;;  %vm4468_vm14 = vcmp.gt.f32.partialorder %v539_v19, 0.0  ;;  %vm4472_vm15 = vcmp.gt.f32.partialorder %v540_v23, 0.0  ;;  %v4476_v45 = vpack.c.b16 %v1172_v18, %v1168_v17  ;;  %vm835_vm2 = vmpackc.low %vm4462_vm13, %vm4458_vm12  ;;  %v455_v34 = vld [vmem:[%s3893_s14 + $0xc0] sm:$0xff]  ;;  %v456_v19 = vld [vmem:[%s3893_s14 + $0xc8] sm:$0xff] }
  0xe3   : > { %1907 = vmatmul.bf16.gmra.mxu2 %v4314_v62  ;;  %v4478_v46 = vpack.c.b16 %v1173_v25, %v1169_v24  ;;  %vm4480_vm0 = vcmp.gt.f32.partialorder %v537_v28, 0.0  ;;  %vm4484_vm1 = vcmp.gt.f32.partialorder %v538_v29, 0.0  ;;  %v4488_v49 = vpack.c.b16 %v1174_v33, %v1170_v30  ;;  %vm837_vm5 = vmpackc.low %vm4472_vm15, %vm4468_vm14  ;;  %v458_v29 = vld [vmem:[%s3893_s14 + $0xd8] sm:$0xff] }
  0xe4   : > { %1996 = vmatmul.bf16.gmra.mxu3 %v4324_v1  ;;  %vm4494_vm3 = vcmp.gt.f32.partialorder %v541_v38, 0.0  ;;  %vm4498_vm4 = vcmp.gt.f32.partialorder %v542_v39, 0.0  ;;  %vm836_vm6 = vmpackc.low %vm4484_vm1, %vm4480_vm0  ;;  %v3118_v3 = vor.u32 %v3258_v63, %v3115_v0  ;;  %v3182_v8 = vor.u32 %v3274_v2, %v3179_v4  ;;  %v775_v4 = vld [vmem:[%s3900_s25 + $0xc0] sm:$0xff]  ;;  %v3224_v0 = vld [vmem:[%s3907_s17 + $0x34] sm:$0xf] }
  0xe5   : > { %vm838_vm7 = vmpackc.low %vm4498_vm4, %vm4494_vm3  ;;  %v2990_v9 = vor.u32 %v3226_v6, %v2987_v7  ;;  %v899_v12 = vsel %vm835_vm2, %v771_v55, 0  ;;  %v901_v16 = vsel %vm837_vm5, %v773_v56, 0  ;;  %v3054_v22 = vor.u32 %v3242_v10, %v3051_v11  ;;  %v777_v6 = vld [vmem:[%s3900_s25 + $0xd0] sm:$0xff]  ;;  %v776_v7 = vld [vmem:[%s3900_s25 + $0xc8] sm:$0xff] }
  0xe6   : > { %2248 = vmatpush.bf16.msrb.mxu2 %v3118_v3  ;;  %v900_v31 = vsel %vm836_vm6, %v772_v59, 0  ;;  %v902_v32 = vsel %vm838_vm7, %v774_v60, 0  ;;  %2337 = vmatpush.bf16.msrb.mxu3 %v3182_v8  ;;  %v1175_v27 = vunpack.c.l.b16 %v899_v12  ;;  %v1179_v13 = vunpack.c.l.b16 %v901_v16  ;;  %v778_v8 = vld [vmem:[%s3900_s25 + $0xd8] sm:$0xff]  ;;  %v459_v11 = vld [vmem:[%s3893_s14 + $0xe0] sm:$0xff]  ;;  %v3240_v3 = vld [vmem:[%s3907_s17 + $0xb4] sm:$0xf] }
  0xe7   : > { %2070 = vmatpush.bf16.msrb.mxu0 %v2990_v9  ;;  %2159 = vmatpush.bf16.msrb.mxu1 %v3054_v22  ;;  %v1176_v17 = vunpack.c.h.b16 %v899_v12  ;;  %v1180_v18 = vunpack.c.h.b16 %v901_v16  ;;  %v1177_v23 = vunpack.c.l.b16 %v900_v31  ;;  %v1181_v24 = vunpack.c.l.b16 %v902_v32  ;;  %v461_v22 = vld [vmem:[%s3893_s14 + $0xf0] sm:$0xff]  ;;  %v779_v2 = vld [vmem:[%s3900_s25 + $0xe0] sm:$0xff] }
  0xe8   : > { %v543_v25 = vunpack.c.l.bf16 %v455_v34  ;;  %v544_v28 = vunpack.c.h.bf16 %v455_v34  ;;  %v1178_v30 = vunpack.c.h.b16 %v900_v31  ;;  %v1182_v33 = vunpack.c.h.b16 %v902_v32  ;;  %v460_v34 = vld [vmem:[%s3893_s14 + $0xe8] sm:$0xff] }
  0xe9   : > { %v547_v38 = vunpack.c.l.bf16 %v457_v35  ;;  %v548_v39 = vunpack.c.h.bf16 %v457_v35  ;;  %v545_v40 = vunpack.c.l.bf16 %v456_v19  ;;  %v546_v41 = vunpack.c.h.bf16 %v456_v19 }
  0xea   : > { %v4554_v43 = vpack.c.b16 %v1179_v13, %v1175_v27  ;;  %v549_v44 = vunpack.c.l.bf16 %v458_v29  ;;  %v550_v47 = vunpack.c.h.bf16 %v458_v29  ;;  %v4556_v48 = vpack.c.b16 %v1180_v18, %v1176_v17 }
  0xeb   : > { %v4558_v51 = vpack.c.b16 %v1181_v24, %v1177_v23  ;;  %vm4560_vm8 = vcmp.gt.f32.partialorder %v543_v25, 0.0  ;;  %vm4564_vm9 = vcmp.gt.f32.partialorder %v544_v28, 0.0  ;;  %v4568_v56 = vpack.c.b16 %v1182_v33, %v1178_v30  ;;  %v462_v25 = vld [vmem:[%s3893_s14 + $0xf8] sm:$0xff] }
  0xec   : > { %vm4570_vm10 = vcmp.gt.f32.partialorder %v547_v38, 0.0  ;;  %vm4574_vm11 = vcmp.gt.f32.partialorder %v548_v39, 0.0  ;;  %vm4578_vm12 = vcmp.gt.f32.partialorder %v545_v40, 0.0  ;;  %vm4582_vm13 = vcmp.gt.f32.partialorder %v546_v41, 0.0  ;;  %vm839_vm14 = vmpackc.low %vm4564_vm9, %vm4560_vm8 }
  0xed   : > { %vm4591_vm15 = vcmp.gt.f32.partialorder %v549_v44, 0.0  ;;  %vm4595_vm0 = vcmp.gt.f32.partialorder %v550_v47, 0.0  ;;  %vm841_vm1 = vmpackc.low %vm4574_vm11, %vm4570_vm10  ;;  %v903_v9 = vsel %vm839_vm14, %v775_v4, 0  ;;  %v551_v13 = vunpack.c.l.bf16 %v459_v11 }
  0xee   : > { %vm840_vm2 = vmpackc.low %vm4582_vm13, %vm4578_vm12  ;;  %v905_v10 = vsel %vm841_vm1, %v777_v6, 0  ;;  %v1183_v31 = vunpack.c.l.b16 %v903_v9  ;;  %v1184_v35 = vunpack.c.h.b16 %v903_v9  ;;  %v552_v17 = vunpack.c.h.bf16 %v459_v11  ;;  %v781_v6 = vld [vmem:[%s3900_s25 + $0xf0] sm:$0xff]  ;;  %v3107_v9 = vld [vmem:[%s3907_s17 + $0x138] sm:$0xf0] }
  0xef   : > { %vm842_vm3 = vmpackc.low %vm4595_vm0, %vm4591_vm15  ;;  %v904_v12 = vsel %vm840_vm2, %v776_v7, 0  ;;  %v1187_v32 = vunpack.c.l.b16 %v905_v10  ;;  %v1188_v27 = vunpack.c.h.b16 %v905_v10  ;;  %v555_v23 = vunpack.c.l.bf16 %v461_v22  ;;  %v780_v7 = vld [vmem:[%s3900_s25 + $0xe8] sm:$0xff]  ;;  %v3272_v10 = vld [vmem:[%s3907_s17 + $0x1b4] sm:$0xf] }
  0xf0   : > { %v906_v16 = vsel %vm842_vm3, %v778_v8, 0  ;;  %v1185_v18 = vunpack.c.l.b16 %v904_v12  ;;  %v556_v24 = vunpack.c.h.bf16 %v461_v22  ;;  %v1186_v28 = vunpack.c.h.b16 %v904_v12  ;;  %v3256_v8 = vld [vmem:[%s3907_s17 + $0x134] sm:$0xf]  ;;  %v782_v11 = vld [vmem:[%s3900_s25 + $0xf8] sm:$0xff] }
  0xf1   : > { %1734 = vmatmul.bf16.gmra.mxu0 %v4390_v50  ;;  %v1189_v19 = vunpack.c.l.b16 %v906_v16  ;;  %v1190_v29 = vunpack.c.h.b16 %v906_v16  ;;  %v553_v30 = vunpack.c.l.bf16 %v460_v34  ;;  %v554_v33 = vunpack.c.h.bf16 %v460_v34  ;;  %v3171_v16 = vld [vmem:[%s3907_s17 + $0x1b8] sm:$0xf0] }
  0xf2   : > { %1823 = vmatmul.bf16.gmra.mxu1 %v4392_v53  ;;  %v4622_v38 = vpack.c.b16 %v1187_v32, %v1183_v31  ;;  %vm4624_vm4 = vcmp.gt.f32.partialorder %v551_v13, 0.0  ;;  %vm4628_vm5 = vcmp.gt.f32.partialorder %v552_v17, 0.0  ;;  %v557_v41 = vunpack.c.l.bf16 %v462_v25 }
  0xf3   : > { %1912 = vmatmul.bf16.gmra.mxu2 %v4394_v54  ;;  %v558_v44 = vunpack.c.h.bf16 %v462_v25  ;;  %v4632_v47 = vpack.c.b16 %v1188_v27, %v1184_v35  ;;  %v4634_v52 = vpack.c.b16 %v1189_v19, %v1185_v18  ;;  %vm4636_vm6 = vcmp.gt.f32.partialorder %v555_v23, 0.0  ;;  %vm843_vm10 = vmpackc.low %vm4628_vm5, %vm4624_vm4  ;;  %v463_v27 = vld [vmem:[%s3893_s14 + $0x100] sm:$0xff]  ;;  %v465_v18 = vld [vmem:[%s3893_s14 + $0x110] sm:$0xff] }
  0xf4   : > { %2001 = vmatmul.bf16.gmra.mxu3 %v4404_v57  ;;  %vm4640_vm7 = vcmp.gt.f32.partialorder %v556_v24, 0.0  ;;  %v4644_v60 = vpack.c.b16 %v1190_v29, %v1186_v28  ;;  %vm4646_vm8 = vcmp.gt.f32.partialorder %v553_v30, 0.0  ;;  %vm4650_vm9 = vcmp.gt.f32.partialorder %v554_v33, 0.0  ;;  %v464_v24 = vld [vmem:[%s3893_s14 + $0x108] sm:$0xff]  ;;  %v466_v33 = vld [vmem:[%s3893_s14 + $0x118] sm:$0xff] }
  0xf5   : > { %vm845_vm11 = vmpackc.low %vm4640_vm7, %vm4636_vm6  ;;  %vm4664_vm12 = vcmp.gt.f32.partialorder %v557_v41, 0.0  ;;  %vm4668_vm13 = vcmp.gt.f32.partialorder %v558_v44, 0.0  ;;  %v3110_v12 = vor.u32 %v3256_v8, %v3107_v9  ;;  %v907_v22 = vsel %vm843_vm10, %v779_v2, 0  ;;  %v2979_v2 = vld [vmem:[%s3907_s17 + $0x38] sm:$0xf0] }
  0xf6   : > { %vm844_vm14 = vmpackc.low %vm4650_vm9, %vm4646_vm8  ;;  %v909_v31 = vsel %vm845_vm11, %v781_v6, 0  ;;  %v3174_v32 = vor.u32 %v3272_v10, %v3171_v16  ;;  %v1191_v13 = vunpack.c.l.b16 %v907_v22  ;;  %v1192_v19 = vunpack.c.h.b16 %v907_v22  ;;  %v3043_v9 = vld [vmem:[%s3907_s17 + $0xb8] sm:$0xf0] }
  0xf7   : > { %vm846_vm15 = vmpackc.low %vm4668_vm13, %vm4664_vm12  ;;  %2249 = vmatpush.bf16.msrb.mxu2 %v3110_v12  ;;  %v908_v34 = vsel %vm844_vm14, %v780_v7, 0  ;;  %v1195_v17 = vunpack.c.l.b16 %v909_v31  ;;  %v1196_v23 = vunpack.c.h.b16 %v909_v31  ;;  %v559_v29 = vunpack.c.l.bf16 %v463_v27 }
  0xf8   : > { %v910_v35 = vsel %vm846_vm15, %v782_v11, 0  ;;  %2338 = vmatpush.bf16.msrb.mxu3 %v3174_v32  ;;  %v1193_v25 = vunpack.c.l.b16 %v908_v34  ;;  %v560_v30 = vunpack.c.h.bf16 %v463_v27  ;;  %v1194_v39 = vunpack.c.h.b16 %v908_v34 }
  0xf9   : > { %v1197_v28 = vunpack.c.l.b16 %v910_v35  ;;  %v1198_v40 = vunpack.c.h.b16 %v910_v35  ;;  %v563_v41 = vunpack.c.l.bf16 %v465_v18  ;;  %v564_v44 = vunpack.c.h.bf16 %v465_v18  ;;  %v785_v18 = vld [vmem:[%s3900_s25 + $0x110] sm:$0xff] }
  0xfa   : > { %v4704_v55 = vpack.c.b16 %v1195_v17, %v1191_v13  ;;  %v561_v59 = vunpack.c.l.bf16 %v464_v24  ;;  %v562_v63 = vunpack.c.h.bf16 %v464_v24  ;;  %v4709_v4 = vpack.c.b16 %v1196_v23, %v1192_v19  ;;  %v783_v17 = vld [vmem:[%s3900_s25 + $0x100] sm:$0xff]  ;;  %v784_v19 = vld [vmem:[%s3900_s25 + $0x108] sm:$0xff]  ;;  %v786_v23 = vld [vmem:[%s3900_s25 + $0x118] sm:$0xff] }
  0xfb   : > { %v565_v6 = vunpack.c.l.bf16 %v466_v33  ;;  %v566_v7 = vunpack.c.h.bf16 %v466_v33  ;;  %v2982_v8 = vor.u32 %v3224_v0, %v2979_v2  ;;  %v4712_v10 = vpack.c.b16 %v1197_v28, %v1193_v25  ;;  %v467_v24 = vld [vmem:[%s3893_s14 + $0x120] sm:$0xff]  ;;  %v470_v2 = vld [vmem:[%s3893_s14 + $0x138] sm:$0xff] }
  0xfc   : > { %vm4714_vm0 = vcmp.gt.f32.partialorder %v559_v29, 0.0  ;;  %vm4718_vm1 = vcmp.gt.f32.partialorder %v560_v30, 0.0  ;;  %v3046_v16 = vor.u32 %v3240_v3, %v3043_v9  ;;  %v4722_v22 = vpack.c.b16 %v1198_v40, %v1194_v39  ;;  %v469_v29 = vld [vmem:[%s3893_s14 + $0x130] sm:$0xff] }
  0xfd   : > { %vm4724_vm2 = vcmp.gt.f32.partialorder %v563_v41, 0.0  ;;  %vm4728_vm3 = vcmp.gt.f32.partialorder %v564_v44, 0.0  ;;  %2071 = vmatpush.bf16.msrb.mxu0 %v2982_v8  ;;  %vm4732_vm4 = vcmp.gt.f32.partialorder %v561_v59, 0.0  ;;  %vm4736_vm5 = vcmp.gt.f32.partialorder %v562_v63, 0.0  ;;  %vm847_vm6 = vmpackc.low %vm4718_vm1, %vm4714_vm0  ;;  %v468_v41 = vld [vmem:[%s3893_s14 + $0x128] sm:$0xff] }
  0xfe   : > { %5773 = vst [vmem:[#allocation26_spill] sm:$0xff] %v4722_v22  ;;  %2160 = vmatpush.bf16.msrb.mxu1 %v3046_v16  ;;  %vm4745_vm7 = vcmp.gt.f32.partialorder %v565_v6, 0.0  ;;  %vm4749_vm8 = vcmp.gt.f32.partialorder %v566_v7, 0.0  ;;  %vm849_vm9 = vmpackc.low %vm4728_vm3, %vm4724_vm2  ;;  %v911_v25 = vsel %vm847_vm6, %v783_v17, 0  ;;  %v567_v39 = vunpack.c.l.bf16 %v467_v24 }
  0xff   : > { %vm848_vm10 = vmpackc.low %vm4736_vm5, %vm4732_vm4  ;;  %v913_v28 = vsel %vm849_vm9, %v785_v18, 0  ;;  %v568_v40 = vunpack.c.h.bf16 %v467_v24  ;;  %v1199_v44 = vunpack.c.l.b16 %v911_v25  ;;  %v571_v63 = vunpack.c.l.bf16 %v469_v29 }
 0x100   : > { %vm850_vm11 = vmpackc.low %vm4749_vm8, %vm4745_vm7  ;;  %v912_v30 = vsel %vm848_vm10, %v784_v19, 0  ;;  %v1203_v59 = vunpack.c.l.b16 %v913_v28  ;;  %v572_v0 = vunpack.c.h.bf16 %v469_v29  ;;  %v1200_v3 = vunpack.c.h.b16 %v911_v25 }
 0x101   : > { %1739 = vmatmul.bf16.gmra.mxu0 %v4466_v42  ;;  %v914_v33 = vsel %vm850_vm11, %v786_v23, 0  ;;  %v1204_v6 = vunpack.c.h.b16 %v913_v28  ;;  %v1201_v7 = vunpack.c.l.b16 %v912_v30  ;;  %v1202_v9 = vunpack.c.h.b16 %v912_v30  ;;  %v787_v30 = vld [vmem:[%s3900_s25 + $0x120] sm:$0xff]  ;;  %v472_v28 = vld [vmem:[%s3893_s14 + $0x148] sm:$0xff] }
 0x102   : > { %1828 = vmatmul.bf16.gmra.mxu1 %v4476_v45  ;;  %v1205_v8 = vunpack.c.l.b16 %v914_v33  ;;  %v1206_v11 = vunpack.c.h.b16 %v914_v33  ;;  %v569_v12 = vunpack.c.l.bf16 %v468_v41  ;;  %v570_v16 = vunpack.c.h.bf16 %v468_v41  ;;  %v789_v33 = vld [vmem:[%s3900_s25 + $0x130] sm:$0xff] }
 0x103   : > { %1917 = vmatmul.bf16.gmra.mxu2 %v4478_v46  ;;  %vm4776_vm12 = vcmp.gt.f32.partialorder %v567_v39, 0.0  ;;  %vm4780_vm13 = vcmp.gt.f32.partialorder %v568_v40, 0.0  ;;  %v573_v34 = vunpack.c.l.bf16 %v470_v2  ;;  %v574_v35 = vunpack.c.h.bf16 %v470_v2  ;;  %v3254_v2 = vld [vmem:[%s3907_s17 + $0x124] sm:$0xf]  ;;  %v473_v40 = vld [vmem:[%s3893_s14 + $0x150] sm:$0xff] }
 0x104   : > { %2006 = vmatmul.bf16.gmra.mxu3 %v4488_v49  ;;  %v4784_v27 = vpack.c.b16 %v1203_v59, %v1199_v44  ;;  %vm4786_vm14 = vcmp.gt.f32.partialorder %v571_v63, 0.0  ;;  %vm4790_vm15 = vcmp.gt.f32.partialorder %v572_v0, 0.0  ;;  %v4794_v19 = vpack.c.b16 %v1204_v6, %v1200_v3  ;;  %vm851_vm0 = vmpackc.low %vm4780_vm13, %vm4776_vm12  ;;  %v788_v63 = vld [vmem:[%s3900_s25 + $0x128] sm:$0xff]  ;;  %v790_v0 = vld [vmem:[%s3900_s25 + $0x138] sm:$0xff] }
 0x105   : > { %v4796_v23 = vpack.c.b16 %v1205_v8, %v1201_v7  ;;  %v4798_v25 = vpack.c.b16 %v1206_v11, %v1202_v9  ;;  %vm4804_vm1 = vcmp.gt.f32.partialorder %v569_v12, 0.0  ;;  %vm4808_vm2 = vcmp.gt.f32.partialorder %v570_v16, 0.0  ;;  %vm853_vm3 = vmpackc.low %vm4790_vm15, %vm4786_vm14  ;;  %v3099_v3 = vld [vmem:[%s3907_s17 + $0x128] sm:$0xf0]  ;;  %v3270_v6 = vld [vmem:[%s3907_s17 + $0x1a4] sm:$0xf] }
 0x106   : > { %5790 = vst [vmem:[#allocation27_spill] sm:$0xff] %v4784_v27  ;;  %vm4818_vm4 = vcmp.gt.f32.partialorder %v573_v34, 0.0  ;;  %vm4822_vm5 = vcmp.gt.f32.partialorder %v574_v35, 0.0  ;;  %vm852_vm6 = vmpackc.low %vm4808_vm2, %vm4804_vm1  ;;  %v915_v44 = vsel %vm851_vm0, %v787_v30, 0  ;;  %v917_v59 = vsel %vm853_vm3, %v789_v33, 0  ;;  %v943_v35 = vld [vmem:[#allocation2 + $0xb0] sm:$0xff] }
 0x107   : > { %5795 = vst [vmem:[#allocation28_spill] sm:$0xff] %v4794_v19  ;;  %vm854_vm7 = vmpackc.low %vm4822_vm5, %vm4818_vm4  ;;  %v3102_v8 = vor.u32 %v3254_v2, %v3099_v3  ;;  %v3163_v9 = vld [vmem:[%s3907_s17 + $0x1a8] sm:$0xf0]  ;;  %v916_v31 = vsel %vm852_vm6, %v788_v63, 0  ;;  %v1207_v17 = vunpack.c.l.b16 %v915_v44  ;;  %v1208_v33 = vunpack.c.h.b16 %v915_v44 }
 0x108   : > { %5796 = vst [vmem:[#allocation29_spill] sm:$0xff] %v4796_v23  ;;  %v918_v32 = vsel %vm854_vm7, %v790_v0, 0  ;;  %v3166_v34 = vor.u32 %v3270_v6, %v3163_v9  ;;  %v1212_v39 = vunpack.c.h.b16 %v917_v59  ;;  %v1209_v29 = vunpack.c.l.b16 %v916_v31  ;;  %v474_v6 = vld [vmem:[%s3893_s14 + $0x158] sm:$0xff] }
 0x109   : > { %5797 = vst [vmem:[#allocation30_spill] sm:$0xff] %v4798_v25  ;;  %2250 = vmatpush.bf16.msrb.mxu2 %v3102_v8  ;;  %v1210_v0 = vunpack.c.h.b16 %v916_v31  ;;  %v1214_v9 = vunpack.c.h.b16 %v918_v32  ;;  %v579_v8 = vunpack.c.l.bf16 %v473_v40  ;;  %v580_v44 = vunpack.c.h.bf16 %v473_v40 }
 0x10a   : > { %2339 = vmatpush.bf16.msrb.mxu3 %v3166_v34  ;;  %v578_v34 = vunpack.c.h.bf16 %v472_v28 }
 0x10b   : > { %vm4873_vm10 = vcmp.gt.f32.partialorder %v579_v8, 0.0  ;;  %vm4877_vm11 = vcmp.gt.f32.partialorder %v580_v44, 0.0 }
 0x10c   : > { %vm4885_vm13 = vcmp.gt.f32.partialorder %v578_v34, 0.0  ;;  %vm857_vm1 = vmpackc.low %vm4877_vm11, %vm4873_vm10 }
 0x111   : > { %1744 = vmatmul.bf16.gmra.mxu0 %v4554_v43 }
 0x112   : > { %1833 = vmatmul.bf16.gmra.mxu1 %v4556_v48 }
 0x113   : > { %1922 = vmatmul.bf16.gmra.mxu2 %v4558_v51 }
 0x114   : > { %2011 = vmatmul.bf16.gmra.mxu3 %v4568_v56 }
 0x121   : > { %1749 = vmatmul.bf16.gmra.mxu0 %v4622_v38 }
 0x122   : > { %1838 = vmatmul.bf16.gmra.mxu1 %v4632_v47 }
 0x123   : > { %1927 = vmatmul.bf16.gmra.mxu2 %v4634_v52 }
 0x124   : > { %2016 = vmatmul.bf16.gmra.mxu3 %v4644_v60 }
 0x131   : > { %1754 = vmatmul.bf16.gmra.mxu0 %v4704_v55 }
 0x132   : > { %1843 = vmatmul.bf16.gmra.mxu1 %v4709_v4 }
 0x133   : > { %1932 = vmatmul.bf16.gmra.mxu2 %v4712_v10 }
 0x134   : > { %2021 = vmatmul.bf16.gmra.mxu3 %v4722_v22 }
 0x13e   : > { %v1720_v18 = vpop.f32.mrf.mxu0 }
 0x13f   : > { %v1809_v24 = vpop.f32.mrf.mxu1 }
 0x140   : > { %v1810_v41 = vadd.f32 %v1809_v24, %v1720_v18  ;;  %v1211_v18 = vunpack.c.l.b16 %v917_v59  ;;  %v471_v24 = vld [vmem:[%s3893_s14 + $0x140] sm:$0xff] }
 0x141   : > { %1759 = vmatmul.bf16.gmra.mxu0 %v4784_v27  ;;  %v575_v2 = vunpack.c.l.bf16 %v471_v24  ;;  %v576_v3 = vunpack.c.h.bf16 %v471_v24  ;;  %v581_v24 = vunpack.c.l.bf16 %v474_v6 }
 0x142   : > { %1848 = vmatmul.bf16.gmra.mxu1 %v4794_v19  ;;  %v3035_v19 = vld [vmem:[%s3907_s17 + $0xa8] sm:$0xf0] }
 0x143   : > { %1937 = vmatmul.bf16.gmra.mxu2 %v4796_v23  ;;  %v2971_v23 = vld [vmem:[%s3907_s17 + $0x28] sm:$0xf0]  ;;  %vm4863_vm8 = vcmp.gt.f32.partialorder %v575_v2, 0.0  ;;  %vm4867_vm9 = vcmp.gt.f32.partialorder %v576_v3, 0.0  ;;  %vm4894_vm15 = vcmp.gt.f32.partialorder %v581_v24, 0.0  ;;  %v791_v3 = vld [vmem:[%s3900_s25 + $0x140] sm:$0xff] }
 0x144   : > { %2026 = vmatmul.bf16.gmra.mxu3 %v4798_v25  ;;  %v3222_v25 = vld [vmem:[%s3907_s17 + $0x24] sm:$0xf]  ;;  %vm855_vm14 = vmpackc.low %vm4867_vm9, %vm4863_vm8 }
 0x145   : > { %v919_v44 = vsel %vm855_vm14, %v791_v3, 0 }
 0x146   : > { %v1898_v7 = vpop.f32.mrf.mxu2  ;;  %v1722_v16 = vpop.f32.mrf.mxu0 }
 0x147   : > { %v1899_v11 = vadd.f32 %v1898_v7, %v1810_v41  ;;  %v1987_v12 = vpop.f32.mrf.mxu3  ;;  %v1811_v13 = vpop.f32.mrf.mxu1  ;;  %v1213_v41 = vunpack.c.l.b16 %v918_v32  ;;  %v4853_v7 = vpack.c.b16 %v1211_v18, %v1207_v17  ;;  %v2974_v17 = vor.u32 %v3222_v25, %v2971_v23  ;;  %v3238_v18 = vld [vmem:[%s3907_s17 + $0xa4] sm:$0xf]  ;;  %v476_v25 = vld [vmem:[%s3893_s14 + $0x168] sm:$0xff] }
 0x148   : > { %v1812_v59 = vadd.f32 %v1811_v13, %v1722_v16  ;;  %v3038_v13 = vor.u32 %v3238_v18, %v3035_v19  ;;  %v1216_v16 = vunpack.c.h.b16 %v919_v44 }
 0x149   : > { %v1988_v30 = vadd.f32 %v1987_v12, %v1899_v11  ;;  %5806 = vst [vmem:[#allocation31_spill] sm:$0xff] %v4853_v7  ;;  %v4855_v11 = vpack.c.b16 %v1212_v39, %v1208_v33  ;;  %v577_v12 = vunpack.c.l.bf16 %v472_v28  ;;  %v4859_v31 = vpack.c.b16 %v1213_v41, %v1209_v29  ;;  %v945_v33 = vld [vmem:[#allocation2 + $0xd8] sm:$0xff]  ;;  %2072 = vmatpush.bf16.msrb.mxu0 %v2974_v17  ;;  %v947_v17 = vld [vmem:[#allocation2 + $0x50] sm:$0xff] }
 0x14a   : > { %v4871_v29 = vpack.c.b16 %v1214_v9, %v1210_v0  ;;  %2161 = vmatpush.bf16.msrb.mxu1 %v3038_v13  ;;  %v792_v9 = vld [vmem:[%s3900_s25 + $0x148] sm:$0xff]  ;;  %v477_v13 = vld [vmem:[%s3893_s14 + $0x170] sm:$0xff] }
 0x14b   : > { %v2423_v63 = vadd.f32 %v1988_v30, %v943_v35  ;;  %5807 = vst [vmem:[#allocation32_spill] sm:$0xff] %v4855_v11  ;;  %v582_v30 = vunpack.c.h.bf16 %v474_v6  ;;  %vm4881_vm12 = vcmp.gt.f32.partialorder %v577_v12, 0.0  ;;  %v793_v6 = vld [vmem:[%s3900_s25 + $0x150] sm:$0xff]  ;;  %v588_v3 = vunpack.c.h.bf16 %v477_v13 }
 0x14c   : > { %5808 = vst [vmem:[#allocation33_spill] sm:$0xff] %v4859_v31  ;;  %vm856_vm2 = vmpackc.low %vm4885_vm13, %vm4881_vm12 }
 0x14d   : > { %2487 = vst [vmem:[#allocation2 + $0xb0] sm:$0xff] %v2423_v63  ;;  %vm4898_vm0 = vcmp.gt.f32.partialorder %v582_v30, 0.0  ;;  %v920_v24 = vsel %vm856_vm2, %v792_v9, 0  ;;  %v475_v30 = vld [vmem:[%s3893_s14 + $0x160] sm:$0xff]  ;;  %vm4948_vm7 = vcmp.gt.f32.partialorder %v588_v3, 0.0  ;;  %v798_v3 = vld [vmem:[%s3900_s25 + $0x178] sm:$0xff] }
 0x14e   : > { %v1900_v35 = vpop.f32.mrf.mxu2  ;;  %v1725_v22 = vpop.f32.mrf.mxu0  ;;  %5813 = vst [vmem:[#allocation34_spill] sm:$0xff] %v4871_v29  ;;  %vm858_vm3 = vmpackc.low %vm4898_vm0, %vm4894_vm15  ;;  %v583_v28 = vunpack.c.l.bf16 %v475_v30  ;;  %v584_v19 = vunpack.c.h.bf16 %v475_v30  ;;  %v3155_v30 = vld [vmem:[%s3907_s17 + $0x198] sm:$0xf0] }
 0x14f   : > { %v1901_v32 = vadd.f32 %v1900_v35, %v1812_v59  ;;  %v1989_v27 = vpop.f32.mrf.mxu3  ;;  %v1814_v39 = vpop.f32.mrf.mxu1  ;;  %v921_v59 = vsel %vm857_vm1, %v793_v6, 0  ;;  %v1218_v6 = vunpack.c.h.b16 %v920_v24 }
 0x150   : > { %v1815_v2 = vadd.f32 %v1814_v39, %v1725_v22  ;;  %v794_v22 = vld [vmem:[%s3900_s25 + $0x158] sm:$0xff]  ;;  %v1215_v39 = vunpack.c.l.b16 %v919_v44  ;;  %v1219_v23 = vunpack.c.l.b16 %v921_v59  ;;  %v1220_v40 = vunpack.c.h.b16 %v921_v59 }
 0x151   : > { %v1990_v41 = vadd.f32 %v1989_v27, %v1901_v32  ;;  %1764 = vmatmul.bf16.gmra.mxu0 %v4853_v7  ;;  %v922_v32 = vsel %vm858_vm3, %v794_v22, 0  ;;  %v478_v27 = vld [vmem:[%s3893_s14 + $0x178] sm:$0xff]  ;;  %vm4934_vm4 = vcmp.gt.f32.partialorder %v583_v28, 0.0  ;;  %vm4938_vm5 = vcmp.gt.f32.partialorder %v584_v19, 0.0  ;;  %v479_v28 = vld [vmem:[%s3893_s14 + $0x180] sm:$0xff] }
 0x152   : > { %1853 = vmatmul.bf16.gmra.mxu1 %v4855_v11  ;;  %v1222_v9 = vunpack.c.h.b16 %v922_v32  ;;  %v4930_v44 = vpack.c.b16 %v1219_v23, %v1215_v39  ;;  %v4932_v59 = vpack.c.b16 %v1220_v40, %v1216_v16  ;;  %v949_v39 = vld [vmem:[#allocation2 + $0x130] sm:$0xff]  ;;  %vm859_vm10 = vmpackc.low %vm4938_vm5, %vm4934_vm4 }
 0x153   : > { %v2425_v0 = vadd.f32 %v1990_v41, %v945_v33  ;;  %1942 = vmatmul.bf16.gmra.mxu2 %v4859_v31  ;;  %v1217_v41 = vunpack.c.l.b16 %v920_v24 }
 0x154   : > { %2031 = vmatmul.bf16.gmra.mxu3 %v4871_v29  ;;  %v586_v29 = vunpack.c.h.bf16 %v476_v25  ;;  %5826 = vst [vmem:[#allocation35_spill] sm:$0xff] %v4930_v44  ;;  %v4952_v16 = vpack.c.b16 %v1222_v9, %v1218_v6  ;;  %v3252_v9 = vld [vmem:[%s3907_s17 + $0x114] sm:$0xf] }
 0x155   : > { %2489 = vst [vmem:[#allocation2 + $0xd8] sm:$0xff] %v2425_v0  ;;  %v1221_v0 = vunpack.c.l.b16 %v922_v32 }
 0x156   : > { %v1903_v8 = vpop.f32.mrf.mxu2  ;;  %v1727_v35 = vpop.f32.mrf.mxu0  ;;  %5827 = vst [vmem:[#allocation36_spill] sm:$0xff] %v4932_v59  ;;  %vm4958_vm9 = vcmp.gt.f32.partialorder %v586_v29, 0.0  ;;  %v797_v29 = vld [vmem:[%s3900_s25 + $0x170] sm:$0xff] }
 0x157   : > { %v1904_v12 = vadd.f32 %v1903_v8, %v1815_v2  ;;  %v1992_v34 = vpop.f32.mrf.mxu3  ;;  %v1816_v18 = vpop.f32.mrf.mxu1  ;;  %v587_v2 = vunpack.c.l.bf16 %v477_v13  ;;  %v585_v8 = vunpack.c.l.bf16 %v476_v25  ;;  %5837 = vst [vmem:[#allocation38_spill] sm:$0xff] %v4952_v16  ;;  %v480_v25 = vld [vmem:[%s3893_s14 + $0x188] sm:$0xff] }
 0x158   : > { %v1817_v22 = vadd.f32 %v1816_v18, %v1727_v35  ;;  %v4942_v18 = vpack.c.b16 %v1221_v0, %v1217_v41  ;;  %v795_v41 = vld [vmem:[%s3900_s25 + $0x160] sm:$0xff] }
 0x159   : > { %v1993_v33 = vadd.f32 %v1992_v34, %v1904_v12  ;;  %v589_v12 = vunpack.c.l.bf16 %v478_v27  ;;  %v590_v34 = vunpack.c.h.bf16 %v478_v27  ;;  %vm4944_vm6 = vcmp.gt.f32.partialorder %v587_v2, 0.0  ;;  %v796_v2 = vld [vmem:[%s3900_s25 + $0x168] sm:$0xff] }
 0x15a   : > { %5832 = vst [vmem:[#allocation37_spill] sm:$0xff] %v4942_v18  ;;  %vm4954_vm8 = vcmp.gt.f32.partialorder %v585_v8, 0.0  ;;  %vm861_vm13 = vmpackc.low %vm4948_vm7, %vm4944_vm6  ;;  %v923_v0 = vsel %vm859_vm10, %v795_v41, 0  ;;  %v3091_v8 = vld [vmem:[%s3907_s17 + $0x118] sm:$0xf0] }
 0x15b   : > { %v2427_v63 = vadd.f32 %v1993_v33, %v947_v17  ;;  %vm4967_vm11 = vcmp.gt.f32.partialorder %v589_v12, 0.0  ;;  %vm4971_vm12 = vcmp.gt.f32.partialorder %v590_v34, 0.0  ;;  %vm860_vm14 = vmpackc.low %vm4958_vm9, %vm4954_vm8  ;;  %v925_v6 = vsel %vm861_vm13, %v797_v29, 0  ;;  %v3268_v34 = vld [vmem:[%s3907_s17 + $0x194] sm:$0xf] }
 0x15c   : > { %vm862_vm15 = vmpackc.low %vm4971_vm12, %vm4967_vm11  ;;  %v3094_v12 = vor.u32 %v3252_v9, %v3091_v8  ;;  %v3158_v33 = vor.u32 %v3268_v34, %v3155_v30  ;;  %v1227_v41 = vunpack.c.l.b16 %v925_v6  ;;  %v1224_v29 = vunpack.c.h.b16 %v923_v0  ;;  %v482_v34 = vld [vmem:[%s3893_s14 + $0x198] sm:$0xff] }
 0x15d   : > { %2491 = vst [vmem:[#allocation2 + $0x50] sm:$0xff] %v2427_v63  ;;  %v926_v13 = vsel %vm862_vm15, %v798_v3, 0  ;;  %v591_v8 = vunpack.c.l.bf16 %v479_v28 }
 0x15e   : > { %v1905_v31 = vpop.f32.mrf.mxu2  ;;  %v1730_v35 = vpop.f32.mrf.mxu0  ;;  %2251 = vmatpush.bf16.msrb.mxu2 %v3094_v12  ;;  %2340 = vmatpush.bf16.msrb.mxu3 %v3158_v33  ;;  %v1229_v9 = vunpack.c.l.b16 %v926_v13  ;;  %v594_v33 = vunpack.c.h.bf16 %v480_v25 }
 0x15f   : > { %v1906_v24 = vadd.f32 %v1905_v31, %v1817_v22  ;;  %v1994_v32 = vpop.f32.mrf.mxu3  ;;  %v1819_v23 = vpop.f32.mrf.mxu1  ;;  %vm5017_vm0 = vcmp.gt.f32.partialorder %v591_v8, 0.0  ;;  %v799_v8 = vld [vmem:[%s3900_s25 + $0x180] sm:$0xff] }
 0x160   : > { %v1820_v63 = vadd.f32 %v1819_v23, %v1730_v35  ;;  %v924_v35 = vsel %vm860_vm14, %v796_v2, 0  ;;  %vm5039_vm5 = vcmp.gt.f32.partialorder %v594_v33, 0.0 }
 0x161   : > { %v1995_v40 = vadd.f32 %v1994_v32, %v1906_v24  ;;  %1769 = vmatmul.bf16.gmra.mxu0 %v4930_v44  ;;  %v1225_v31 = vunpack.c.l.b16 %v924_v35  ;;  %v1226_v3 = vunpack.c.h.b16 %v924_v35  ;;  %v3027_v44 = vld [vmem:[%s3907_s17 + $0x98] sm:$0xf0] }
 0x162   : > { %1858 = vmatmul.bf16.gmra.mxu1 %v4932_v59  ;;  %v2963_v59 = vld [vmem:[%s3907_s17 + $0x18] sm:$0xf0] }
 0x163   : > { %v2429_v27 = vadd.f32 %v1995_v40, %v949_v39  ;;  %1947 = vmatmul.bf16.gmra.mxu2 %v4942_v18  ;;  %v951_v39 = vld [vmem:[#allocation2 + $0x180] sm:$0xff]  ;;  %v1223_v40 = vunpack.c.l.b16 %v923_v0  ;;  %v3220_v18 = vld [vmem:[%s3907_s17 + $0x14] sm:$0xf]  ;;  %v5013_v35 = vpack.c.b16 %v1229_v9, %v1225_v31 }
 0x164   : > { %2036 = vmatmul.bf16.gmra.mxu3 %v4952_v16  ;;  %v1230_v16 = vunpack.c.h.b16 %v926_v13 }
 0x165   : > { %2493 = vst [vmem:[#allocation2 + $0x130] sm:$0xff] %v2429_v27  ;;  %v1228_v27 = vunpack.c.h.b16 %v925_v6  ;;  %v5007_v30 = vpack.c.b16 %v1227_v41, %v1223_v40  ;;  %v2966_v40 = vor.u32 %v3220_v18, %v2963_v59  ;;  %v3236_v41 = vld [vmem:[%s3907_s17 + $0x94] sm:$0xf]  ;;  %v484_v18 = vld [vmem:[%s3893_s14 + $0x1a8] sm:$0xff] }
 0x166   : > { %v1908_v22 = vpop.f32.mrf.mxu2  ;;  %v1732_v32 = vpop.f32.mrf.mxu0  ;;  %5848 = vst [vmem:[#allocation41_spill] sm:$0xff] %v5013_v35  ;;  %v5025_v31 = vpack.c.b16 %v1230_v16, %v1226_v3 }
 0x167   : > { %v1909_v17 = vadd.f32 %v1908_v22, %v1820_v63  ;;  %v1997_v24 = vpop.f32.mrf.mxu3  ;;  %v1821_v23 = vpop.f32.mrf.mxu1  ;;  %v481_v63 = vld [vmem:[%s3893_s14 + $0x190] sm:$0xff]  ;;  %v592_v22 = vunpack.c.h.bf16 %v479_v28  ;;  %5846 = vst [vmem:[#allocation39_spill] sm:$0xff] %v5007_v30  ;;  %v597_v28 = vunpack.c.l.bf16 %v482_v34  ;;  %2073 = vmatpush.bf16.msrb.mxu0 %v2966_v40  ;;  %v955_v40 = vld [vmem:[#allocation2 + $0x120] sm:$0xff] }
 0x168   : > { %v595_v12 = vunpack.c.l.bf16 %v481_v63  ;;  %v596_v0 = vunpack.c.h.bf16 %v481_v63  ;;  %v1822_v6 = vadd.f32 %v1821_v23, %v1732_v32  ;;  %v3030_v23 = vor.u32 %v3236_v41, %v3027_v44  ;;  %5853 = vst [vmem:[#allocation42_spill] sm:$0xff] %v5025_v31 }
 0x169   : > { %v1998_v19 = vadd.f32 %v1997_v24, %v1909_v17  ;;  %v5009_v17 = vpack.c.b16 %v1228_v27, %v1224_v29  ;;  %v593_v24 = vunpack.c.l.bf16 %v480_v25  ;;  %vm5021_vm1 = vcmp.gt.f32.partialorder %v592_v22, 0.0  ;;  %v953_v29 = vld [vmem:[#allocation2 + $0x118] sm:$0xff]  ;;  %v801_v22 = vld [vmem:[%s3900_s25 + $0x190] sm:$0xff] }
 0x16a   : > { %vm5027_vm2 = vcmp.gt.f32.partialorder %v595_v12, 0.0  ;;  %vm5031_vm3 = vcmp.gt.f32.partialorder %v596_v0, 0.0  ;;  %2162 = vmatpush.bf16.msrb.mxu1 %v3030_v23  ;;  %vm863_vm6 = vmpackc.low %vm5021_vm1, %vm5017_vm0  ;;  %vm5048_vm7 = vcmp.gt.f32.partialorder %v597_v28, 0.0  ;;  %v485_v23 = vld [vmem:[%s3893_s14 + $0x1b0] sm:$0xff] }
 0x16b   : > { %v2431_v2 = vadd.f32 %v1998_v19, %v951_v39  ;;  %5847 = vst [vmem:[#allocation40_spill] sm:$0xff] %v5009_v17  ;;  %v598_v19 = vunpack.c.h.bf16 %v482_v34  ;;  %vm5035_vm4 = vcmp.gt.f32.partialorder %v593_v24, 0.0  ;;  %vm865_vm9 = vmpackc.low %vm5031_vm3, %vm5027_vm2  ;;  %v800_v34 = vld [vmem:[%s3900_s25 + $0x188] sm:$0xff]  ;;  %v927_v0 = vsel %vm863_vm6, %v799_v8, 0 }
 0x16c   : > { %vm864_vm10 = vmpackc.low %vm5039_vm5, %vm5035_vm4  ;;  %v1232_v32 = vunpack.c.h.b16 %v927_v0  ;;  %v604_v8 = vunpack.c.h.bf16 %v485_v23 }
 0x16d   : > { %2495 = vst [vmem:[#allocation2 + $0x180] sm:$0xff] %v2431_v2  ;;  %vm5052_vm8 = vcmp.gt.f32.partialorder %v598_v19, 0.0  ;;  %v928_v28 = vsel %vm864_vm10, %v800_v34, 0  ;;  %v483_v19 = vld [vmem:[%s3893_s14 + $0x1a0] sm:$0xff] }
 0x16e   : > { %v1910_v39 = vpop.f32.mrf.mxu2  ;;  %v1735_v7 = vpop.f32.mrf.mxu0  ;;  %vm866_vm11 = vmpackc.low %vm5052_vm8, %vm5048_vm7  ;;  %v599_v25 = vunpack.c.l.bf16 %v483_v19  ;;  %v600_v44 = vunpack.c.h.bf16 %v483_v19  ;;  %vm5102_vm15 = vcmp.gt.f32.partialorder %v604_v8, 0.0  ;;  %v806_v8 = vld [vmem:[%s3900_s25 + $0x1b8] sm:$0xff]  ;;  %v3147_v19 = vld [vmem:[%s3907_s17 + $0x188] sm:$0xf0] }
 0x16f   : > { %v1911_v13 = vadd.f32 %v1910_v39, %v1822_v6  ;;  %v1999_v11 = vpop.f32.mrf.mxu3  ;;  %v1824_v27 = vpop.f32.mrf.mxu1  ;;  %v929_v6 = vsel %vm865_vm9, %v801_v22, 0  ;;  %v1234_v22 = vunpack.c.h.b16 %v928_v28 }
 0x170   : > { %v1825_v3 = vadd.f32 %v1824_v27, %v1735_v7  ;;  %v802_v7 = vld [vmem:[%s3900_s25 + $0x198] sm:$0xff]  ;;  %v1231_v27 = vunpack.c.l.b16 %v927_v0  ;;  %v1235_v59 = vunpack.c.l.b16 %v929_v6  ;;  %v1236_v63 = vunpack.c.h.b16 %v929_v6 }
 0x171   : > { %v2000_v9 = vadd.f32 %v1999_v11, %v1911_v13  ;;  %1774 = vmatmul.bf16.gmra.mxu0 %v5007_v30  ;;  %v930_v13 = vsel %vm866_vm11, %v802_v7, 0  ;;  %v486_v11 = vld [vmem:[%s3893_s14 + $0x1b8] sm:$0xff]  ;;  %vm5088_vm12 = vcmp.gt.f32.partialorder %v599_v25, 0.0  ;;  %vm5092_vm13 = vcmp.gt.f32.partialorder %v600_v44, 0.0  ;;  %v487_v25 = vld [vmem:[%s3893_s14 + $0x1c0] sm:$0xff] }
 0x172   : > { %1863 = vmatmul.bf16.gmra.mxu1 %v5009_v17  ;;  %v1238_v34 = vunpack.c.h.b16 %v930_v13  ;;  %v5084_v0 = vpack.c.b16 %v1235_v59, %v1231_v27  ;;  %v5086_v6 = vpack.c.b16 %v1236_v63, %v1232_v32  ;;  %v957_v27 = vld [vmem:[#allocation2 + $0x108] sm:$0xff]  ;;  %vm867_vm2 = vmpackc.low %vm5092_vm13, %vm5088_vm12 }
 0x173   : > { %v2433_v2 = vadd.f32 %v2000_v9, %v953_v29  ;;  %1952 = vmatmul.bf16.gmra.mxu2 %v5013_v35  ;;  %v1233_v9 = vunpack.c.l.b16 %v928_v28 }
 0x174   : > { %2041 = vmatmul.bf16.gmra.mxu3 %v5025_v31  ;;  %v602_v31 = vunpack.c.h.bf16 %v484_v18  ;;  %5866 = vst [vmem:[#allocation43_spill] sm:$0xff] %v5084_v0  ;;  %v5106_v32 = vpack.c.b16 %v1238_v34, %v1234_v22  ;;  %v3250_v34 = vld [vmem:[%s3907_s17 + $0x104] sm:$0xf] }
 0x175   : > { %2497 = vst [vmem:[#allocation2 + $0x118] sm:$0xff] %v2433_v2  ;;  %v1237_v2 = vunpack.c.l.b16 %v930_v13 }
 0x176   : > { %v1913_v12 = vpop.f32.mrf.mxu2  ;;  %v1737_v39 = vpop.f32.mrf.mxu0  ;;  %5867 = vst [vmem:[#allocation44_spill] sm:$0xff] %v5086_v6  ;;  %vm5112_vm1 = vcmp.gt.f32.partialorder %v602_v31, 0.0  ;;  %v805_v31 = vld [vmem:[%s3900_s25 + $0x1b0] sm:$0xff] }
 0x177   : > { %v1914_v24 = vadd.f32 %v1913_v12, %v1825_v3  ;;  %v2002_v33 = vpop.f32.mrf.mxu3  ;;  %v1826_v41 = vpop.f32.mrf.mxu1  ;;  %v603_v3 = vunpack.c.l.bf16 %v485_v23  ;;  %v601_v12 = vunpack.c.l.bf16 %v484_v18  ;;  %5877 = vst [vmem:[#allocation46_spill] sm:$0xff] %v5106_v32  ;;  %v488_v18 = vld [vmem:[%s3893_s14 + $0x1c8] sm:$0xff] }
 0x178   : > { %v1827_v7 = vadd.f32 %v1826_v41, %v1737_v39  ;;  %v5096_v41 = vpack.c.b16 %v1237_v2, %v1233_v9  ;;  %v803_v9 = vld [vmem:[%s3900_s25 + $0x1a0] sm:$0xff] }
 0x179   : > { %v2003_v29 = vadd.f32 %v2002_v33, %v1914_v24  ;;  %v605_v24 = vunpack.c.l.bf16 %v486_v11  ;;  %v606_v33 = vunpack.c.h.bf16 %v486_v11  ;;  %vm5098_vm14 = vcmp.gt.f32.partialorder %v603_v3, 0.0  ;;  %v804_v3 = vld [vmem:[%s3900_s25 + $0x1a8] sm:$0xff] }
 0x17a   : > { %5872 = vst [vmem:[#allocation45_spill] sm:$0xff] %v5096_v41  ;;  %vm5108_vm0 = vcmp.gt.f32.partialorder %v601_v12, 0.0  ;;  %vm869_vm5 = vmpackc.low %vm5102_vm15, %vm5098_vm14  ;;  %v931_v2 = vsel %vm867_vm2, %v803_v9, 0  ;;  %v3083_v12 = vld [vmem:[%s3907_s17 + $0x108] sm:$0xf0] }
 0x17b   : > { %v2435_v16 = vadd.f32 %v2003_v29, %v955_v40  ;;  %vm5121_vm3 = vcmp.gt.f32.partialorder %v605_v24, 0.0  ;;  %vm5125_vm4 = vcmp.gt.f32.partialorder %v606_v33, 0.0  ;;  %vm868_vm6 = vmpackc.low %vm5112_vm1, %vm5108_vm0  ;;  %v933_v22 = vsel %vm869_vm5, %v805_v31, 0  ;;  %v3266_v33 = vld [vmem:[%s3907_s17 + $0x184] sm:$0xf] }
 0x17c   : > { %vm870_vm7 = vmpackc.low %vm5125_vm4, %vm5121_vm3  ;;  %v3086_v24 = vor.u32 %v3250_v34, %v3083_v12  ;;  %v3150_v29 = vor.u32 %v3266_v33, %v3147_v19  ;;  %v1243_v9 = vunpack.c.l.b16 %v933_v22  ;;  %v1240_v31 = vunpack.c.h.b16 %v931_v2  ;;  %v490_v33 = vld [vmem:[%s3893_s14 + $0x1d8] sm:$0xff] }
 0x17d   : > { %2499 = vst [vmem:[#allocation2 + $0x120] sm:$0xff] %v2435_v16  ;;  %v934_v23 = vsel %vm870_vm7, %v806_v8, 0  ;;  %v607_v12 = vunpack.c.l.bf16 %v487_v25 }
 0x17e   : > { %v1915_v35 = vpop.f32.mrf.mxu2  ;;  %v1740_v39 = vpop.f32.mrf.mxu0  ;;  %2252 = vmatpush.bf16.msrb.mxu2 %v3086_v24  ;;  %2341 = vmatpush.bf16.msrb.mxu3 %v3150_v29  ;;  %v1245_v34 = vunpack.c.l.b16 %v934_v23  ;;  %v610_v29 = vunpack.c.h.bf16 %v488_v18 }
 0x17f   : > { %v1916_v28 = vadd.f32 %v1915_v35, %v1827_v7  ;;  %v2004_v13 = vpop.f32.mrf.mxu3  ;;  %v1829_v59 = vpop.f32.mrf.mxu1  ;;  %vm5171_vm8 = vcmp.gt.f32.partialorder %v607_v12, 0.0  ;;  %v807_v12 = vld [vmem:[%s3900_s25 + $0x1c0] sm:$0xff] }
 0x180   : > { %v1830_v16 = vadd.f32 %v1829_v59, %v1740_v39  ;;  %v932_v39 = vsel %vm868_vm6, %v804_v3, 0  ;;  %vm5193_vm13 = vcmp.gt.f32.partialorder %v610_v29, 0.0 }
 0x181   : > { %v2005_v63 = vadd.f32 %v2004_v13, %v1916_v28  ;;  %1779 = vmatmul.bf16.gmra.mxu0 %v5084_v0  ;;  %v1241_v35 = vunpack.c.l.b16 %v932_v39  ;;  %v1242_v8 = vunpack.c.h.b16 %v932_v39  ;;  %v3019_v0 = vld [vmem:[%s3907_s17 + $0x88] sm:$0xf0] }
 0x182   : > { %1868 = vmatmul.bf16.gmra.mxu1 %v5086_v6  ;;  %v2955_v6 = vld [vmem:[%s3907_s17 + $0x8] sm:$0xf0] }
 0x183   : > { %v2437_v11 = vadd.f32 %v2005_v63, %v957_v27  ;;  %1957 = vmatmul.bf16.gmra.mxu2 %v5096_v41  ;;  %v959_v27 = vld [vmem:[#allocation2 + $0xe0] sm:$0xff]  ;;  %v1239_v63 = vunpack.c.l.b16 %v931_v2  ;;  %v5167_v39 = vpack.c.b16 %v1245_v34, %v1241_v35 }
 0x184   : > { %2046 = vmatmul.bf16.gmra.mxu3 %v5106_v32  ;;  %v1246_v32 = vunpack.c.h.b16 %v934_v23  ;;  %v3218_v41 = vld [vmem:[%s3907_s17 + $0x4] sm:$0xf] }
 0x185   : > { %2501 = vst [vmem:[#allocation2 + $0x108] sm:$0xff] %v2437_v11  ;;  %v1244_v11 = vunpack.c.h.b16 %v933_v22  ;;  %v5161_v19 = vpack.c.b16 %v1243_v9, %v1239_v63  ;;  %v2958_v63 = vor.u32 %v3218_v41, %v2955_v6  ;;  %v3234_v9 = vld [vmem:[%s3907_s17 + $0x84] sm:$0xf] }
 0x186   : > { %v1918_v7 = vpop.f32.mrf.mxu2  ;;  %v1742_v13 = vpop.f32.mrf.mxu0  ;;  %5887 = vst [vmem:[#allocation48_spill] sm:$0xff] %v5167_v39  ;;  %v5179_v35 = vpack.c.b16 %v1246_v32, %v1242_v8 }
 0x187   : > { %v1919_v40 = vadd.f32 %v1918_v7, %v1830_v16  ;;  %v2007_v28 = vpop.f32.mrf.mxu3  ;;  %v1831_v59 = vpop.f32.mrf.mxu1  ;;  %v489_v16 = vld [vmem:[%s3893_s14 + $0x1d0] sm:$0xff]  ;;  %v608_v7 = vunpack.c.h.bf16 %v487_v25  ;;  %v613_v25 = vunpack.c.l.bf16 %v490_v33  ;;  %2074 = vmatpush.bf16.msrb.mxu0 %v2958_v63 }
 0x188   : > { %v611_v24 = vunpack.c.l.bf16 %v489_v16  ;;  %v612_v2 = vunpack.c.h.bf16 %v489_v16  ;;  %v1832_v22 = vadd.f32 %v1831_v59, %v1742_v13  ;;  %v3022_v59 = vor.u32 %v3234_v9, %v3019_v0  ;;  %5892 = vst [vmem:[#allocation49_spill] sm:$0xff] %v5179_v35 }
 0x189   : > { %v2008_v44 = vadd.f32 %v2007_v28, %v1919_v40  ;;  %v5163_v40 = vpack.c.b16 %v1244_v11, %v1240_v31  ;;  %v609_v28 = vunpack.c.l.bf16 %v488_v18  ;;  %vm5175_vm9 = vcmp.gt.f32.partialorder %v608_v7, 0.0  ;;  %v961_v31 = vld [vmem:[#allocation2 + $0x138] sm:$0xff]  ;;  %v809_v7 = vld [vmem:[%s3900_s25 + $0x1d0] sm:$0xff] }
 0x18a   : > { %vm5181_vm10 = vcmp.gt.f32.partialorder %v611_v24, 0.0  ;;  %vm5185_vm11 = vcmp.gt.f32.partialorder %v612_v2, 0.0  ;;  %2163 = vmatpush.bf16.msrb.mxu1 %v3022_v59  ;;  %vm871_vm14 = vmpackc.low %vm5175_vm9, %vm5171_vm8  ;;  %vm5202_vm15 = vcmp.gt.f32.partialorder %v613_v25, 0.0 }
 0x18b   : > { %v2439_v3 = vadd.f32 %v2008_v44, %v959_v27  ;;  %5886 = vst [vmem:[#allocation47_spill] sm:$0xff] %v5163_v40  ;;  %v614_v44 = vunpack.c.h.bf16 %v490_v33  ;;  %vm5189_vm12 = vcmp.gt.f32.partialorder %v609_v28, 0.0  ;;  %vm873_vm1 = vmpackc.low %vm5185_vm11, %vm5181_vm10  ;;  %v808_v33 = vld [vmem:[%s3900_s25 + $0x1c8] sm:$0xff]  ;;  %v935_v2 = vsel %vm871_vm14, %v807_v12, 0 }
 0x18c   : > { %vm872_vm2 = vmpackc.low %vm5193_vm13, %vm5189_vm12  ;;  %v1248_v13 = vunpack.c.h.b16 %v935_v2 }
 0x18d   : > { %2503 = vst [vmem:[#allocation2 + $0xe0] sm:$0xff] %v2439_v3  ;;  %vm5206_vm0 = vcmp.gt.f32.partialorder %v614_v44, 0.0  ;;  %v936_v25 = vsel %vm872_vm2, %v808_v33, 0  ;;  %v963_v44 = vld [vmem:[#allocation2 + $0x80] sm:$0xff] }
 0x18e   : > { %v1920_v27 = vpop.f32.mrf.mxu2  ;;  %v1745_v30 = vpop.f32.mrf.mxu0  ;;  %vm874_vm3 = vmpackc.low %vm5206_vm0, %vm5202_vm15  ;;  %v1249_v16 = vunpack.c.l.b16 %v936_v25 }
 0x18f   : > { %v1921_v23 = vadd.f32 %v1920_v27, %v1832_v22  ;;  %v2009_v17 = vpop.f32.mrf.mxu3  ;;  %v1834_v11 = vpop.f32.mrf.mxu1  ;;  %v937_v27 = vsel %vm873_vm1, %v809_v7, 0 }
 0x190   : > { %v1835_v8 = vadd.f32 %v1834_v11, %v1745_v30  ;;  %v810_v30 = vld [vmem:[%s3900_s25 + $0x1d8] sm:$0xff]  ;;  %v493_v11 = vld [vmem:[%s3893_s14 + $0x1f0] sm:$0xff]  ;;  %v1251_v6 = vunpack.c.l.b16 %v937_v27  ;;  %v1252_v41 = vunpack.c.h.b16 %v937_v27 }
 0x191   : > { %v2010_v34 = vadd.f32 %v2009_v17, %v1921_v23  ;;  %1784 = vmatmul.bf16.gmra.mxu0 %v5161_v19  ;;  %v938_v9 = vsel %vm874_vm3, %v810_v30, 0  ;;  %v491_v23 = vld [vmem:[%s3893_s14 + $0x1e0] sm:$0xff]  ;;  %v619_v7 = vunpack.c.l.bf16 %v493_v11  ;;  %v620_v33 = vunpack.c.h.bf16 %v493_v11 }
 0x192   : > { %1873 = vmatmul.bf16.gmra.mxu1 %v5163_v40  ;;  %v1253_v0 = vunpack.c.l.b16 %v938_v9  ;;  %v615_v17 = vunpack.c.l.bf16 %v491_v23  ;;  %v616_v32 = vunpack.c.h.bf16 %v491_v23  ;;  %v1254_v12 = vunpack.c.h.b16 %v938_v9 }
 0x193   : > { %v2441_v3 = vadd.f32 %v2010_v34, %v961_v31  ;;  %1962 = vmatmul.bf16.gmra.mxu2 %v5167_v39  ;;  %v1247_v31 = vunpack.c.l.b16 %v935_v2  ;;  %v492_v34 = vld [vmem:[%s3893_s14 + $0x1e8] sm:$0xff]  ;;  %v5240_v2 = vpack.c.b16 %v1252_v41, %v1248_v13  ;;  %vm5254_vm6 = vcmp.gt.f32.partialorder %v619_v7, 0.0 }
 0x194   : > { %2051 = vmatmul.bf16.gmra.mxu3 %v5179_v35  ;;  %v5242_v23 = vpack.c.b16 %v1253_v0, %v1249_v16  ;;  %vm5244_vm4 = vcmp.gt.f32.partialorder %v615_v17, 0.0  ;;  %vm5248_vm5 = vcmp.gt.f32.partialorder %v616_v32, 0.0  ;;  %vm5258_vm7 = vcmp.gt.f32.partialorder %v620_v33, 0.0  ;;  %v811_v32 = vld [vmem:[%s3900_s25 + $0x1e0] sm:$0xff] }
 0x195   : > { %2505 = vst [vmem:[#allocation2 + $0x138] sm:$0xff] %v2441_v3  ;;  %v494_v3 = vld [vmem:[%s3893_s14 + $0x1f8] sm:$0xff]  ;;  %v5238_v35 = vpack.c.b16 %v1251_v6, %v1247_v31  ;;  %vm875_vm10 = vmpackc.low %vm5248_vm5, %vm5244_vm4 }
 0x196   : > { %v1923_v24 = vpop.f32.mrf.mxu2  ;;  %v1747_v29 = vpop.f32.mrf.mxu0  ;;  %v621_v27 = vunpack.c.l.bf16 %v494_v3  ;;  %v622_v39 = vunpack.c.h.bf16 %v494_v3  ;;  %vm877_vm13 = vmpackc.low %vm5258_vm7, %vm5254_vm6  ;;  %v813_v3 = vld [vmem:[%s3900_s25 + $0x1f0] sm:$0xff] }
 0x197   : > { %v1924_v22 = vadd.f32 %v1923_v24, %v1835_v8  ;;  %v2012_v28 = vpop.f32.mrf.mxu3  ;;  %v1836_v63 = vpop.f32.mrf.mxu1  ;;  %v1250_v8 = vunpack.c.h.b16 %v936_v25  ;;  %v617_v24 = vunpack.c.l.bf16 %v492_v34 }
 0x198   : > { %v1837_v30 = vadd.f32 %v1836_v63, %v1747_v29  ;;  %v965_v63 = vld [vmem:[#allocation2 + $0x1b8] sm:$0xff]  ;;  %vm5275_vm11 = vcmp.gt.f32.partialorder %v621_v27, 0.0  ;;  %vm5279_vm12 = vcmp.gt.f32.partialorder %v622_v39, 0.0 }
 0x199   : > { %v2013_v59 = vadd.f32 %v2012_v28, %v1924_v22  ;;  %v618_v22 = vunpack.c.h.bf16 %v492_v34  ;;  %v5252_v31 = vpack.c.b16 %v1254_v12, %v1250_v8  ;;  %vm5262_vm8 = vcmp.gt.f32.partialorder %v617_v24, 0.0  ;;  %v814_v39 = vld [vmem:[%s3900_s25 + $0x1f8] sm:$0xff]  ;;  %vm878_vm15 = vmpackc.low %vm5279_vm12, %vm5275_vm11 }
 0x19a   : > { %v941_v24 = vsel %vm877_vm13, %v813_v3, 0 }
 0x19b   : > { %v2443_v18 = vadd.f32 %v2013_v59, %v963_v44  ;;  %vm5266_vm9 = vcmp.gt.f32.partialorder %v618_v22, 0.0  ;;  %v967_v22 = vld [vmem:[#allocation2 + $0x1e8] sm:$0xff] }
 0x19c   : > { %vm876_vm14 = vmpackc.low %vm5266_vm9, %vm5262_vm8 }
 0x19d   : > { %2507 = vst [vmem:[#allocation2 + $0x80] sm:$0xff] %v2443_v18 }
 0x19e   : > { %v1925_v28 = vpop.f32.mrf.mxu2  ;;  %v1750_v40 = vpop.f32.mrf.mxu0 }
 0x19f   : > { %v1926_v44 = vadd.f32 %v1925_v28, %v1837_v30  ;;  %v2014_v59 = vpop.f32.mrf.mxu3  ;;  %v1839_v9 = vpop.f32.mrf.mxu1  ;;  %v939_v30 = vsel %vm875_vm10, %v811_v32, 0 }
 0x1a0   : > { %v1840_v17 = vadd.f32 %v1839_v9, %v1750_v40  ;;  %v812_v40 = vld [vmem:[%s3900_s25 + $0x1e8] sm:$0xff]  ;;  %v1259_v9 = vunpack.c.l.b16 %v941_v24  ;;  %v1256_v11 = vunpack.c.h.b16 %v939_v30 }
 0x1a1   : > { %v2015_v13 = vadd.f32 %v2014_v59, %v1926_v44  ;;  %1789 = vmatmul.bf16.gmra.mxu0 %v5238_v35  ;;  %v940_v27 = vsel %vm876_vm14, %v812_v40, 0  ;;  %v942_v44 = vsel %vm878_vm15, %v814_v39, 0 }
 0x1a2   : > { %1878 = vmatmul.bf16.gmra.mxu1 %v5240_v2  ;;  %v1257_v41 = vunpack.c.l.b16 %v940_v27  ;;  %v1261_v16 = vunpack.c.l.b16 %v942_v44  ;;  %v1258_v34 = vunpack.c.h.b16 %v940_v27  ;;  %v1262_v18 = vunpack.c.h.b16 %v942_v44 }
 0x1a3   : > { %v2445_v0 = vadd.f32 %v2015_v13, %v965_v63  ;;  %1967 = vmatmul.bf16.gmra.mxu2 %v5242_v23  ;;  %v1255_v63 = vunpack.c.l.b16 %v939_v30  ;;  %v1260_v13 = vunpack.c.h.b16 %v941_v24 }
 0x1a4   : > { %2056 = vmatmul.bf16.gmra.mxu3 %v5252_v31  ;;  %v5311_v39 = vpack.c.b16 %v1261_v16, %v1257_v41 }
 0x1a5   : > { %2509 = vst [vmem:[#allocation2 + $0x1b8] sm:$0xff] %v2445_v0  ;;  %v5307_v0 = vpack.c.b16 %v1259_v9, %v1255_v63  ;;  %v5309_v40 = vpack.c.b16 %v1260_v13, %v1256_v11 }
 0x1a6   : > { %v1928_v8 = vpop.f32.mrf.mxu2  ;;  %v1752_v33 = vpop.f32.mrf.mxu0 }
 0x1a7   : > { %v1929_v12 = vadd.f32 %v1928_v8, %v1840_v17  ;;  %v2017_v7 = vpop.f32.mrf.mxu3  ;;  %v1841_v28 = vpop.f32.mrf.mxu1  ;;  %v969_v8 = vld [vmem:[#allocation2 + $0x160] sm:$0xff] }
 0x1a8   : > { %v1842_v29 = vadd.f32 %v1841_v28, %v1752_v33 }
 0x1a9   : > { %v2018_v59 = vadd.f32 %v2017_v7, %v1929_v12  ;;  %v5313_v7 = vpack.c.b16 %v1262_v18, %v1258_v34  ;;  %v973_v18 = vld [vmem:[#allocation2 + $0xf0] sm:$0xff] }
 0x1ab   : > { %v2447_v6 = vadd.f32 %v2018_v59, %v967_v22  ;;  %v971_v59 = vld [vmem:[#allocation2 + $0x1e0] sm:$0xff] }
 0x1ad   : > { %2511 = vst [vmem:[#allocation2 + $0x1e8] sm:$0xff] %v2447_v6 }
 0x1ae   : > { %v1930_v25 = vpop.f32.mrf.mxu2  ;;  %v1755_v3 = vpop.f32.mrf.mxu0 }
 0x1af   : > { %v1931_v17 = vadd.f32 %v1930_v25, %v1842_v29  ;;  %v2019_v32 = vpop.f32.mrf.mxu3  ;;  %v1844_v12 = vpop.f32.mrf.mxu1 }
 0x1b0   : > { %v1845_v22 = vadd.f32 %v1844_v12, %v1755_v3 }
 0x1b1   : > { %v2020_v30 = vadd.f32 %v2019_v32, %v1931_v17  ;;  %1794 = vmatmul.bf16.gmra.mxu0 %v5307_v0 }
 0x1b2   : > { %1883 = vmatmul.bf16.gmra.mxu1 %v5309_v40 }
 0x1b3   : > { %v2449_v24 = vadd.f32 %v2020_v30, %v969_v8  ;;  %1972 = vmatmul.bf16.gmra.mxu2 %v5311_v39 }
 0x1b4   : > { %2061 = vmatmul.bf16.gmra.mxu3 %v5313_v7 }
 0x1b5   : > { %2513 = vst [vmem:[#allocation2 + $0x160] sm:$0xff] %v2449_v24  ;;  %v975_v24 = vld [vmem:[#allocation2 + $0x148] sm:$0xff] }
 0x1b6   : > { %v1933_v33 = vpop.f32.mrf.mxu2  ;;  %v1757_v44 = vpop.f32.mrf.mxu0 }
 0x1b7   : > { %v1934_v28 = vadd.f32 %v1933_v33, %v1845_v22  ;;  %v2022_v27 = vpop.f32.mrf.mxu3  ;;  %v1846_v63 = vpop.f32.mrf.mxu1 }
 0x1b8   : > { %v1847_v6 = vadd.f32 %v1846_v63, %v1757_v44 }
 0x1b9   : > { %v2023_v9 = vadd.f32 %v2022_v27, %v1934_v28 }
 0x1bb   : > { %v2451_v11 = vadd.f32 %v2023_v9, %v971_v59 }
 0x1bd   : > { %2515 = vst [vmem:[#allocation2 + $0x1e0] sm:$0xff] %v2451_v11 }
 0x1be   : > { %v1935_v13 = vpop.f32.mrf.mxu2  ;;  %v1760_v34 = vpop.f32.mrf.mxu0 }
 0x1bf   : > { %v1936_v41 = vadd.f32 %v1935_v13, %v1847_v6  ;;  %v2024_v16 = vpop.f32.mrf.mxu3  ;;  %v1849_v29 = vpop.f32.mrf.mxu1 }
 0x1c0   : > { %v1850_v32 = vadd.f32 %v1849_v29, %v1760_v34  ;;  %v979_v34 = vld [vmem:[#allocation2 + $0x40] sm:$0xff] }
 0x1c1   : > { %v2025_v25 = vadd.f32 %v2024_v16, %v1936_v41  ;;  %2075 = vmatmul.bf16.vlgmr.msrb.gmra.mxu0 %v4150_v20 }
 0x1c2   : > { %2164 = vmatmul.bf16.vlgmr.msrb.gmra.mxu1 %v4152_v21  ;;  %v977_v21 = vld [vmem:[#allocation2 + $0x100] sm:$0xff] }
 0x1c3   : > { %v2453_v17 = vadd.f32 %v2025_v25, %v973_v18  ;;  %2253 = vmatmul.bf16.vlgmr.msrb.gmra.mxu2 %v4164_v36 }
 0x1c4   : > { %2342 = vmatmul.bf16.vlgmr.msrb.gmra.mxu3 %v4166_v37 }
 0x1c5   : > { %2517 = vst [vmem:[#allocation2 + $0xf0] sm:$0xff] %v2453_v17 }
 0x1c6   : > { %v1938_v3 = vpop.f32.mrf.mxu2  ;;  %v1762_v30 = vpop.f32.mrf.mxu0 }
 0x1c7   : > { %v1939_v8 = vadd.f32 %v1938_v3, %v1850_v32  ;;  %v2027_v12 = vpop.f32.mrf.mxu3  ;;  %v1851_v22 = vpop.f32.mrf.mxu1 }
 0x1c8   : > { %v1852_v27 = vadd.f32 %v1851_v22, %v1762_v30 }
 0x1c9   : > { %v2028_v33 = vadd.f32 %v2027_v12, %v1939_v8 }
 0x1cb   : > { %v2455_v28 = vadd.f32 %v2028_v33, %v975_v24 }
 0x1cd   : > { %2519 = vst [vmem:[#allocation2 + $0x148] sm:$0xff] %v2455_v28 }
 0x1ce   : > { %v1940_v20 = vpop.f32.mrf.mxu2  ;;  %v1765_v63 = vpop.f32.mrf.mxu0 }
 0x1cf   : > { %v1941_v44 = vadd.f32 %v1940_v20, %v1852_v27  ;;  %v2029_v59 = vpop.f32.mrf.mxu3  ;;  %v1854_v9 = vpop.f32.mrf.mxu1  ;;  %v983_v27 = vld [vmem:[#allocation2 + $0x1a0] sm:$0xff] }
 0x1d0   : > { %v1855_v11 = vadd.f32 %v1854_v9, %v1765_v63 }
 0x1d1   : > { %v2030_v36 = vadd.f32 %v2029_v59, %v1941_v44  ;;  %2080 = vmatmul.bf16.gmra.mxu0 %v4226_v5 }
 0x1d2   : > { %2169 = vmatmul.bf16.gmra.mxu1 %v4228_v14  ;;  %v981_v14 = vld [vmem:[#allocation2 + $0x20] sm:$0xff] }
 0x1d3   : > { %v2457_v37 = vadd.f32 %v2030_v36, %v977_v21  ;;  %2258 = vmatmul.bf16.gmra.mxu2 %v4230_v15 }
 0x1d4   : > { %2347 = vmatmul.bf16.gmra.mxu3 %v4240_v26 }
 0x1d5   : > { %2521 = vst [vmem:[#allocation2 + $0x100] sm:$0xff] %v2457_v37 }
 0x1d6   : > { %v1943_v6 = vpop.f32.mrf.mxu2  ;;  %v1767_v16 = vpop.f32.mrf.mxu0 }
 0x1d7   : > { %v1944_v13 = vadd.f32 %v1943_v6, %v1855_v11  ;;  %v2032_v41 = vpop.f32.mrf.mxu3  ;;  %v1856_v18 = vpop.f32.mrf.mxu1 }
 0x1d8   : > { %v1857_v17 = vadd.f32 %v1856_v18, %v1767_v16 }
 0x1d9   : > { %v2033_v29 = vadd.f32 %v2032_v41, %v1944_v13 }
 0x1db   : > { %v2459_v25 = vadd.f32 %v2033_v29, %v979_v34  ;;  %v987_v34 = vld [vmem:[#allocation2 + $0x70] sm:$0xff] }
 0x1dd   : > { %2523 = vst [vmem:[#allocation2 + $0x40] sm:$0xff] %v2459_v25 }
 0x1de   : > { %v1945_v5 = vpop.f32.mrf.mxu2  ;;  %v1770_v8 = vpop.f32.mrf.mxu0 }
 0x1df   : > { %v1946_v32 = vadd.f32 %v1945_v5, %v1857_v17  ;;  %v2034_v3 = vpop.f32.mrf.mxu3  ;;  %v1859_v12 = vpop.f32.mrf.mxu1 }
 0x1e0   : > { %v1860_v30 = vadd.f32 %v1859_v12, %v1770_v8 }
 0x1e1   : > { %v2035_v15 = vadd.f32 %v2034_v3, %v1946_v32  ;;  %2085 = vmatmul.bf16.gmra.mxu0 %v4302_v58 }
 0x1e2   : > { %2174 = vmatmul.bf16.gmra.mxu1 %v4312_v61  ;;  %v985_v61 = vld [vmem:[#allocation2 + $0xe8] sm:$0xff] }
 0x1e3   : > { %v2461_v26 = vadd.f32 %v2035_v15, %v981_v14  ;;  %2263 = vmatmul.bf16.gmra.mxu2 %v4314_v62 }
 0x1e4   : > { %2352 = vmatmul.bf16.gmra.mxu3 %v4324_v1 }
 0x1e5   : > { %2525 = vst [vmem:[#allocation2 + $0x20] sm:$0xff] %v2461_v26 }
 0x1e6   : > { %v1948_v24 = vpop.f32.mrf.mxu2  ;;  %v1772_v28 = vpop.f32.mrf.mxu0 }
 0x1e7   : > { %v1949_v22 = vadd.f32 %v1948_v24, %v1860_v30  ;;  %v2037_v33 = vpop.f32.mrf.mxu3  ;;  %v1861_v20 = vpop.f32.mrf.mxu1  ;;  %v991_v24 = vld [vmem:[#allocation2 + $0xb8] sm:$0xff] }
 0x1e8   : > { %v1862_v63 = vadd.f32 %v1861_v20, %v1772_v28 }
 0x1e9   : > { %v2038_v44 = vadd.f32 %v2037_v33, %v1949_v22 }
 0x1eb   : > { %v2463_v59 = vadd.f32 %v2038_v44, %v983_v27 }
 0x1ed   : > { %2527 = vst [vmem:[#allocation2 + $0x1a0] sm:$0xff] %v2463_v59 }
 0x1ee   : > { %v1950_v58 = vpop.f32.mrf.mxu2  ;;  %v1775_v36 = vpop.f32.mrf.mxu0 }
 0x1ef   : > { %v1951_v21 = vadd.f32 %v1950_v58, %v1862_v63  ;;  %v2039_v9 = vpop.f32.mrf.mxu3  ;;  %v1864_v37 = vpop.f32.mrf.mxu1 }
 0x1f0   : > { %v1865_v11 = vadd.f32 %v1864_v37, %v1775_v36  ;;  %v995_v37 = vld [vmem:[#allocation2 + $0x170] sm:$0xff] }
 0x1f1   : > { %v2040_v62 = vadd.f32 %v2039_v9, %v1951_v21  ;;  %2090 = vmatmul.bf16.gmra.mxu0 %v4390_v50 }
 0x1f2   : > { %2179 = vmatmul.bf16.gmra.mxu1 %v4392_v53  ;;  %v989_v53 = vld [vmem:[#allocation2 + $0x1d8] sm:$0xff] }
 0x1f3   : > { %v2465_v1 = vadd.f32 %v2040_v62, %v985_v61  ;;  %2268 = vmatmul.bf16.gmra.mxu2 %v4394_v54 }
 0x1f4   : > { %2357 = vmatmul.bf16.gmra.mxu3 %v4404_v57 }
 0x1f5   : > { %2529 = vst [vmem:[#allocation2 + $0xe8] sm:$0xff] %v2465_v1 }
 0x1f6   : > { %v1953_v6 = vpop.f32.mrf.mxu2  ;;  %v1777_v16 = vpop.f32.mrf.mxu0 }
 0x1f7   : > { %v1954_v13 = vadd.f32 %v1953_v6, %v1865_v11  ;;  %v2042_v41 = vpop.f32.mrf.mxu3  ;;  %v1866_v18 = vpop.f32.mrf.mxu1 }
 0x1f8   : > { %v1867_v17 = vadd.f32 %v1866_v18, %v1777_v16 }
 0x1f9   : > { %v2043_v29 = vadd.f32 %v2042_v41, %v1954_v13 }
 0x1fb   : > { %v2467_v25 = vadd.f32 %v2043_v29, %v987_v34 }
 0x1fd   : > { %2531 = vst [vmem:[#allocation2 + $0x70] sm:$0xff] %v2467_v25 }
 0x1fe   : > { %v1955_v50 = vpop.f32.mrf.mxu2  ;;  %v1780_v3 = vpop.f32.mrf.mxu0 }
 0x1ff   : > { %v1956_v5 = vadd.f32 %v1955_v50, %v1867_v17  ;;  %v2044_v32 = vpop.f32.mrf.mxu3  ;;  %v1869_v8 = vpop.f32.mrf.mxu1 }
 0x200   : > { %v1870_v14 = vadd.f32 %v1869_v8, %v1780_v3 }
 0x201   : > { %v2045_v54 = vadd.f32 %v2044_v32, %v1956_v5  ;;  %2095 = vmatmul.bf16.gmra.mxu0 %v4466_v42  ;;  %v999_v5 = vld [vmem:[#allocation2 + $0x198] sm:$0xff] }
 0x202   : > { %2184 = vmatmul.bf16.gmra.mxu1 %v4476_v45  ;;  %v993_v45 = vld [vmem:[#allocation2 + $0xa8] sm:$0xff] }
 0x203   : > { %v2469_v57 = vadd.f32 %v2045_v54, %v989_v53  ;;  %2273 = vmatmul.bf16.gmra.mxu2 %v4478_v46 }
 0x204   : > { %2362 = vmatmul.bf16.gmra.mxu3 %v4488_v49 }
 0x205   : > { %2533 = vst [vmem:[#allocation2 + $0x1d8] sm:$0xff] %v2469_v57 }
 0x206   : > { %v1958_v12 = vpop.f32.mrf.mxu2  ;;  %v1782_v30 = vpop.f32.mrf.mxu0 }
 0x207   : > { %v1959_v15 = vadd.f32 %v1958_v12, %v1870_v14  ;;  %v2047_v26 = vpop.f32.mrf.mxu3  ;;  %v1871_v22 = vpop.f32.mrf.mxu1 }
 0x208   : > { %v1872_v27 = vadd.f32 %v1871_v22, %v1782_v30 }
 0x209   : > { %v2048_v33 = vadd.f32 %v2047_v26, %v1959_v15  ;;  %v5921_v26 = vld [vmem:[#allocation26_spill] sm:$0xff] }
 0x20b   : > { %v2471_v28 = vadd.f32 %v2048_v33, %v991_v24 }
 0x20d   : > { %2535 = vst [vmem:[#allocation2 + $0xb8] sm:$0xff] %v2471_v28  ;;  %v1003_v28 = vld [vmem:[#allocation2 + $0x158] sm:$0xff] }
 0x20e   : > { %v1960_v42 = vpop.f32.mrf.mxu2  ;;  %v1785_v59 = vpop.f32.mrf.mxu0 }
 0x20f   : > { %v1961_v20 = vadd.f32 %v1960_v42, %v1872_v27  ;;  %v2049_v44 = vpop.f32.mrf.mxu3  ;;  %v1874_v63 = vpop.f32.mrf.mxu1 }
 0x210   : > { %v1875_v58 = vadd.f32 %v1874_v63, %v1785_v59 }
 0x211   : > { %v2050_v46 = vadd.f32 %v2049_v44, %v1961_v20  ;;  %2100 = vmatmul.bf16.gmra.mxu0 %v4554_v43 }
 0x212   : > { %2189 = vmatmul.bf16.gmra.mxu1 %v4556_v48  ;;  %v997_v48 = vld [vmem:[#allocation2 + $0x68] sm:$0xff] }
 0x213   : > { %v2473_v49 = vadd.f32 %v2050_v46, %v993_v45  ;;  %2278 = vmatmul.bf16.gmra.mxu2 %v4558_v51 }
 0x214   : > { %2367 = vmatmul.bf16.gmra.mxu3 %v4568_v56 }
 0x215   : > { %2537 = vst [vmem:[#allocation2 + $0xa8] sm:$0xff] %v2473_v49  ;;  %v5922_v49 = vld [vmem:[#allocation27_spill] sm:$0xff] }
 0x216   : > { %v1963_v21 = vpop.f32.mrf.mxu2  ;;  %v1787_v61 = vpop.f32.mrf.mxu0 }
 0x217   : > { %v1964_v9 = vadd.f32 %v1963_v21, %v1875_v58  ;;  %v2052_v36 = vpop.f32.mrf.mxu3  ;;  %v1876_v62 = vpop.f32.mrf.mxu1 }
 0x218   : > { %v1877_v6 = vadd.f32 %v1876_v62, %v1787_v61  ;;  %v5925_v61 = vld [vmem:[#allocation30_spill] sm:$0xff] }
 0x219   : > { %v2053_v1 = vadd.f32 %v2052_v36, %v1964_v9  ;;  %v5923_v9 = vld [vmem:[#allocation28_spill] sm:$0xff]  ;;  %v5924_v36 = vld [vmem:[#allocation29_spill] sm:$0xff] }
 0x21b   : > { %v2475_v11 = vadd.f32 %v2053_v1, %v995_v37 }
 0x21d   : > { %2539 = vst [vmem:[#allocation2 + $0x170] sm:$0xff] %v2475_v11 }
 0x21e   : > { %v1965_v43 = vpop.f32.mrf.mxu2  ;;  %v1790_v16 = vpop.f32.mrf.mxu0 }
 0x21f   : > { %v1966_v13 = vadd.f32 %v1965_v43, %v1877_v6  ;;  %v2054_v41 = vpop.f32.mrf.mxu3  ;;  %v1879_v34 = vpop.f32.mrf.mxu1  ;;  %v944_v6 = vld [vmem:[#allocation2 + $0x1b0] sm:$0xff] }
 0x220   : > { %v1880_v18 = vadd.f32 %v1879_v34, %v1790_v16 }
 0x221   : > { %v2055_v51 = vadd.f32 %v2054_v41, %v1966_v13  ;;  %2105 = vmatmul.bf16.gmra.mxu0 %v4622_v38 }
 0x222   : > { %2194 = vmatmul.bf16.gmra.mxu1 %v4632_v47  ;;  %v1001_v47 = vld [vmem:[#allocation2 + $0xc0] sm:$0xff] }
 0x223   : > { %v2477_v56 = vadd.f32 %v2055_v51, %v997_v48  ;;  %2283 = vmatmul.bf16.gmra.mxu2 %v4634_v52 }
 0x224   : > { %2372 = vmatmul.bf16.gmra.mxu3 %v4644_v60 }
 0x225   : > { %2541 = vst [vmem:[#allocation2 + $0x68] sm:$0xff] %v2477_v56 }
 0x226   : > { %v1968_v29 = vpop.f32.mrf.mxu2  ;;  %v1792_v50 = vpop.f32.mrf.mxu0 }
 0x227   : > { %v1969_v25 = vadd.f32 %v1968_v29, %v1880_v18  ;;  %v2057_v17 = vpop.f32.mrf.mxu3  ;;  %v1881_v32 = vpop.f32.mrf.mxu1  ;;  %v946_v18 = vld [vmem:[#allocation2 + $0x18] sm:$0xff] }
 0x228   : > { %v1882_v8 = vadd.f32 %v1881_v32, %v1792_v50  ;;  %v5927_v32 = vld [vmem:[#allocation32_spill] sm:$0xff] }
 0x229   : > { %v2058_v3 = vadd.f32 %v2057_v17, %v1969_v25  ;;  %v5926_v17 = vld [vmem:[#allocation31_spill] sm:$0xff] }
 0x22b   : > { %v2479_v53 = vadd.f32 %v2058_v3, %v999_v5  ;;  %v5928_v3 = vld [vmem:[#allocation33_spill] sm:$0xff] }
 0x22d   : > { %2543 = vst [vmem:[#allocation2 + $0x198] sm:$0xff] %v2479_v53  ;;  %v5929_v53 = vld [vmem:[#allocation34_spill] sm:$0xff] }
 0x22e   : > { %v1970_v38 = vpop.f32.mrf.mxu2  ;;  %v1795_v14 = vpop.f32.mrf.mxu0 }
 0x22f   : > { %v1971_v54 = vadd.f32 %v1970_v38, %v1882_v8  ;;  %v2059_v57 = vpop.f32.mrf.mxu3  ;;  %v1884_v12 = vpop.f32.mrf.mxu1 }
 0x230   : > { %v1885_v15 = vadd.f32 %v1884_v12, %v1795_v14  ;;  %v948_v14 = vld [vmem:[#allocation2 + $0x168] sm:$0xff] }
 0x231   : > { %v2060_v52 = vadd.f32 %v2059_v57, %v1971_v54  ;;  %2110 = vmatmul.bf16.gmra.mxu0 %v4704_v55 }
 0x232   : > { %2199 = vmatmul.bf16.gmra.mxu1 %v4709_v4  ;;  %v1005_v4 = vld [vmem:[#allocation2 + $0x58] sm:$0xff] }
 0x233   : > { %v2481_v60 = vadd.f32 %v2060_v52, %v1001_v47  ;;  %2288 = vmatmul.bf16.gmra.mxu2 %v4712_v10 }
 0x234   : > { %2377 = vmatmul.bf16.gmra.mxu3 %v5921_v26 }
 0x235   : > { %2545 = vst [vmem:[#allocation2 + $0xc0] sm:$0xff] %v2481_v60 }
 0x236   : > { %v1973_v30 = vpop.f32.mrf.mxu2  ;;  %v1797_v33 = vpop.f32.mrf.mxu0 }
 0x237   : > { %v1974_v24 = vadd.f32 %v1973_v30, %v1885_v15  ;;  %v2062_v22 = vpop.f32.mrf.mxu3  ;;  %v1886_v27 = vpop.f32.mrf.mxu1 }
 0x238   : > { %v1887_v44 = vadd.f32 %v1886_v27, %v1797_v33  ;;  %v5930_v27 = vld [vmem:[#allocation35_spill] sm:$0xff] }
 0x239   : > { %v2063_v42 = vadd.f32 %v2062_v22, %v1974_v24  ;;  %v950_v22 = vld [vmem:[#allocation2 + $0x48] sm:$0xff] }
 0x23b   : > { %v2483_v20 = vadd.f32 %v2063_v42, %v1003_v28 }
 0x23d   : > { %2547 = vst [vmem:[#allocation2 + $0x158] sm:$0xff] %v2483_v20 }
 0x23e   : > { %v1975_v55 = vpop.f32.mrf.mxu2  ;;  %v2076_v63 = vpop.f32.mrf.mxu0 }
 0x23f   : > { %v1976_v59 = vadd.f32 %v1975_v55, %v1887_v44  ;;  %v2064_v45 = vpop.f32.mrf.mxu3  ;;  %v2165_v46 = vpop.f32.mrf.mxu1  ;;  %v5931_v44 = vld [vmem:[#allocation36_spill] sm:$0xff]  ;;  %v5932_v55 = vld [vmem:[#allocation37_spill] sm:$0xff] }
 0x240   : > { %v2166_v21 = vadd.f32 %v2165_v46, %v2076_v63 }
 0x241   : > { %v2065_v10 = vadd.f32 %v2064_v45, %v1976_v59  ;;  %2115 = vmatmul.bf16.gmra.mxu0 %v5922_v49  ;;  %v5933_v59 = vld [vmem:[#allocation38_spill] sm:$0xff] }
 0x242   : > { %2204 = vmatmul.bf16.gmra.mxu1 %v5923_v9 }
 0x243   : > { %v2485_v58 = vadd.f32 %v2065_v10, %v1005_v4  ;;  %2293 = vmatmul.bf16.gmra.mxu2 %v5924_v36  ;;  %v952_v10 = vld [vmem:[#allocation2 + $0x110] sm:$0xff] }
 0x244   : > { %2382 = vmatmul.bf16.gmra.mxu3 %v5925_v61 }
 0x245   : > { %2549 = vst [vmem:[#allocation2 + $0x58] sm:$0xff] %v2485_v58 }
 0x246   : > { %v2254_v37 = vpop.f32.mrf.mxu2  ;;  %v2078_v11 = vpop.f32.mrf.mxu0 }
 0x247   : > { %v2255_v62 = vadd.f32 %v2254_v37, %v2166_v21  ;;  %v2343_v1 = vpop.f32.mrf.mxu3  ;;  %v2167_v43 = vpop.f32.mrf.mxu1 }
 0x248   : > { %v2168_v16 = vadd.f32 %v2167_v43, %v2078_v11  ;;  %v5934_v43 = vld [vmem:[#allocation39_spill] sm:$0xff] }
 0x249   : > { %v2344_v13 = vadd.f32 %v2343_v1, %v2255_v62  ;;  %v954_v1 = vld [vmem:[#allocation2 + $0x98] sm:$0xff] }
 0x24b   : > { %v2424_v41 = vadd.f32 %v2344_v13, %v944_v6 }
 0x24d   : > { %2488 = vst [vmem:[#allocation2 + $0x1b0] sm:$0xff] %v2424_v41 }
 0x24e   : > { %v2256_v48 = vpop.f32.mrf.mxu2  ;;  %v2081_v56 = vpop.f32.mrf.mxu0 }
 0x24f   : > { %v2257_v34 = vadd.f32 %v2256_v48, %v2168_v16  ;;  %v2345_v51 = vpop.f32.mrf.mxu3  ;;  %v2170_v29 = vpop.f32.mrf.mxu1  ;;  %v5935_v16 = vld [vmem:[#allocation40_spill] sm:$0xff]  ;;  %v5936_v48 = vld [vmem:[#allocation41_spill] sm:$0xff] }
 0x250   : > { %v2171_v5 = vadd.f32 %v2170_v29, %v2081_v56 }
 0x251   : > { %v2346_v25 = vadd.f32 %v2345_v51, %v2257_v34  ;;  %2120 = vmatmul.bf16.gmra.mxu0 %v5926_v17  ;;  %v5937_v34 = vld [vmem:[#allocation42_spill] sm:$0xff] }
 0x252   : > { %2209 = vmatmul.bf16.gmra.mxu1 %v5927_v32 }
 0x253   : > { %v2426_v50 = vadd.f32 %v2346_v25, %v946_v18  ;;  %2298 = vmatmul.bf16.gmra.mxu2 %v5928_v3  ;;  %v956_v25 = vld [vmem:[#allocation2 + $0x150] sm:$0xff] }
 0x254   : > { %2387 = vmatmul.bf16.gmra.mxu3 %v5929_v53 }
 0x255   : > { %2490 = vst [vmem:[#allocation2 + $0x18] sm:$0xff] %v2426_v50 }
 0x256   : > { %v2259_v8 = vpop.f32.mrf.mxu2  ;;  %v2083_v57 = vpop.f32.mrf.mxu0 }
 0x257   : > { %v2260_v38 = vadd.f32 %v2259_v8, %v2171_v5  ;;  %v2348_v54 = vpop.f32.mrf.mxu3  ;;  %v2172_v47 = vpop.f32.mrf.mxu1 }
 0x258   : > { %v2173_v60 = vadd.f32 %v2172_v47, %v2083_v57  ;;  %v5938_v47 = vld [vmem:[#allocation43_spill] sm:$0xff] }
 0x259   : > { %v2349_v12 = vadd.f32 %v2348_v54, %v2260_v38  ;;  %v958_v54 = vld [vmem:[#allocation2 + $0x60] sm:$0xff] }
 0x25b   : > { %v2428_v52 = vadd.f32 %v2349_v12, %v948_v14 }
 0x25d   : > { %2492 = vst [vmem:[#allocation2 + $0x168] sm:$0xff] %v2428_v52 }
 0x25e   : > { %v2261_v15 = vpop.f32.mrf.mxu2  ;;  %v2086_v24 = vpop.f32.mrf.mxu0 }
 0x25f   : > { %v2262_v26 = vadd.f32 %v2261_v15, %v2173_v60  ;;  %v2350_v30 = vpop.f32.mrf.mxu3  ;;  %v2175_v33 = vpop.f32.mrf.mxu1  ;;  %v5939_v60 = vld [vmem:[#allocation44_spill] sm:$0xff]  ;;  %v5940_v15 = vld [vmem:[#allocation45_spill] sm:$0xff] }
 0x260   : > { %v2176_v20 = vadd.f32 %v2175_v33, %v2086_v24 }
 0x261   : > { %v2351_v28 = vadd.f32 %v2350_v30, %v2262_v26  ;;  %2125 = vmatmul.bf16.gmra.mxu0 %v5930_v27  ;;  %v5941_v26 = vld [vmem:[#allocation46_spill] sm:$0xff] }
 0x262   : > { %2214 = vmatmul.bf16.gmra.mxu1 %v5931_v44 }
 0x263   : > { %v2430_v42 = vadd.f32 %v2351_v28, %v950_v22  ;;  %2303 = vmatmul.bf16.gmra.mxu2 %v5932_v55  ;;  %v960_v28 = vld [vmem:[#allocation2 + $0x188] sm:$0xff] }
 0x264   : > { %2392 = vmatmul.bf16.gmra.mxu3 %v5933_v59 }
 0x265   : > { %2494 = vst [vmem:[#allocation2 + $0x48] sm:$0xff] %v2430_v42 }
 0x266   : > { %v2264_v45 = vpop.f32.mrf.mxu2  ;;  %v2088_v46 = vpop.f32.mrf.mxu0 }
 0x267   : > { %v2265_v63 = vadd.f32 %v2264_v45, %v2176_v20  ;;  %v2353_v4 = vpop.f32.mrf.mxu3  ;;  %v2177_v49 = vpop.f32.mrf.mxu1 }
 0x268   : > { %v2178_v9 = vadd.f32 %v2177_v49, %v2088_v46 }
 0x269   : > { %v2354_v58 = vadd.f32 %v2353_v4, %v2265_v63  ;;  %v962_v4 = vld [vmem:[#allocation2 + $0x140] sm:$0xff] }
 0x26b   : > { %v2432_v21 = vadd.f32 %v2354_v58, %v952_v10 }
 0x26d   : > { %2496 = vst [vmem:[#allocation2 + $0x110] sm:$0xff] %v2432_v21  ;;  %v5942_v21 = vld [vmem:[#allocation47_spill] sm:$0xff] }
 0x26e   : > { %v2266_v36 = vpop.f32.mrf.mxu2  ;;  %v2091_v62 = vpop.f32.mrf.mxu0 }
 0x26f   : > { %v2267_v61 = vadd.f32 %v2266_v36, %v2178_v9  ;;  %v2355_v37 = vpop.f32.mrf.mxu3  ;;  %v2180_v11 = vpop.f32.mrf.mxu1  ;;  %v5943_v9 = vld [vmem:[#allocation48_spill] sm:$0xff]  ;;  %v5944_v36 = vld [vmem:[#allocation49_spill] sm:$0xff] }
 0x270   : > { %v2181_v41 = vadd.f32 %v2180_v11, %v2091_v62  ;;  %v964_v11 = vld [vmem:[#allocation2 + $0x1a8] sm:$0xff] }
 0x271   : > { %v2356_v6 = vadd.f32 %v2355_v37, %v2267_v61  ;;  %2130 = vmatmul.bf16.gmra.mxu0 %v5934_v43 }
 0x272   : > { %2219 = vmatmul.bf16.gmra.mxu1 %v5935_v16 }
 0x273   : > { %v2434_v13 = vadd.f32 %v2356_v6, %v954_v1  ;;  %2308 = vmatmul.bf16.gmra.mxu2 %v5936_v48 }
 0x274   : > { %2397 = vmatmul.bf16.gmra.mxu3 %v5937_v34 }
 0x275   : > { %2498 = vst [vmem:[#allocation2 + $0x98] sm:$0xff] %v2434_v13 }
 0x276   : > { %v2269_v51 = vpop.f32.mrf.mxu2  ;;  %v2093_v29 = vpop.f32.mrf.mxu0 }
 0x277   : > { %v2270_v56 = vadd.f32 %v2269_v51, %v2181_v41  ;;  %v2358_v18 = vpop.f32.mrf.mxu3  ;;  %v2182_v17 = vpop.f32.mrf.mxu1  ;;  %v966_v51 = vld [vmem:[#allocation2 + $0x28] sm:$0xff] }
 0x278   : > { %v2183_v32 = vadd.f32 %v2182_v17, %v2093_v29 }
 0x279   : > { %v2359_v50 = vadd.f32 %v2358_v18, %v2270_v56 }
 0x27b   : > { %v2436_v5 = vadd.f32 %v2359_v50, %v956_v25 }
 0x27d   : > { %2500 = vst [vmem:[#allocation2 + $0x150] sm:$0xff] %v2436_v5 }
 0x27e   : > { %v2271_v3 = vpop.f32.mrf.mxu2  ;;  %v2096_v38 = vpop.f32.mrf.mxu0 }
 0x27f   : > { %v2272_v53 = vadd.f32 %v2271_v3, %v2183_v32  ;;  %v2360_v8 = vpop.f32.mrf.mxu3  ;;  %v2185_v57 = vpop.f32.mrf.mxu1  ;;  %v968_v3 = vld [vmem:[#allocation2 + $0xf8] sm:$0xff] }
 0x280   : > { %v2186_v52 = vadd.f32 %v2185_v57, %v2096_v38 }
 0x281   : > { %v2361_v14 = vadd.f32 %v2360_v8, %v2272_v53  ;;  %2135 = vmatmul.bf16.gmra.mxu0 %v5938_v47 }
 0x282   : > { %2224 = vmatmul.bf16.gmra.mxu1 %v5939_v60 }
 0x283   : > { %v2438_v12 = vadd.f32 %v2361_v14, %v958_v54  ;;  %2313 = vmatmul.bf16.gmra.mxu2 %v5940_v15 }
 0x284   : > { %2402 = vmatmul.bf16.gmra.mxu3 %v5941_v26 }
 0x285   : > { %2502 = vst [vmem:[#allocation2 + $0x60] sm:$0xff] %v2438_v12 }
 0x286   : > { %v2274_v30 = vpop.f32.mrf.mxu2  ;;  %v2098_v33 = vpop.f32.mrf.mxu0 }
 0x287   : > { %v2275_v24 = vadd.f32 %v2274_v30, %v2186_v52  ;;  %v2363_v22 = vpop.f32.mrf.mxu3  ;;  %v2187_v27 = vpop.f32.mrf.mxu1 }
 0x288   : > { %v2188_v44 = vadd.f32 %v2187_v27, %v2098_v33 }
 0x289   : > { %v2364_v42 = vadd.f32 %v2363_v22, %v2275_v24  ;;  %v972_v24 = vld [vmem:[#allocation2] sm:$0xff] }
 0x28b   : > { %v2440_v20 = vadd.f32 %v2364_v42, %v960_v28 }
 0x28d   : > { %2504 = vst [vmem:[#allocation2 + $0x188] sm:$0xff] %v2440_v20 }
 0x28e   : > { %v2276_v55 = vpop.f32.mrf.mxu2  ;;  %v2101_v63 = vpop.f32.mrf.mxu0 }
 0x28f   : > { %v2277_v59 = vadd.f32 %v2276_v55, %v2188_v44  ;;  %v2365_v45 = vpop.f32.mrf.mxu3  ;;  %v2190_v46 = vpop.f32.mrf.mxu1 }
 0x290   : > { %v2191_v58 = vadd.f32 %v2190_v46, %v2101_v63 }
 0x291   : > { %v2366_v10 = vadd.f32 %v2365_v45, %v2277_v59  ;;  %2140 = vmatmul.bf16.gmra.mxu0 %v5161_v19 }
 0x292   : > { %2229 = vmatmul.bf16.gmra.mxu1 %v5942_v21 }
 0x293   : > { %v2442_v49 = vadd.f32 %v2366_v10, %v962_v4  ;;  %2318 = vmatmul.bf16.gmra.mxu2 %v5943_v9  ;;  %v976_v10 = vld [vmem:[#allocation2 + $0x1d0] sm:$0xff] }
 0x294   : > { %2407 = vmatmul.bf16.gmra.mxu3 %v5944_v36 }
 0x295   : > { %2506 = vst [vmem:[#allocation2 + $0x140] sm:$0xff] %v2442_v49 }
 0x296   : > { %v2279_v61 = vpop.f32.mrf.mxu2  ;;  %v2103_v1 = vpop.f32.mrf.mxu0 }
 0x297   : > { %v2280_v37 = vadd.f32 %v2279_v61, %v2191_v58  ;;  %v2368_v62 = vpop.f32.mrf.mxu3  ;;  %v2192_v6 = vpop.f32.mrf.mxu1 }
 0x298   : > { %v2193_v41 = vadd.f32 %v2192_v6, %v2103_v1  ;;  %v978_v1 = vld [vmem:[#allocation2 + $0xc8] sm:$0xff] }
 0x299   : > { %v2369_v43 = vadd.f32 %v2368_v62, %v2280_v37 }
 0x29b   : > { %v2444_v13 = vadd.f32 %v2369_v43, %v964_v11 }
 0x29d   : > { %2508 = vst [vmem:[#allocation2 + $0x1a8] sm:$0xff] %v2444_v13 }
 0x29e   : > { %v2281_v19 = vpop.f32.mrf.mxu2  ;;  %v2106_v34 = vpop.f32.mrf.mxu0 }
 0x29f   : > { %v2282_v16 = vadd.f32 %v2281_v19, %v2193_v41  ;;  %v2370_v48 = vpop.f32.mrf.mxu3  ;;  %v2195_v56 = vpop.f32.mrf.mxu1 }
 0x2a0   : > { %v2196_v25 = vadd.f32 %v2195_v56, %v2106_v34  ;;  %v980_v34 = vld [vmem:[#allocation2 + $0x1f8] sm:$0xff] }
 0x2a1   : > { %v2371_v18 = vadd.f32 %v2370_v48, %v2282_v16  ;;  %2145 = vmatmul.bf16.gmra.mxu0 %v5238_v35 }
 0x2a2   : > { %2234 = vmatmul.bf16.gmra.mxu1 %v5240_v2  ;;  %v970_v2 = vld [vmem:[#allocation2 + $0x30] sm:$0xff] }
 0x2a3   : > { %v2446_v29 = vadd.f32 %v2371_v18, %v966_v51  ;;  %2323 = vmatmul.bf16.gmra.mxu2 %v5242_v23 }
 0x2a4   : > { %2412 = vmatmul.bf16.gmra.mxu3 %v5252_v31 }
 0x2a5   : > { %2510 = vst [vmem:[#allocation2 + $0x28] sm:$0xff] %v2446_v29 }
 0x2a6   : > { %v2284_v17 = vpop.f32.mrf.mxu2  ;;  %v2108_v32 = vpop.f32.mrf.mxu0 }
 0x2a7   : > { %v2285_v50 = vadd.f32 %v2284_v17, %v2196_v25  ;;  %v2373_v5 = vpop.f32.mrf.mxu3  ;;  %v2197_v53 = vpop.f32.mrf.mxu1 }
 0x2a8   : > { %v2198_v54 = vadd.f32 %v2197_v53, %v2108_v32  ;;  %v982_v32 = vld [vmem:[#allocation2 + $0x128] sm:$0xff] }
 0x2a9   : > { %v2374_v8 = vadd.f32 %v2373_v5, %v2285_v50 }
 0x2ab   : > { %v2448_v38 = vadd.f32 %v2374_v8, %v968_v3 }
 0x2ad   : > { %2512 = vst [vmem:[#allocation2 + $0xf8] sm:$0xff] %v2448_v38 }
 0x2ae   : > { %v2286_v35 = vpop.f32.mrf.mxu2  ;;  %v2111_v47 = vpop.f32.mrf.mxu0 }
 0x2af   : > { %v2287_v57 = vadd.f32 %v2286_v35, %v2198_v54  ;;  %v2375_v14 = vpop.f32.mrf.mxu3  ;;  %v2200_v12 = vpop.f32.mrf.mxu1 }
 0x2b0   : > { %v2201_v52 = vadd.f32 %v2200_v12, %v2111_v47  ;;  %v984_v47 = vld [vmem:[#allocation2 + $0x1f0] sm:$0xff] }
 0x2b1   : > { %v2376_v23 = vadd.f32 %v2375_v14, %v2287_v57  ;;  %2150 = vmatmul.bf16.gmra.mxu0 %v5307_v0 }
 0x2b2   : > { %2239 = vmatmul.bf16.gmra.mxu1 %v5309_v40  ;;  %v974_v40 = vld [vmem:[#allocation2 + $0x8] sm:$0xff] }
 0x2b3   : > { %v2450_v31 = vadd.f32 %v2376_v23, %v970_v2  ;;  %2328 = vmatmul.bf16.gmra.mxu2 %v5311_v39 }
 0x2b4   : > { %2417 = vmatmul.bf16.gmra.mxu3 %v5313_v7 }
 0x2b5   : > { %2514 = vst [vmem:[#allocation2 + $0x30] sm:$0xff] %v2450_v31 }
 0x2b6   : > { %v2289_v60 = vpop.f32.mrf.mxu2  ;;  %v2113_v30 = vpop.f32.mrf.mxu0 }
 0x2b7   : > { %v2290_v15 = vadd.f32 %v2289_v60, %v2201_v52  ;;  %v2378_v26 = vpop.f32.mrf.mxu3  ;;  %v2202_v22 = vpop.f32.mrf.mxu1 }
 0x2b8   : > { %v2203_v27 = vadd.f32 %v2202_v22, %v2113_v30  ;;  %v986_v30 = vld [vmem:[#allocation2 + $0x78] sm:$0xff] }
 0x2b9   : > { %v2379_v33 = vadd.f32 %v2378_v26, %v2290_v15 }
 0x2bb   : > { %v2452_v28 = vadd.f32 %v2379_v33, %v972_v24 }
 0x2bd   : > { %2516 = vst [vmem:[#allocation2] sm:$0xff] %v2452_v28 }
 0x2be   : > { %v2291_v0 = vpop.f32.mrf.mxu2  ;;  %v2116_v44 = vpop.f32.mrf.mxu0 }
 0x2bf   : > { %v2292_v42 = vadd.f32 %v2291_v0, %v2203_v27  ;;  %v2380_v20 = vpop.f32.mrf.mxu3  ;;  %v2205_v55 = vpop.f32.mrf.mxu1 }
 0x2c0   : > { %v2206_v7 = vadd.f32 %v2205_v55, %v2116_v44  ;;  %v988_v44 = vld [vmem:[#allocation2 + $0x90] sm:$0xff] }
 0x2c1   : > { %v2381_v39 = vadd.f32 %v2380_v20, %v2292_v42 }
 0x2c3   : > { %v2454_v59 = vadd.f32 %v2381_v39, %v974_v40 }
 0x2c5   : > { %2518 = vst [vmem:[#allocation2 + $0x8] sm:$0xff] %v2454_v59 }
 0x2c6   : > { %v2294_v45 = vpop.f32.mrf.mxu2  ;;  %v2118_v46 = vpop.f32.mrf.mxu0 }
 0x2c7   : > { %v2295_v63 = vadd.f32 %v2294_v45, %v2206_v7  ;;  %v2383_v4 = vpop.f32.mrf.mxu3  ;;  %v2207_v49 = vpop.f32.mrf.mxu1 }
 0x2c8   : > { %v2208_v9 = vadd.f32 %v2207_v49, %v2118_v46  ;;  %v990_v46 = vld [vmem:[#allocation2 + $0xd0] sm:$0xff] }
 0x2c9   : > { %v2384_v58 = vadd.f32 %v2383_v4, %v2295_v63 }
 0x2cb   : > { %v2456_v21 = vadd.f32 %v2384_v58, %v976_v10 }
 0x2cd   : > { %2520 = vst [vmem:[#allocation2 + $0x1d0] sm:$0xff] %v2456_v21 }
 0x2ce   : > { %v2296_v36 = vpop.f32.mrf.mxu2  ;;  %v2121_v62 = vpop.f32.mrf.mxu0 }
 0x2cf   : > { %v2297_v61 = vadd.f32 %v2296_v36, %v2208_v9  ;;  %v2385_v37 = vpop.f32.mrf.mxu3  ;;  %v2210_v11 = vpop.f32.mrf.mxu1 }
 0x2d0   : > { %v2211_v13 = vadd.f32 %v2210_v11, %v2121_v62  ;;  %v992_v62 = vld [vmem:[#allocation2 + $0x88] sm:$0xff] }
 0x2d1   : > { %v2386_v6 = vadd.f32 %v2385_v37, %v2297_v61 }
 0x2d3   : > { %v2458_v43 = vadd.f32 %v2386_v6, %v978_v1 }
 0x2d5   : > { %2522 = vst [vmem:[#allocation2 + $0xc8] sm:$0xff] %v2458_v43 }
 0x2d6   : > { %v2299_v41 = vpop.f32.mrf.mxu2  ;;  %v2123_v48 = vpop.f32.mrf.mxu0 }
 0x2d7   : > { %v2300_v19 = vadd.f32 %v2299_v41, %v2211_v13  ;;  %v2388_v16 = vpop.f32.mrf.mxu3  ;;  %v2212_v51 = vpop.f32.mrf.mxu1 }
 0x2d8   : > { %v2213_v29 = vadd.f32 %v2212_v51, %v2123_v48  ;;  %v994_v48 = vld [vmem:[#allocation2 + $0x1c8] sm:$0xff] }
 0x2d9   : > { %v2389_v56 = vadd.f32 %v2388_v16, %v2300_v19 }
 0x2db   : > { %v2460_v18 = vadd.f32 %v2389_v56, %v980_v34 }
 0x2dd   : > { %2524 = vst [vmem:[#allocation2 + $0x1f8] sm:$0xff] %v2460_v18 }
 0x2de   : > { %v2301_v25 = vpop.f32.mrf.mxu2  ;;  %v2126_v5 = vpop.f32.mrf.mxu0 }
 0x2df   : > { %v2302_v17 = vadd.f32 %v2301_v25, %v2213_v29  ;;  %v2390_v50 = vpop.f32.mrf.mxu3  ;;  %v2215_v3 = vpop.f32.mrf.mxu1 }
 0x2e0   : > { %v2216_v38 = vadd.f32 %v2215_v3, %v2126_v5  ;;  %v996_v5 = vld [vmem:[#allocation2 + $0x178] sm:$0xff] }
 0x2e1   : > { %v2391_v53 = vadd.f32 %v2390_v50, %v2302_v17 }
 0x2e3   : > { %v2462_v8 = vadd.f32 %v2391_v53, %v982_v32 }
 0x2e5   : > { %2526 = vst [vmem:[#allocation2 + $0x128] sm:$0xff] %v2462_v8 }
 0x2e6   : > { %v2304_v54 = vpop.f32.mrf.mxu2  ;;  %v2128_v14 = vpop.f32.mrf.mxu0 }
 0x2e7   : > { %v2305_v35 = vadd.f32 %v2304_v54, %v2216_v38  ;;  %v2393_v57 = vpop.f32.mrf.mxu3  ;;  %v2217_v2 = vpop.f32.mrf.mxu1 }
 0x2e8   : > { %v2218_v31 = vadd.f32 %v2217_v2, %v2128_v14  ;;  %v998_v14 = vld [vmem:[#allocation2 + $0x190] sm:$0xff] }
 0x2e9   : > { %v2394_v12 = vadd.f32 %v2393_v57, %v2305_v35 }
 0x2eb   : > { %v2464_v23 = vadd.f32 %v2394_v12, %v984_v47 }
 0x2ed   : > { %2528 = vst [vmem:[#allocation2 + $0x1f0] sm:$0xff] %v2464_v23 }
 0x2ee   : > { %v2306_v52 = vpop.f32.mrf.mxu2  ;;  %v2131_v26 = vpop.f32.mrf.mxu0 }
 0x2ef   : > { %v2307_v60 = vadd.f32 %v2306_v52, %v2218_v31  ;;  %v2395_v15 = vpop.f32.mrf.mxu3  ;;  %v2220_v24 = vpop.f32.mrf.mxu1 }
 0x2f0   : > { %v2221_v28 = vadd.f32 %v2220_v24, %v2131_v26  ;;  %v1000_v26 = vld [vmem:[#allocation2 + $0x38] sm:$0xff] }
 0x2f1   : > { %v2396_v22 = vadd.f32 %v2395_v15, %v2307_v60 }
 0x2f3   : > { %v2466_v33 = vadd.f32 %v2396_v22, %v986_v30 }
 0x2f5   : > { %2530 = vst [vmem:[#allocation2 + $0x78] sm:$0xff] %v2466_v33 }
 0x2f6   : > { %v2309_v27 = vpop.f32.mrf.mxu2  ;;  %v2133_v20 = vpop.f32.mrf.mxu0 }
 0x2f7   : > { %v2310_v0 = vadd.f32 %v2309_v27, %v2221_v28  ;;  %v2398_v42 = vpop.f32.mrf.mxu3  ;;  %v2222_v40 = vpop.f32.mrf.mxu1 }
 0x2f8   : > { %v2223_v59 = vadd.f32 %v2222_v40, %v2133_v20 }
 0x2f9   : > { %v2399_v55 = vadd.f32 %v2398_v42, %v2310_v0  ;;  %v1002_v42 = vld [vmem:[#allocation2 + $0x1c0] sm:$0xff] }
 0x2fb   : > { %v2468_v39 = vadd.f32 %v2399_v55, %v988_v44 }
 0x2fd   : > { %2532 = vst [vmem:[#allocation2 + $0x90] sm:$0xff] %v2468_v39 }
 0x2fe   : > { %v2311_v7 = vpop.f32.mrf.mxu2  ;;  %v2136_v4 = vpop.f32.mrf.mxu0 }
 0x2ff   : > { %v2312_v45 = vadd.f32 %v2311_v7, %v2223_v59  ;;  %v2400_v63 = vpop.f32.mrf.mxu3  ;;  %v2225_v10 = vpop.f32.mrf.mxu1 }
 0x300   : > { %v2226_v21 = vadd.f32 %v2225_v10, %v2136_v4 }
 0x301   : > { %v2401_v49 = vadd.f32 %v2400_v63, %v2312_v45  ;;  %v1004_v63 = vld [vmem:[#allocation2 + $0x10] sm:$0xff] }
 0x303   : > { %v2470_v58 = vadd.f32 %v2401_v49, %v990_v46 }
 0x305   : > { %2534 = vst [vmem:[#allocation2 + $0xd0] sm:$0xff] %v2470_v58 }
 0x306   : > { %v2314_v9 = vpop.f32.mrf.mxu2  ;;  %v2138_v37 = vpop.f32.mrf.mxu0 }
 0x307   : > { %v2315_v36 = vadd.f32 %v2314_v9, %v2226_v21  ;;  %v2403_v61 = vpop.f32.mrf.mxu3  ;;  %v2227_v1 = vpop.f32.mrf.mxu1 }
 0x308   : > { %v2228_v43 = vadd.f32 %v2227_v1, %v2138_v37 }
 0x309   : > { %v2404_v11 = vadd.f32 %v2403_v61, %v2315_v36  ;;  %v1006_v36 = vld [vmem:[#allocation2 + $0xa0] sm:$0xff] }
 0x30b   : > { %v2472_v6 = vadd.f32 %v2404_v11, %v992_v62 }
 0x30d   : > { %2536 = vst [vmem:[#allocation2 + $0x88] sm:$0xff] %v2472_v6 }
 0x30e   : > { %v2316_v13 = vpop.f32.mrf.mxu2  ;;  %v2141_v16 = vpop.f32.mrf.mxu0 }
 0x30f   : > { %v2317_v41 = vadd.f32 %v2316_v13, %v2228_v43  ;;  %v2405_v19 = vpop.f32.mrf.mxu3  ;;  %v2230_v34 = vpop.f32.mrf.mxu1 }
 0x310   : > { %v2231_v18 = vadd.f32 %v2230_v34, %v2141_v16 }
 0x311   : > { %v2406_v51 = vadd.f32 %v2405_v19, %v2317_v41 }
 0x313   : > { %v2474_v56 = vadd.f32 %v2406_v51, %v994_v48 }
 0x315   : > { %2538 = vst [vmem:[#allocation2 + $0x1c8] sm:$0xff] %v2474_v56 }
 0x316   : > { %v2319_v29 = vpop.f32.mrf.mxu2  ;;  %v2143_v50 = vpop.f32.mrf.mxu0 }
 0x317   : > { %v2320_v25 = vadd.f32 %v2319_v29, %v2231_v18  ;;  %v2408_v17 = vpop.f32.mrf.mxu3  ;;  %v2232_v32 = vpop.f32.mrf.mxu1 }
 0x318   : > { %v2233_v8 = vadd.f32 %v2232_v32, %v2143_v50 }
 0x319   : > { %v2409_v3 = vadd.f32 %v2408_v17, %v2320_v25 }
 0x31b   : > { %v2476_v53 = vadd.f32 %v2409_v3, %v996_v5 }
 0x31d   : > { %2540 = vst [vmem:[#allocation2 + $0x178] sm:$0xff] %v2476_v53 }
 0x31e   : > { %v2321_v38 = vpop.f32.mrf.mxu2  ;;  %v2146_v57 = vpop.f32.mrf.mxu0 }
 0x31f   : > { %v2322_v54 = vadd.f32 %v2321_v38, %v2233_v8  ;;  %v2410_v35 = vpop.f32.mrf.mxu3  ;;  %v2235_v47 = vpop.f32.mrf.mxu1 }
 0x320   : > { %v2236_v23 = vadd.f32 %v2235_v47, %v2146_v57 }
 0x321   : > { %v2411_v2 = vadd.f32 %v2410_v35, %v2322_v54 }
 0x323   : > { %v2478_v12 = vadd.f32 %v2411_v2, %v998_v14 }
 0x325   : > { %2542 = vst [vmem:[#allocation2 + $0x190] sm:$0xff] %v2478_v12 }
 0x326   : > { %v2324_v31 = vpop.f32.mrf.mxu2  ;;  %v2148_v15 = vpop.f32.mrf.mxu0 }
 0x327   : > { %v2325_v52 = vadd.f32 %v2324_v31, %v2236_v23  ;;  %v2413_v60 = vpop.f32.mrf.mxu3  ;;  %v2237_v30 = vpop.f32.mrf.mxu1 }
 0x328   : > { %v2238_v33 = vadd.f32 %v2237_v30, %v2148_v15 }
 0x329   : > { %v2414_v24 = vadd.f32 %v2413_v60, %v2325_v52 }
 0x32b   : > { %v2480_v22 = vadd.f32 %v2414_v24, %v1000_v26 }
 0x32d   : > { %2544 = vst [vmem:[#allocation2 + $0x38] sm:$0xff] %v2480_v22 }
 0x32e   : > { %v2326_v28 = vpop.f32.mrf.mxu2  ;;  %v2151_v20 = vpop.f32.mrf.mxu0 }
 0x32f   : > { %v2327_v27 = vadd.f32 %v2326_v28, %v2238_v33  ;;  %v2415_v0 = vpop.f32.mrf.mxu3  ;;  %v2240_v44 = vpop.f32.mrf.mxu1 }
 0x330   : > { %v2241_v39 = vadd.f32 %v2240_v44, %v2151_v20 }
 0x331   : > { %v2416_v40 = vadd.f32 %v2415_v0, %v2327_v27 }
 0x333   : > { %v2482_v55 = vadd.f32 %v2416_v40, %v1002_v42 }
 0x335   : > { %2546 = vst [vmem:[#allocation2 + $0x1c0] sm:$0xff] %v2482_v55 }
 0x336   : > { %v2329_v59 = vpop.f32.mrf.mxu2  ;;  %v2153_v46 = vpop.f32.mrf.mxu0 }
 0x337   : > { %v2330_v7 = vadd.f32 %v2329_v59, %v2241_v39  ;;  %v2418_v45 = vpop.f32.mrf.mxu3  ;;  %v2242_v10 = vpop.f32.mrf.mxu1 }
 0x338   : > { %v2243_v58 = vadd.f32 %v2242_v10, %v2153_v46 }
 0x339   : > { %v2419_v4 = vadd.f32 %v2418_v45, %v2330_v7 }
 0x33b   : > { %v2484_v49 = vadd.f32 %v2419_v4, %v1004_v63 }
 0x33d   : > { %2548 = vst [vmem:[#allocation2 + $0x10] sm:$0xff] %v2484_v49 }
 0x33e   : > { %v2331_v21 = vpop.f32.mrf.mxu2 }
 0x33f   : > { %v2332_v9 = vadd.f32 %v2331_v21, %v2243_v58  ;;  %v2420_v61 = vpop.f32.mrf.mxu3 }
 0x341   : > { %v2421_v37 = vadd.f32 %v2420_v61, %v2332_v9  ;;  %2554 = sbr.rel (%p3207_p6) target bundleno = 907 (0x38b), region = 56 }
 0x343   : > { %v2486_v62 = vadd.f32 %v2421_v37, %v1006_v36 }
 0x345   : > { %2550 = vst [vmem:[#allocation2 + $0xa0] sm:$0xff] %v2486_v62 }
 0x346   : > { %v2555_v1 = vld [vmem:[#allocation2 + $0xb0] sm:$0xff]  ;;  %v2619_v11 = vld [vmem:[%s5946_s27] sm:$0x3]  ;;  %v2557_v41 = vld [vmem:[#allocation2 + $0xd8] sm:$0xff] }
 0x347   : > { %v2556_v6 = vld [vmem:[#allocation2 + $0x1b0] sm:$0xff]  ;;  %v5387_v43 = vperm.slane %v2619_v11, 0  ;;  %v5389_v13 = vperm.slane %v2619_v11, 1  ;;  %v2558_v19 = vld [vmem:[#allocation2 + $0x18] sm:$0xff]  ;;  %v2560_v56 = vld [vmem:[#allocation2 + $0x168] sm:$0xff] }
 0x348   : > { %v2559_v16 = vld [vmem:[#allocation2 + $0x50] sm:$0xff]  ;;  %v2562_v17 = vld [vmem:[#allocation2 + $0x48] sm:$0xff]  ;;  %v2563_v5 = vld [vmem:[#allocation2 + $0x180] sm:$0xff] }
 0x349   : > { %v2625_v48 = vadd.f32 %v5387_v43, %v2555_v1  ;;  %v2626_v34 = vadd.f32 %v5389_v13, %v2556_v6  ;;  %v2627_v51 = vadd.f32 %v5387_v43, %v2557_v41  ;;  %v2628_v18 = vadd.f32 %v5389_v13, %v2558_v19  ;;  %v2561_v29 = vld [vmem:[#allocation2 + $0x130] sm:$0xff]  ;;  %v2565_v8 = vld [vmem:[#allocation2 + $0x118] sm:$0xff]  ;;  %v2567_v57 = vld [vmem:[#allocation2 + $0x120] sm:$0xff] }
 0x34a   : > { %v2629_v25 = vadd.f32 %v5387_v43, %v2559_v16  ;;  %v2630_v50 = vadd.f32 %v5389_v13, %v2560_v56  ;;  %v2631_v32 = vadd.f32 %v5387_v43, %v2561_v29  ;;  %v2564_v3 = vld [vmem:[#allocation2 + $0x110] sm:$0xff]  ;;  %v2632_v53 = vadd.f32 %v5389_v13, %v2562_v17  ;;  %v2566_v54 = vld [vmem:[#allocation2 + $0x98] sm:$0xff]  ;;  %v2569_v12 = vld [vmem:[#allocation2 + $0x108] sm:$0xff] }
 0x34b   : > { %2689 = vst [vmem:[%s3916_s7] sm:$0xff] %v2625_v48  ;;  %v2633_v38 = vadd.f32 %v5387_v43, %v2563_v5  ;;  %v2634_v35 = vadd.f32 %v5389_v13, %v2564_v3  ;;  %v2635_v14 = vadd.f32 %v5387_v43, %v2565_v8  ;;  %v2568_v47 = vld [vmem:[#allocation2 + $0x150] sm:$0xff]  ;;  %v2636_v2 = vadd.f32 %v5389_v13, %v2566_v54  ;;  %v2570_v31 = vld [vmem:[#allocation2 + $0x60] sm:$0xff]  ;;  %v2572_v26 = vld [vmem:[#allocation2 + $0x188] sm:$0xff] }
 0x34c   : > { %2690 = vst [vmem:[%s3916_s7 + $0x8] sm:$0xff] %v2626_v34  ;;  %v2637_v23 = vadd.f32 %v5387_v43, %v2567_v57  ;;  %v2638_v52 = vadd.f32 %v5389_v13, %v2568_v47  ;;  %v2571_v60 = vld [vmem:[#allocation2 + $0xe0] sm:$0xff]  ;;  %v2639_v15 = vadd.f32 %v5387_v43, %v2569_v12  ;;  %v2640_v30 = vadd.f32 %v5389_v13, %v2570_v31  ;;  %v2573_v24 = vld [vmem:[#allocation2 + $0x138] sm:$0xff]  ;;  %v2576_v42 = vld [vmem:[#allocation2 + $0x1a8] sm:$0xff] }
 0x34d   : > { %2691 = vst [vmem:[%s3916_s7 + $0x10] sm:$0xff] %v2627_v51  ;;  %v2641_v22 = vadd.f32 %v5387_v43, %v2571_v60  ;;  %v2574_v33 = vld [vmem:[#allocation2 + $0x140] sm:$0xff]  ;;  %v2642_v28 = vadd.f32 %v5389_v13, %v2572_v26  ;;  %v2643_v0 = vadd.f32 %v5387_v43, %v2573_v24  ;;  %v2577_v44 = vld [vmem:[#allocation2 + $0x1b8] sm:$0xff]  ;;  %v2578_v55 = vld [vmem:[#allocation2 + $0x28] sm:$0xff]  ;;  %v2646_v39 = vadd.f32 %v5389_v13, %v2576_v42 }
 0x34e   : > { %2692 = vst [vmem:[%s3916_s7 + $0x18] sm:$0xff] %v2628_v18  ;;  %v2575_v27 = vld [vmem:[#allocation2 + $0x80] sm:$0xff]  ;;  %v2644_v20 = vadd.f32 %v5389_v13, %v2574_v33  ;;  %v2579_v59 = vld [vmem:[#allocation2 + $0x1e8] sm:$0xff]  ;;  %v2647_v7 = vadd.f32 %v5387_v43, %v2577_v44  ;;  %v2580_v45 = vld [vmem:[#allocation2 + $0xf8] sm:$0xff]  ;;  %v2648_v63 = vadd.f32 %v5389_v13, %v2578_v55 }
 0x34f   : > { %2693 = vst [vmem:[%s3916_s7 + $0x20] sm:$0xff] %v2629_v25  ;;  %v2645_v40 = vadd.f32 %v5387_v43, %v2575_v27  ;;  %v2581_v4 = vld [vmem:[#allocation2 + $0x160] sm:$0xff]  ;;  %v2649_v46 = vadd.f32 %v5387_v43, %v2579_v59  ;;  %v2582_v10 = vld [vmem:[#allocation2 + $0x30] sm:$0xff]  ;;  %v2650_v49 = vadd.f32 %v5389_v13, %v2580_v45  ;;  %v2586_v62 = vld [vmem:[#allocation2 + $0x8] sm:$0xff] }
 0x350   : > { %2694 = vst [vmem:[%s3916_s7 + $0x28] sm:$0xff] %v2630_v50  ;;  %v2583_v58 = vld [vmem:[#allocation2 + $0x1e0] sm:$0xff]  ;;  %v2651_v21 = vadd.f32 %v5387_v43, %v2581_v4  ;;  %v2652_v36 = vadd.f32 %v5389_v13, %v2582_v10  ;;  %v2585_v61 = vld [vmem:[#allocation2 + $0xf0] sm:$0xff]  ;;  %v2587_v11 = vld [vmem:[#allocation2 + $0x148] sm:$0xff]  ;;  %v2656_v19 = vadd.f32 %v5389_v13, %v2586_v62 }
 0x351   : > { %2695 = vst [vmem:[%s3916_s7 + $0x30] sm:$0xff] %v2631_v32  ;;  %v2584_v9 = vld [vmem:[#allocation2] sm:$0xff]  ;;  %v2653_v37 = vadd.f32 %v5387_v43, %v2583_v58  ;;  %v2655_v6 = vadd.f32 %v5387_v43, %v2585_v61  ;;  %v2588_v41 = vld [vmem:[#allocation2 + $0x1d0] sm:$0xff]  ;;  %v2657_v48 = vadd.f32 %v5387_v43, %v2587_v11  ;;  %v2590_v34 = vld [vmem:[#allocation2 + $0xc8] sm:$0xff] }
 0x352   : > { %2696 = vst [vmem:[%s3916_s7 + $0x38] sm:$0xff] %v2632_v53  ;;  %v2654_v1 = vadd.f32 %v5389_v13, %v2584_v9  ;;  %v2589_v16 = vld [vmem:[#allocation2 + $0x100] sm:$0xff]  ;;  %v2658_v51 = vadd.f32 %v5389_v13, %v2588_v41  ;;  %v2592_v29 = vld [vmem:[#allocation2 + $0x1f8] sm:$0xff]  ;;  %v2660_v25 = vadd.f32 %v5389_v13, %v2590_v34  ;;  %v2594_v5 = vld [vmem:[#allocation2 + $0x128] sm:$0xff] }
 0x353   : > { %2697 = vst [vmem:[%s3916_s7 + $0x40] sm:$0xff] %v2633_v38  ;;  %v2591_v56 = vld [vmem:[#allocation2 + $0x40] sm:$0xff]  ;;  %v2659_v18 = vadd.f32 %v5387_v43, %v2589_v16  ;;  %v2662_v32 = vadd.f32 %v5389_v13, %v2592_v29  ;;  %v2596_v8 = vld [vmem:[#allocation2 + $0x1f0] sm:$0xff]  ;;  %v2664_v38 = vadd.f32 %v5389_v13, %v2594_v5  ;;  %v2597_v54 = vld [vmem:[#allocation2 + $0xe8] sm:$0xff] }
 0x354   : > { %2698 = vst [vmem:[%s3916_s7 + $0x48] sm:$0xff] %v2634_v35  ;;  %v2593_v17 = vld [vmem:[#allocation2 + $0x20] sm:$0xff]  ;;  %v2661_v50 = vadd.f32 %v5387_v43, %v2591_v56  ;;  %v2598_v57 = vld [vmem:[#allocation2 + $0x78] sm:$0xff]  ;;  %v2599_v47 = vld [vmem:[#allocation2 + $0x70] sm:$0xff] }
 0x355   : > { %2699 = vst [vmem:[%s3916_s7 + $0x50] sm:$0xff] %v2635_v14  ;;  %v2595_v3 = vld [vmem:[#allocation2 + $0x1a0] sm:$0xff]  ;;  %v2663_v53 = vadd.f32 %v5387_v43, %v2593_v17  ;;  %v2666_v14 = vadd.f32 %v5389_v13, %v2596_v8  ;;  %v2600_v12 = vld [vmem:[#allocation2 + $0x90] sm:$0xff]  ;;  %v2601_v31 = vld [vmem:[#allocation2 + $0x1d8] sm:$0xff] }
 0x356   : > { %2700 = vst [vmem:[%s3916_s7 + $0x58] sm:$0xff] %v2636_v2  ;;  %v2665_v35 = vadd.f32 %v5387_v43, %v2595_v3  ;;  %v2667_v2 = vadd.f32 %v5387_v43, %v2597_v54  ;;  %v2602_v60 = vld [vmem:[#allocation2 + $0xd0] sm:$0xff]  ;;  %v2603_v26 = vld [vmem:[#allocation2 + $0xb8] sm:$0xff]  ;;  %v2604_v24 = vld [vmem:[#allocation2 + $0x88] sm:$0xff] }
 0x357   : > { %2701 = vst [vmem:[%s3916_s7 + $0x60] sm:$0xff] %v2637_v23  ;;  %v2668_v23 = vadd.f32 %v5389_v13, %v2598_v57  ;;  %v2605_v33 = vld [vmem:[#allocation2 + $0xa8] sm:$0xff]  ;;  %v2607_v42 = vld [vmem:[#allocation2 + $0x170] sm:$0xff]  ;;  %v2608_v44 = vld [vmem:[#allocation2 + $0x178] sm:$0xff] }
 0x358   : > { %2702 = vst [vmem:[%s3916_s7 + $0x68] sm:$0xff] %v2638_v52  ;;  %v2669_v52 = vadd.f32 %v5387_v43, %v2599_v47  ;;  %v2606_v27 = vld [vmem:[#allocation2 + $0x1c8] sm:$0xff]  ;;  %v2610_v59 = vld [vmem:[#allocation2 + $0x190] sm:$0xff]  ;;  %v2611_v45 = vld [vmem:[#allocation2 + $0x198] sm:$0xff] }
 0x359   : > { %2703 = vst [vmem:[%s3916_s7 + $0x70] sm:$0xff] %v2639_v15  ;;  %v2670_v15 = vadd.f32 %v5389_v13, %v2600_v12  ;;  %v2609_v55 = vld [vmem:[#allocation2 + $0x68] sm:$0xff]  ;;  %v2612_v4 = vld [vmem:[#allocation2 + $0x38] sm:$0xff]  ;;  %v2613_v10 = vld [vmem:[#allocation2 + $0xc0] sm:$0xff] }
 0x35a   : > { %2704 = vst [vmem:[%s3916_s7 + $0x78] sm:$0xff] %v2640_v30  ;;  %v2671_v30 = vadd.f32 %v5387_v43, %v2601_v31  ;;  %v2614_v58 = vld [vmem:[#allocation2 + $0x1c0] sm:$0xff]  ;;  %v2615_v9 = vld [vmem:[#allocation2 + $0x158] sm:$0xff]  ;;  %v2616_v61 = vld [vmem:[#allocation2 + $0x10] sm:$0xff] }
 0x35b   : > { %2705 = vst [vmem:[%s3916_s7 + $0x80] sm:$0xff] %v2641_v22  ;;  %v2672_v22 = vadd.f32 %v5389_v13, %v2602_v60  ;;  %v2617_v62 = vld [vmem:[#allocation2 + $0x58] sm:$0xff]  ;;  %v2618_v11 = vld [vmem:[#allocation2 + $0xa0] sm:$0xff] }
 0x35c   : > { %2706 = vst [vmem:[%s3916_s7 + $0x88] sm:$0xff] %v2642_v28  ;;  %v2673_v28 = vadd.f32 %v5387_v43, %v2603_v26  ;;  %v2687_v41 = vadd.f32 %v5387_v43, %v2617_v62 }
 0x35d   : > { %2707 = vst [vmem:[%s3916_s7 + $0x90] sm:$0xff] %v2643_v0  ;;  %v2674_v0 = vadd.f32 %v5389_v13, %v2604_v24 }
 0x35e   : > { %2708 = vst [vmem:[%s3916_s7 + $0x98] sm:$0xff] %v2644_v20  ;;  %v2675_v20 = vadd.f32 %v5387_v43, %v2605_v33 }
 0x35f   : > { %2709 = vst [vmem:[%s3916_s7 + $0xa0] sm:$0xff] %v2645_v40  ;;  %v2676_v40 = vadd.f32 %v5389_v13, %v2606_v27 }
 0x360   : > { %2710 = vst [vmem:[%s3916_s7 + $0xa8] sm:$0xff] %v2646_v39  ;;  %v2677_v39 = vadd.f32 %v5387_v43, %v2607_v42 }
 0x361   : > { %2711 = vst [vmem:[%s3916_s7 + $0xb0] sm:$0xff] %v2647_v7  ;;  %v2678_v7 = vadd.f32 %v5389_v13, %v2608_v44 }
 0x362   : > { %2712 = vst [vmem:[%s3916_s7 + $0xb8] sm:$0xff] %v2648_v63  ;;  %v2679_v63 = vadd.f32 %v5387_v43, %v2609_v55 }
 0x363   : > { %2713 = vst [vmem:[%s3916_s7 + $0xc0] sm:$0xff] %v2649_v46  ;;  %v2680_v46 = vadd.f32 %v5389_v13, %v2610_v59 }
 0x364   : > { %2714 = vst [vmem:[%s3916_s7 + $0xc8] sm:$0xff] %v2650_v49  ;;  %v2681_v49 = vadd.f32 %v5387_v43, %v2611_v45 }
 0x365   : > { %2715 = vst [vmem:[%s3916_s7 + $0xd0] sm:$0xff] %v2651_v21  ;;  %v2682_v21 = vadd.f32 %v5389_v13, %v2612_v4 }
 0x366   : > { %2716 = vst [vmem:[%s3916_s7 + $0xd8] sm:$0xff] %v2652_v36  ;;  %v2683_v36 = vadd.f32 %v5387_v43, %v2613_v10 }
 0x367   : > { %2717 = vst [vmem:[%s3916_s7 + $0xe0] sm:$0xff] %v2653_v37  ;;  %v2684_v37 = vadd.f32 %v5389_v13, %v2614_v58 }
 0x368   : > { %2718 = vst [vmem:[%s3916_s7 + $0xe8] sm:$0xff] %v2654_v1  ;;  %v2685_v1 = vadd.f32 %v5387_v43, %v2615_v9 }
 0x369   : > { %2719 = vst [vmem:[%s3916_s7 + $0xf0] sm:$0xff] %v2655_v6  ;;  %v2686_v6 = vadd.f32 %v5389_v13, %v2616_v61 }
 0x36a   : > { %2720 = vst [vmem:[%s3916_s7 + $0xf8] sm:$0xff] %v2656_v19  ;;  %v2688_v19 = vadd.f32 %v5389_v13, %v2618_v11 }
 0x36b   : > { %2721 = vst [vmem:[%s3916_s7 + $0x100] sm:$0xff] %v2657_v48 }
 0x36c   : > { %2722 = vst [vmem:[%s3916_s7 + $0x108] sm:$0xff] %v2658_v51 }
 0x36d   : > { %2723 = vst [vmem:[%s3916_s7 + $0x110] sm:$0xff] %v2659_v18 }
 0x36e   : > { %2724 = vst [vmem:[%s3916_s7 + $0x118] sm:$0xff] %v2660_v25 }
 0x36f   : > { %2725 = vst [vmem:[%s3916_s7 + $0x120] sm:$0xff] %v2661_v50 }
 0x370   : > { %2726 = vst [vmem:[%s3916_s7 + $0x128] sm:$0xff] %v2662_v32 }
 0x371   : > { %2727 = vst [vmem:[%s3916_s7 + $0x130] sm:$0xff] %v2663_v53 }
 0x372   : > { %2728 = vst [vmem:[%s3916_s7 + $0x138] sm:$0xff] %v2664_v38 }
 0x373   : > { %2729 = vst [vmem:[%s3916_s7 + $0x140] sm:$0xff] %v2665_v35 }
 0x374   : > { %2730 = vst [vmem:[%s3916_s7 + $0x148] sm:$0xff] %v2666_v14 }
 0x375   : > { %2731 = vst [vmem:[%s3916_s7 + $0x150] sm:$0xff] %v2667_v2 }
 0x376   : > { %2732 = vst [vmem:[%s3916_s7 + $0x158] sm:$0xff] %v2668_v23 }
 0x377   : > { %2733 = vst [vmem:[%s3916_s7 + $0x160] sm:$0xff] %v2669_v52 }
 0x378   : > { %2734 = vst [vmem:[%s3916_s7 + $0x168] sm:$0xff] %v2670_v15 }
 0x379   : > { %2735 = vst [vmem:[%s3916_s7 + $0x170] sm:$0xff] %v2671_v30 }
 0x37a   : > { %2736 = vst [vmem:[%s3916_s7 + $0x178] sm:$0xff] %v2672_v22 }
 0x37b   : > { %2737 = vst [vmem:[%s3916_s7 + $0x180] sm:$0xff] %v2673_v28 }
 0x37c   : > { %2738 = vst [vmem:[%s3916_s7 + $0x188] sm:$0xff] %v2674_v0 }
 0x37d   : > { %2739 = vst [vmem:[%s3916_s7 + $0x190] sm:$0xff] %v2675_v20 }
 0x37e   : > { %2740 = vst [vmem:[%s3916_s7 + $0x198] sm:$0xff] %v2676_v40 }
 0x37f   : > { %2741 = vst [vmem:[%s3916_s7 + $0x1a0] sm:$0xff] %v2677_v39 }
 0x380   : > { %2742 = vst [vmem:[%s3916_s7 + $0x1a8] sm:$0xff] %v2678_v7 }
 0x381   : > { %2743 = vst [vmem:[%s3916_s7 + $0x1b0] sm:$0xff] %v2679_v63 }
 0x382   : > { %2744 = vst [vmem:[%s3916_s7 + $0x1b8] sm:$0xff] %v2680_v46 }
 0x383   : > { %2745 = vst [vmem:[%s3916_s7 + $0x1c0] sm:$0xff] %v2681_v49 }
 0x384   : > { %2746 = vst [vmem:[%s3916_s7 + $0x1c8] sm:$0xff] %v2682_v21 }
 0x385   : > { %2747 = vst [vmem:[%s3916_s7 + $0x1d0] sm:$0xff] %v2683_v36 }
 0x386   : > { %2748 = vst [vmem:[%s3916_s7 + $0x1d8] sm:$0xff] %v2684_v37 }
 0x387   : > { %2749 = vst [vmem:[%s3916_s7 + $0x1e0] sm:$0xff] %v2685_v1 }
 0x388   : > { %2750 = vst [vmem:[%s3916_s7 + $0x1e8] sm:$0xff] %v2686_v6 }
 0x389   : > { %2751 = vst [vmem:[%s3916_s7 + $0x1f0] sm:$0xff] %v2687_v41 }
 0x38a   : > { %2752 = vst [vmem:[%s3916_s7 + $0x1f8] sm:$0xff] %v2688_v19 }
 0x38b PF: > { %s5947_s8 = sld [smem:[#allocation18_spill]]  ;;  %s2769_s14 = sshll.u32 %s3916_s7, 4  ;;  %s2770_s14 = int_to_ptr.vmem [resolvable:$true] %s2769_s14 }
 0x38c   : > { %s5949_s13 = sld [smem:[#allocation52_spill]]  ;;  %s2754_s11 = scalar_lea.sflag [#allocation5], %s346_s29 }
 0x391   : > { %s3283_s18 = sshll.u32 %s5947_s8, 9 }
 0x392   : > { %s2768_s23 = scalar_lea.hbm %s5949_s13, %s3283_s18  ;;  %s3538_s6 = scalar_lea.hbm %s5949_s13, 1024 }
 0x393   : > { %s2771_s21 = sshll.u32 %s2768_s23, 4  ;;  %s2772_s21 = int_to_ptr.hbm [resolvable:$true] %s2771_s21 }
 0x394   : > { %s3532_s25 = sshra.s32 %s2772_s21, 4  ;;  %s3533_s25 = int_to_ptr.hbm [resolvable:$true] %s3532_s25 }
 0x395   : > { %s3534_s15 = scalar_lea.hbm %s3533_s25, 512  ;;  %p3539_p3 = scmp.lt.s32.totalorder %s3533_s25, %s5949_s13 }
 0x396   : > { %p3535_p8 = scmp.ne.s32.totalorder %s3533_s25, %s3534_s15  ;;  %p3540_p11 = scmp.lt.s32.totalorder %s3538_s6, %s3534_s15 }
 0x398   : > { %p3536_p4 = pnand %p3535_p8, %p3822_p13  ;;  %p3541_p12 = por %p3540_p11, %p3539_p3 }
 0x39a   : > { %p3537_p9 = pneg %p3536_p4 }
 0x39c   : > { %p3542_p0 = pnand %p3541_p12, %p3537_p9 }
 0x39e   : > { %3545 = shalt.err (!%p3542_p0)
}
 0x39f   : > { %s3680_s29 = smov 256   ;;  %s3681_s7 = smov 16  }
 0x3a0   : > { %3290 = dma.vmem_to_hbm [thread:$0]  (%p3822_p13), %s2770_s14, 8192, %s2772_s21, %s2754_s11, %s3680_s29, %s3680_s29, %s3681_s7  }
 0x3a1 PF: > { %s5950_s1 = sld [smem:[#allocation14_spill]]  ;;  %p3307_p1 = scmp.ge.s32.totalorder %s3672_s28, 2 }
 0x3a3   : > { %p3303_p10 = pnand %p3307_p1, %p3830_p5 }
 0x3a5   : > { %p3304_p7 = pneg %p3303_p10 }
 0x3a7   : > { %s2786_s27 = sand.u32 1, %s5950_s1  }
 0x3a8   : > { %s2787_s8 = scalar_lea.sflag [#allocation5], %s2786_s27 }
 0x3a9   : > { %3615 = dma.done.wait (%p3304_p7), %s2787_s8, 8192  }
 0x3aa   : > { %3617 = vsyncadd (%p3304_p7), %s2787_s8, 4294959104  ;;  %s23_s28 = sadd.s32 1, %s3672_s28   ;;  %s5953_s30 = sld [smem:[#allocation15_spill]] }
 0x3ab   : > { %p5541_p2 = scmp.ge.s32.totalorder %s23_s28, 6   ;;  %s5954_s17 = sld [smem:[#allocation22_spill]] }
 0x3ac   : > { %s5955_s9 = sld [smem:[#allocation16_spill]]  ;;  %s5961_s15 = smov %s3624_s16 }
 0x3ad   : > { %s5956_s23 = sld [smem:[#allocation23_spill]]  ;;  %s5963_s18 = smov %s3636_s19 }
 0x3ae   : > { %s5957_s25 = sld [smem:[#allocation19_spill]]  ;;  %s5964_s19 = smov %s3640_s20 }
 0x3af   : > { %s5958_s14 = sld [smem:[#allocation20_spill]]  ;;  %s5965_s20 = smov %s3868_s5 }
 0x3b0   : > { %s5959_s27 = sld [smem:[#allocation21_spill]]  ;;  %s5962_s16 = smov %s5953_s30 }
 0x3b1   : > { %s5966_s21 = smov %s3648_s22  ;;  %s5968_s24 = smov %s3664_s26 }
 0x3b2   : > { %s5967_s22 = smov %s5955_s9  ;;  %22 = sbr.rel (!%p5541_p2) target bundleno = 16 (0x10), region = 116 }
 0x3b5   : > { %s5969_s26 = smov %s5958_s14 }
 0x3b7   :  { %2793 = vsyncpa [#allocation4], 1 }
 0x3b8   :  { %2795 = vsyncpa [#allocation4 + $0x1], 1 }
 0x3b9   :  { %2796 = vsyncpa [#allocation7], 1 }
 0x3ba   :  { %2798 = vsyncpa [#allocation7 + $0x1], 1 }
 0x3bb   :  { %2799 = vsyncpa [#allocation5], 1 }
 0x3bc   :  { %2801 = vsyncpa [#allocation5 + $0x1], 1 }

</bundles_post_ra>
